<compile_context>
chip_gen: v7x
topology: tpu7x:2x2x1
jax: 0.10.0
libtpu: 0.0.40
codegen_flags: <defaults>
</compile_context>

<pallas_src>
import functools
import numpy as np
import jax
import jax.numpy as jnp
from jax import lax
from jax.experimental import pallas as pl
from jax.experimental.pallas import tpu as pltpu

F32 = jnp.float32
NEG_INF = -1e9          # large finite negative: avoids inf-inf NaNs in softmax


# -----------------------------------------------------------------------------
# helpers traced INSIDE the Pallas kernel body
# -----------------------------------------------------------------------------
def _softmax_last(x):
    m = jnp.max(x, axis=-1, keepdims=True)
    e = jnp.exp(x - m)
    return e * pl.reciprocal(jnp.sum(e, axis=-1, keepdims=True), approx=True)


def _softmax_sub(x):                    # softmax over axis 0 (sublane dim)
    m = jnp.max(x, axis=0, keepdims=True)
    e = jnp.exp(x - m)
    return e * pl.reciprocal(jnp.sum(e, axis=0, keepdims=True), approx=True)


def _layer_norm(x, g, b, eps=1e-5):
    mu = jnp.mean(x, axis=-1, keepdims=True)
    var = jnp.mean((x - mu) ** 2, axis=-1, keepdims=True)
    return (x - mu) * lax.rsqrt(var + eps) * g + b


def _dot(a, b):
    return jnp.dot(a, b, preferred_element_type=F32)


def _dot_t(a, b):
    # a @ b.T without materializing a transpose (contract last dims of both)
    return lax.dot_general(a, b, (((1,), (1,)), ((), ())),
                           preferred_element_type=F32)


# -----------------------------------------------------------------------------
# the single fused DrugRec kernel
# -----------------------------------------------------------------------------
def _build_kernel(T, D, S, L, H, n_layers, n_drug, out_w, multi):
    SL = S * L
    hd = D // H
    scale = 1.0 / float(np.sqrt(hd))

    def kernel(*refs):
        it = iter(refs)
        (x_cat, gru_w, gru_b, query_wb, gn_x_in, gn_ff_aug,
         attn_bias, pool_mat, enc_w, enc_b, smile_id, drug_id,
         drug_head, ddi) = [next(it) for _ in range(14)]
        if multi:
            (med, source_map, drug_sub, explore_wbm, eps, dist_w,
             br_w, br_v_bd, inter_wb) = [next(it) for _ in range(9)]
        out_ref = next(it)

        # -------- patient encoder: fused dual GRU + query projection --------
        wih = gru_w[0:2 * D, :]                              # [2D, 6D]
        whh = gru_w[2 * D:4 * D, :]                          # [2D, 6D]
        bih = gru_b[0:1, :]
        bhh = gru_b[1:2, :]
        gi_all = _dot(x_cat[...], wih) + bih                 # [T, 6D] (hoisted)
        h = jnp.zeros((1, 2 * D), F32)
        h_prev = h
        for t in range(T):                                   # static unroll
            gi = gi_all[t:t + 1, :]                          # [1, 6D]
            gh = _dot(h, whh) + bhh                          # [1, 6D]
            r = jax.nn.sigmoid(gi[:, :2 * D] + gh[:, :2 * D])
            z = jax.nn.sigmoid(gi[:, 2 * D:4 * D] + gh[:, 2 * D:4 * D])
            n = jnp.tanh(gi[:, 4 * D:] + r * gh[:, 4 * D:])
            h_prev = h
            h = (1.0 - z) * n + z * h
        qw = query_wb[0:2 * D, :]                            # [2D, D]
        qb = query_wb[2 * D:2 * D + 1, :]                    # [1, D]
        query = _dot(jax.nn.relu(h), qw) + qb                # [1, D]

        # -------- graph network: batched over all S*L positions -------------
        # x0 = emb0 @ ffw + sub  as ONE matmul (identity appended host-side)
        x = _dot(gn_x_in[...], gn_ff_aug[...])               # [SL, D]
        bias = attn_bias[...]                                # [SL, SL] blockdiag
        for l in range(n_layers):
            w_l = enc_w[l]                                   # [4D, 3D]
            b_l = enc_b[l]                                   # [8, 3D]
            wqkv = w_l[0:D, :]                               # [D, 3D]
            wo = w_l[D:2 * D, 0:D]
            w1 = w_l[2 * D:3 * D, 0:D]
            w2 = w_l[3 * D:4 * D, 0:D]
            bqkv = b_l[0:1, :]
            bo, b1, b2 = b_l[1:2, 0:D], b_l[2:3, 0:D], b_l[3:4, 0:D]
            g1, be1 = b_l[4:5, 0:D], b_l[5:6, 0:D]
            g2, be2 = b_l[6:7, 0:D], b_l[7:8, 0:D]

            qkv = _dot(x, wqkv) + bqkv                       # ONE [SL, 3D] matmul
            attn = bo
            for hh in range(H):                              # H == 2 only
                q_h = qkv[:, hh * hd:(hh + 1) * hd] * scale
                k_h = qkv[:, D + hh * hd:D + (hh + 1) * hd]
                v_h = qkv[:, 2 * D + hh * hd:2 * D + (hh + 1) * hd]
                p = _softmax_last(_dot_t(q_h, k_h) + bias)   # [SL, SL]
                ctx = _dot(p, v_h)                           # [SL, hd]
                attn = attn + _dot(ctx, wo[hh * hd:(hh + 1) * hd, :])
            y = _layer_norm(x + attn, g1, be1)               # post-norm
            ff = jax.nn.relu(_dot(y, w1) + b1)
            x = _layer_norm(y + _dot(ff, w2) + b2, g2, be2)

        # masked mean pooling as ONE matmul (weights baked host-side)
        smile_rep = _dot(pool_mat[...], x) + smile_id[...]   # [S, D]
        q_id = drug_id[...]                                  # [n_drug, D]
        drug_attn = _softmax_last(_dot_t(q_id, smile_rep))   # [n_drug, S]
        drug_rep = _dot(drug_attn, smile_rep)                # [n_drug, D]
        ssq = jnp.sum(drug_rep * drug_rep, axis=1, keepdims=True)
        drug_emb = drug_rep * lax.rsqrt(jnp.maximum(ssq, 1e-24)) + q_id

        # -------- drug matching head -----------------------------------------
        dm = jax.nn.sigmoid(_dot_t(query, drug_emb))         # [1, n_drug]
        dout_w = drug_head[0:n_drug, :]
        dout_b = drug_head[n_drug:n_drug + 1, :]
        lnd_g = drug_head[n_drug + 1:n_drug + 2, :]
        lnd_b = drug_head[n_drug + 2:n_drug + 3, :]
        dm = _layer_norm(dm + _dot(dm, dout_w) + dout_b, lnd_g, lnd_b)

        if multi:
            before = _dot(jax.nn.relu(h_prev), qw) + qb
            vary0 = query - before                           # [1, D]
            # distribution(): the reference reuses the *_r weights twice
            w_s = dist_w[0:D, :]
            w_mu = dist_w[D:2 * D, :]
            w_sig = dist_w[2 * D:3 * D, :]
            hrel = jax.nn.relu(_dot(vary0, w_s))
            mu = _dot(hrel, w_mu)
            sg = jnp.exp(_dot(hrel, w_sig))
            eps_v = eps[...]                                 # [2, D]
            vary_r = mu + eps_v[0:1, :] * sg
            vary_e = mu + eps_v[1:2, :] * sg

            # batched branch attention: 0 = repeat, 1 = explore, 2 = inter
            vary_flat = jnp.concatenate([vary_r, vary_e, vary0], axis=1)  # [1,3D]
            wq_bd = br_w[0:3 * D, :]                         # block-diag [3D,3D]
            wk_cat = br_w[3 * D:4 * D, :]                    # [D, 3D]
            bq = br_w[4 * D:4 * D + 1, :]                    # [1, 3D]
            med_v = med[...]                                 # [nb, D]
            wq_all = _dot(vary_flat, wq_bd) + bq             # [1, 3D]
            uh_all = _dot(med_v, wk_cat)                     # [nb, 3D]
            t3 = jnp.tanh(uh_all + wq_all)
            norm3 = _softmax_sub(_dot(t3, br_v_bd[...]))     # [nb, 3], over nb

            p_rep = jnp.sum(norm3[:, 0:1] * source_map[...],
                            axis=0, keepdims=True)           # [1, sub_num]
            exp_feat = jnp.sum(norm3[:, 1:2] * med_v, axis=0, keepdims=True)
            mode_feat = jnp.sum(norm3[:, 2:3] * med_v, axis=0, keepdims=True)

            ds = drug_sub[...]
            rep_prob = jax.nn.sigmoid(_dot_t(p_rep, ds))     # [1, n_drug]
            exp_w = explore_wbm[0:D, :]
            exp_b = explore_wbm[D:D + 1, :]
            exp_mask = explore_wbm[D + 1:D + 2, :]
            p_exp = _softmax_last(_dot(exp_feat, exp_w) + exp_b + exp_mask)
            exp_prob = jax.nn.sigmoid(_dot_t(p_exp, ds))
            p_mode = _softmax_last(_dot(mode_feat, inter_wb[0:D, :])
                                   + inter_wb[D:D + 1, :])   # [1, 2]
            satis = p_mode[:, 0:1] * rep_prob + p_mode[:, 1:2] * exp_prob
        else:
            satis = jnp.ones_like(dm)

        result = satis * dm                                  # [1, n_drug]
        neg = jax.nn.sigmoid(result)
        rate = 0.0005 * jnp.sum(_dot(neg, ddi[...]) * neg,
                                axis=(0, 1), keepdims=True)  # [1, 1]
        pieces = [result, rate]
        pad = out_w - n_drug - 1
        if pad > 0:
            pieces.append(jnp.zeros((1, pad), F32))
        out_ref[...] = jnp.concatenate(pieces, axis=1)       # one dense store

    return kernel


# -----------------------------------------------------------------------------
# wrapper: tiny XLA gathers/concats + one pallas_call
# -----------------------------------------------------------------------------
@functools.partial(jax.jit, static_argnames=('multi',))
def _drugrec_fused(p, static, diag_seq, proc_seq, eps, multi):
    T, D = diag_seq.shape
    S, L = static['padded_sub_ids'].shape
    n_drug = p['drug_emb_id'].shape[0]
    n_layers = p['enc_w'].shape[0]
    H = 2
    out_w = ((n_drug + 1 + 127) // 128) * 128

    x_cat = jnp.concatenate([diag_seq, proc_seq], axis=1).astype(F32)  # [T,2D]
    emb0 = (p['recency_emb'][static['rec_ids']]
            + p['degree_emb'][static['deg_ids']]).reshape(S * L, D)
    sub_e = p['sub_embed'][static['padded_sub_ids']].reshape(S * L, D)
    gn_x_in = jnp.concatenate([emb0, sub_e], axis=1)                   # [SL,2D]

    args = [x_cat, p['gru_w'], p['gru_b'], p['query_wb'],
            gn_x_in, p['gn_ff_aug'],
            static['attn_bias'], static['pool_mat'],
            p['enc_w'], p['enc_b'],
            p['smile_emb_id'], p['drug_emb_id'],
            p['drug_head'], static['ddi_matrix']]
    if multi:
        med = p['sub_embed'][static['sub_indices']]                    # [nb, D]
        explore_wbm = jnp.concatenate([p['explore_wb'],
                                       static['explore_bias']], axis=0)
        args += [med, static['source_map'], static['drug_sub'],
                 explore_wbm, eps, p['dist_w'],
                 p['br_w'], p['br_v_bd'], p['inter_wb']]

    kernel = _build_kernel(T, D, S, L, H, n_layers, n_drug, out_w, multi)
    vmem = pl.BlockSpec(memory_space=pltpu.MemorySpace.VMEM)
    # TODO(synk): if batching multiple patients per step on v7x, add a leading
    # "parallel" grid axis so the second TensorCore is used; single-patient
    # inference keeps grid=() (working set << 1 MiB, one TC is plenty).
    out = pl.pallas_call(
        kernel,
        out_shape=jax.ShapeDtypeStruct((1, out_w), F32),
        in_specs=[vmem] * len(args),
        out_specs=vmem,
    )(*args)
    return out[:, :n_drug], out[0, n_drug]


def drugrec_forward(p, static, input_adm, key):
    # TODO(synk): ragged per-admission code-list gathers (variable-length
    # torch.LongTensor) have no clean Pallas equivalent; done as tiny XLA ops.
    diag_seq = jnp.stack([p['diag_emb'][jnp.asarray(a[0], jnp.int32)].sum(0)
                          for a in input_adm])
    proc_seq = jnp.stack([p['proc_emb'][jnp.asarray(a[1], jnp.int32)].sum(0)
                          for a in input_adm])
    D = diag_seq.shape[1]
    eps = jax.random.normal(key, (2, D), F32)      # two randn(emb_dim) draws
    return _drugrec_fused(p, static, diag_seq, proc_seq, eps,
                          multi=(len(input_adm) != 1))


# -----------------------------------------------------------------------------
# deterministic parameter / static-data construction (host side)
# -----------------------------------------------------------------------------
def _fuse_gru(w_ih_d, w_hh_d, b_ih_d, b_hh_d,
              w_ih_p, w_hh_p, b_ih_p, b_hh_p, D):
    """Fuse two torch-layout GRUs (weights [3D, D], biases [3D]) into one
    block-diagonal recurrence over a [1, 2D] hidden state.  Gate columns are
    ordered [r_d | r_p | z_d | z_p | n_d | n_p]."""
    def weight(w_d, w_p):
        a_d, a_p = w_d.T, w_p.T                     # [D, 3D], cols [r|z|n]
        Z = jnp.zeros((D, D), F32)
        top = jnp.concatenate([a_d[:, :D], Z, a_d[:, D:2 * D], Z,
                               a_d[:, 2 * D:], Z], axis=1)
        bot = jnp.concatenate([Z, a_p[:, :D], Z, a_p[:, D:2 * D],
                               Z, a_p[:, 2 * D:]], axis=1)
        return jnp.concatenate([top, bot], axis=0).astype(F32)

    def bias(b_d, b_p):
        return jnp.concatenate(
            [b_d[:D], b_p[:D], b_d[D:2 * D], b_p[D:2 * D],
             b_d[2 * D:], b_p[2 * D:]]).reshape(1, 6 * D).astype(F32)

    gru_w = jnp.concatenate([weight(w_ih_d, w_ih_p),
                             weight(w_hh_d, w_hh_p)], axis=0)   # [4D, 6D]
    gru_b = jnp.concatenate([bias(b_ih_d, b_ih_p),
                             bias(b_hh_d, b_hh_p)], axis=0)     # [2, 6D]
    return gru_w, gru_b


def make_params(key, vocab_size, D, smile_num, drug_num, sub_num, n_layers=2):
    keys = iter(jax.random.split(key, 64))

    def w(*shape, scale=0.1):
        return (scale * jax.random.normal(next(keys), shape)).astype(F32)

    zeros = lambda *s: jnp.zeros(s, F32)
    ones = lambda *s: jnp.ones(s, F32)

    p = {}
    p['diag_emb'] = w(vocab_size[0], D)
    p['proc_emb'] = w(vocab_size[1], D)
    p['gru_w'], p['gru_b'] = _fuse_gru(
        w(3 * D, D), w(3 * D, D), zeros(3 * D), zeros(3 * D),
        w(3 * D, D), w(3 * D, D), zeros(3 * D), zeros(3 * D), D)
    # query head slab: rows [0:2D] = W, row [2D] = b
    p['query_wb'] = jnp.concatenate([w(2 * D, D), zeros(1, D)], axis=0)
    p['sub_embed'] = w(sub_num, D)
    p['smile_emb_id'] = w(smile_num, D)
    p['recency_emb'] = w(30, D)
    p['degree_emb'] = w(30, D)
    # positional projection augmented with identity: x0 = [emb0|sub] @ [ffw; I]
    p['gn_ff_aug'] = jnp.concatenate([w(D, D), jnp.eye(D, dtype=F32)], axis=0)

    # encoder weight slab [n_layers, 4D, 3D]:
    #   rows [0:D]=Wqkv (3D lanes), [D:2D]=Wo, [2D:3D]=W1, [3D:4D]=W2 (D lanes)
    # encoder bias/LN slab [n_layers, 8, 3D]:
    #   row0 bqkv; rows 1..7 = bo, b1, b2, ln1g, ln1b, ln2g, ln2b (lanes 0:D)
    def pad_lanes(x):
        return jnp.concatenate([x, jnp.zeros((x.shape[0], 2 * D), F32)], axis=1)

    enc_w, enc_b = [], []
    for _ in range(n_layers):
        wqkv = jnp.concatenate([w(D, D), w(D, D), w(D, D)], axis=1)     # [D,3D]
        enc_w.append(jnp.concatenate(
            [wqkv, pad_lanes(w(D, D)), pad_lanes(w(D, D)), pad_lanes(w(D, D))],
            axis=0))
        enc_b.append(jnp.concatenate(
            [zeros(1, 3 * D),
             pad_lanes(zeros(1, D)), pad_lanes(zeros(1, D)),
             pad_lanes(zeros(1, D)), pad_lanes(ones(1, D)),
             pad_lanes(zeros(1, D)), pad_lanes(ones(1, D)),
             pad_lanes(zeros(1, D))], axis=0))
    p['enc_w'] = jnp.stack(enc_w)
    p['enc_b'] = jnp.stack(enc_b)

    p['drug_emb_id'] = w(drug_num, D)
    # drug head slab: rows [0:n_drug]=W_out, then b_out, ln_g, ln_b
    p['drug_head'] = jnp.concatenate(
        [w(drug_num, drug_num), zeros(1, drug_num),
         ones(1, drug_num), zeros(1, drug_num)], axis=0)

    # distribution weights (reference uses the *_r set in both branches):
    # rows [0:D]=W_s, [D:2D]=W_mu, [2D:3D]=W_sigma
    p['dist_w'] = jnp.concatenate([w(D, D), w(D, D), w(D, D)], axis=0)

    # branch attention (0=repeat, 1=explore, 2=inter): block-diag Wq,
    # concatenated Wk, bq row; v as block-diag [3D, 3]
    wq_list = [w(D, D) for _ in range(3)]
    wk_list = [w(D, D) for _ in range(3)]
    v_list = [w(D, 1) for _ in range(3)]
    Z = zeros(D, D)
    wq_bd = jnp.concatenate([
        jnp.concatenate([wq_list[0], Z, Z], axis=1),
        jnp.concatenate([Z, wq_list[1], Z], axis=1),
        jnp.concatenate([Z, Z, wq_list[2]], axis=1)], axis=0)       # [3D, 3D]
    wk_cat = jnp.concatenate(wk_list, axis=1)                       # [D, 3D]
    p['br_w'] = jnp.concatenate([wq_bd, wk_cat, zeros(1, 3 * D)], axis=0)
    z1 = zeros(D, 1)
    p['br_v_bd'] = jnp.concatenate([
        jnp.concatenate([v_list[0], z1, z1], axis=1),
        jnp.concatenate([z1, v_list[1], z1], axis=1),
        jnp.concatenate([z1, z1, v_list[2]], axis=1)], axis=0)      # [3D, 3]

    # explore head: rows [0:D]=W, row D = bias (mask row appended in wrapper)
    p['explore_wb'] = jnp.concatenate([w(D, sub_num), zeros(1, sub_num)], axis=0)
    # inter head: rows [0:D]=W, row D = bias
    p['inter_wb'] = jnp.concatenate([w(D, 2), zeros(1, 2)], axis=0)
    return p


def make_static(drug_num, smile_num, sub_num, his_med):
    # host-side (numpy) equivalents of torch.nonzero / unique / pad_sequence /
    # build_map on the static relation matrices.
    smile_sub = np.zeros((smile_num, sub_num), dtype=np.float32)
    for i in range(smile_num):
        cols = [1 + i, 7 + i]
        if i % 2 == 0:
            cols.append(13 + i // 2)
        for c in cols:
            smile_sub[i, c] = 1.0
    recency = np.zeros_like(smile_sub)
    degree = np.zeros_like(smile_sub)
    for i in range(smile_num):
        for c in np.nonzero(smile_sub[i])[0]:
            recency[i, c] = float((i * 3 + c * 5) % 17 + 1)
            degree[i, c] = float((i * 5 + c * 3) % 19 + 1)
    drug_smile = np.zeros((drug_num, smile_num), dtype=np.float32)
    for d in range(drug_num):
        drug_smile[d, d % smile_num] = 1.0
        drug_smile[d, (d + 2) % smile_num] = 1.0
    drug_sub = ((drug_smile @ smile_sub) != 0).astype(np.float32)
    ddi = np.zeros((drug_num, drug_num), dtype=np.float32)
    for i in range(drug_num):
        for j in range(drug_num):
            if i != j and (i + j) % 3 == 0:
                ddi[i, j] = 1.0

    rows, cols = np.nonzero(smile_sub)
    lens = [int((rows == r).sum()) for r in range(smile_num)]
    L = max(lens)
    padded_sub_ids = np.zeros((smile_num, L), dtype=np.int32)
    rec_ids = np.zeros((smile_num, L), dtype=np.int32)
    deg_ids = np.zeros((smile_num, L), dtype=np.int32)
    rec_vals = recency[np.nonzero(recency)]
    deg_vals = degree[np.nonzero(degree)]
    off = 0
    for r in range(smile_num):
        l = lens[r]
        padded_sub_ids[r, :l] = cols[off:off + l]
        rec_ids[r, :l] = np.argsort(rec_vals[off:off + l], kind='stable')
        deg_ids[r, :l] = np.argsort(deg_vals[off:off + l], kind='stable')
        off += l
    # reference quirk: substructure id 0 counts as padding
    pad_mask = padded_sub_ids == 0
    valid = (~pad_mask).astype(np.float32)
    counts = np.maximum(valid.sum(axis=1, keepdims=True), 1.0)  # guard /0

    SL = smile_num * L
    # block-diagonal additive attention bias (off-block & padded keys masked)
    attn_bias = np.full((SL, SL), NEG_INF, dtype=np.float32)
    # masked-mean pooling matrix with 1/count baked in
    pool_mat = np.zeros((smile_num, SL), dtype=np.float32)
    for s in range(smile_num):
        blk = slice(s * L, (s + 1) * L)
        attn_bias[blk, blk] = np.where(pad_mask[s][None, :], NEG_INF, 0.0)
        pool_mat[s, blk] = valid[s] / counts[s]

    rel = drug_sub[np.asarray(his_med, dtype=np.int64)]
    sub_indices = np.unique(np.nonzero(rel)[1]).astype(np.int32)
    nb = len(sub_indices)
    source_map = np.zeros((nb, sub_num), dtype=np.float32)
    source_map[np.arange(nb), sub_indices] = 1.0
    # NOTE: mirrors the reference quirk: uses the *index values* as weights.
    explore_vals = sub_indices.astype(np.float32) @ source_map
    explore_bias = np.where(explore_vals != 0, NEG_INF,
                            0.0)[None, :].astype(np.float32)

    return dict(
        drug_sub=jnp.asarray(drug_sub),
        ddi_matrix=jnp.asarray(ddi),
        padded_sub_ids=jnp.asarray(padded_sub_ids),
        rec_ids=jnp.asarray(rec_ids),
        deg_ids=jnp.asarray(deg_ids),
        attn_bias=jnp.asarray(attn_bias),
        pool_mat=jnp.asarray(pool_mat),
        sub_indices=jnp.asarray(sub_indices),
        source_map=jnp.asarray(source_map),
        explore_bias=jnp.asarray(explore_bias),
    )


# -----------------------------------------------------------------------------
if __name__ == "__main__":
    EMB_DIM = 32
    VOCAB = [12, 10, 8, 6, 16]            # [diag, proc, drug, smile, sub]
    DRUG_NUM, SMILE_NUM, SUB_NUM = VOCAB[2], VOCAB[3], VOCAB[4]

    # patient: 3 admissions of [diag codes, proc codes, med codes]
    patient = [
        [[1, 3, 5], [2, 4], [0, 2]],
        [[2, 6], [1, 3, 5], [1, 3, 4]],
        [[0, 7, 8], [6], []],
    ]
    his_med = patient[-2][-1]

    root = jax.random.PRNGKey(0)
    k_params, k_eps = jax.random.split(root)
    params = make_params(k_params, VOCAB, EMB_DIM, SMILE_NUM, DRUG_NUM, SUB_NUM)
    static = make_static(DRUG_NUM, SMILE_NUM, SUB_NUM, his_med)

    result, ddi_rate = drugrec_forward(params, static, patient, k_eps)
    result = jax.block_until_ready(result)
    ddi_rate = jax.block_until_ready(ddi_rate)
    assert result.shape == (1, DRUG_NUM) and ddi_rate.shape == ()
    assert bool(jnp.all(jnp.isfinite(result))) and bool(jnp.isfinite(ddi_rate))
    print("KERNEL_OK")
</pallas_src>

<mosaic_0001>
module attributes {stable_mosaic.version = 11 : i64} {
  func.func @kernel(%arg0: memref<3x64xf32, #tpu.memory_space<vmem>>, %arg1: memref<128x192xf32, #tpu.memory_space<vmem>>, %arg2: memref<2x192xf32, #tpu.memory_space<vmem>>, %arg3: memref<65x32xf32, #tpu.memory_space<vmem>>, %arg4: memref<18x64xf32, #tpu.memory_space<vmem>>, %arg5: memref<64x32xf32, #tpu.memory_space<vmem>>, %arg6: memref<18x18xf32, #tpu.memory_space<vmem>>, %arg7: memref<6x18xf32, #tpu.memory_space<vmem>>, %arg8: memref<2x128x96xf32, #tpu.memory_space<vmem>>, %arg9: memref<2x8x96xf32, #tpu.memory_space<vmem>>, %arg10: memref<6x32xf32, #tpu.memory_space<vmem>>, %arg11: memref<8x32xf32, #tpu.memory_space<vmem>>, %arg12: memref<11x8xf32, #tpu.memory_space<vmem>>, %arg13: memref<8x8xf32, #tpu.memory_space<vmem>>, %arg14: memref<12x32xf32, #tpu.memory_space<vmem>>, %arg15: memref<12x16xf32, #tpu.memory_space<vmem>>, %arg16: memref<8x16xf32, #tpu.memory_space<vmem>>, %arg17: memref<34x16xf32, #tpu.memory_space<vmem>>, %arg18: memref<2x32xf32, #tpu.memory_space<vmem>>, %arg19: memref<96x32xf32, #tpu.memory_space<vmem>>, %arg20: memref<129x96xf32, #tpu.memory_space<vmem>>, %arg21: memref<96x3xf32, #tpu.memory_space<vmem>>, %arg22: memref<33x2xf32, #tpu.memory_space<vmem>>, %arg23: memref<1x128xf32, #tpu.memory_space<vmem>>) attributes {dimension_semantics = [], scalar_prefetch = 0 : i64, scratch_operands = 0 : i64, tpu.core_type = #tpu.core_type<tc>} {
    %c0 = arith.constant 0 : index
    %c0_0 = arith.constant 0 : index
    %0 = vector.load %arg1[%c0, %c0_0] : memref<128x192xf32, #tpu.memory_space<vmem>>, vector<64x192xf32>
    %c64 = arith.constant 64 : index
    %c0_1 = arith.constant 0 : index
    %1 = vector.load %arg1[%c64, %c0_1] : memref<128x192xf32, #tpu.memory_space<vmem>>, vector<64x192xf32>
    %c0_2 = arith.constant 0 : index
    %c0_3 = arith.constant 0 : index
    %2 = vector.load %arg2[%c0_2, %c0_3] : memref<2x192xf32, #tpu.memory_space<vmem>>, vector<1x192xf32>
    %c1 = arith.constant 1 : index
    %c0_4 = arith.constant 0 : index
    %3 = vector.load %arg2[%c1, %c0_4] : memref<2x192xf32, #tpu.memory_space<vmem>>, vector<1x192xf32>
    %c0_5 = arith.constant 0 : index
    %c0_6 = arith.constant 0 : index
    %4 = vector.load %arg0[%c0_5, %c0_6] : memref<3x64xf32, #tpu.memory_space<vmem>>, vector<3x64xf32>
    %cst = arith.constant dense<0.000000e+00> : vector<3x192xf32>
    %5 = tpu.matmul %4, %0, %cst {dimension_numbers = #tpu.dot_dimension_numbers<[1], [0], [0], [1], [0, 0, 1, 1], [], []>} : vector<3x64xf32>, vector<64x192xf32>, vector<3x192xf32> -> vector<3x192xf32>
    %6 = vector.broadcast %2 : vector<1x192xf32> to vector<3x192xf32>
    %7 = arith.addf %5, %6 : vector<3x192xf32>
    %cst_7 = arith.constant 0.000000e+00 : f32
    %8 = vector.broadcast %cst_7 : f32 to vector<1x64xf32>
    %9 = vector.extract_strided_slice %7 {offsets = [0, 0], sizes = [1, 192], strides = [1, 1]} : vector<3x192xf32> to vector<1x192xf32>
    %cst_8 = arith.constant dense<0.000000e+00> : vector<1x192xf32>
    %10 = tpu.matmul %8, %1, %cst_8 {dimension_numbers = #tpu.dot_dimension_numbers<[1], [0], [0], [1], [0, 0, 1, 1], [], []>} : vector<1x64xf32>, vector<64x192xf32>, vector<1x192xf32> -> vector<1x192xf32>
    %11 = arith.addf %10, %3 : vector<1x192xf32>
    %12 = vector.extract_strided_slice %9 {offsets = [0, 0], sizes = [1, 64], strides = [1, 1]} : vector<1x192xf32> to vector<1x64xf32>
    %13 = vector.extract_strided_slice %11 {offsets = [0, 0], sizes = [1, 64], strides = [1, 1]} : vector<1x192xf32> to vector<1x64xf32>
    %14 = arith.addf %12, %13 : vector<1x64xf32>
    %15 = arith.negf %14 : vector<1x64xf32>
    %16 = math.exp %15 : vector<1x64xf32>
    %cst_9 = arith.constant 1.000000e+00 : f32
    %17 = vector.broadcast %cst_9 : f32 to vector<1x64xf32>
    %18 = arith.addf %17, %16 : vector<1x64xf32>
    %19 = arith.divf %17, %18 : vector<1x64xf32>
    %20 = vector.extract_strided_slice %9 {offsets = [0, 64], sizes = [1, 64], strides = [1, 1]} : vector<1x192xf32> to vector<1x64xf32>
    %21 = vector.extract_strided_slice %11 {offsets = [0, 64], sizes = [1, 64], strides = [1, 1]} : vector<1x192xf32> to vector<1x64xf32>
    %22 = arith.addf %20, %21 : vector<1x64xf32>
    %23 = arith.negf %22 : vector<1x64xf32>
    %24 = math.exp %23 : vector<1x64xf32>
    %cst_10 = arith.constant 1.000000e+00 : f32
    %25 = vector.broadcast %cst_10 : f32 to vector<1x64xf32>
    %26 = arith.addf %25, %24 : vector<1x64xf32>
    %27 = arith.divf %25, %26 : vector<1x64xf32>
    %28 = vector.extract_strided_slice %9 {offsets = [0, 128], sizes = [1, 64], strides = [1, 1]} : vector<1x192xf32> to vector<1x64xf32>
    %29 = vector.extract_strided_slice %11 {offsets = [0, 128], sizes = [1, 64], strides = [1, 1]} : vector<1x192xf32> to vector<1x64xf32>
    %30 = arith.mulf %19, %29 : vector<1x64xf32>
    %31 = arith.addf %28, %30 : vector<1x64xf32>
    %32 = math.tanh %31 : vector<1x64xf32>
    %cst_11 = arith.constant 1.000000e+00 : f32
    %33 = vector.broadcast %cst_11 : f32 to vector<1x64xf32>
    %34 = arith.subf %33, %27 : vector<1x64xf32>
    %35 = arith.mulf %34, %32 : vector<1x64xf32>
    %36 = arith.mulf %27, %8 : vector<1x64xf32>
    %37 = arith.addf %35, %36 : vector<1x64xf32>
    %38 = vector.extract_strided_slice %7 {offsets = [1, 0], sizes = [1, 192], strides = [1, 1]} : vector<3x192xf32> to vector<1x192xf32>
    %cst_12 = arith.constant dense<0.000000e+00> : vector<1x192xf32>
    %39 = tpu.matmul %37, %1, %cst_12 {dimension_numbers = #tpu.dot_dimension_numbers<[1], [0], [0], [1], [0, 0, 1, 1], [], []>} : vector<1x64xf32>, vector<64x192xf32>, vector<1x192xf32> -> vector<1x192xf32>
    %40 = arith.addf %39, %3 : vector<1x192xf32>
    %41 = vector.extract_strided_slice %38 {offsets = [0, 0], sizes = [1, 64], strides = [1, 1]} : vector<1x192xf32> to vector<1x64xf32>
    %42 = vector.extract_strided_slice %40 {offsets = [0, 0], sizes = [1, 64], strides = [1, 1]} : vector<1x192xf32> to vector<1x64xf32>
    %43 = arith.addf %41, %42 : vector<1x64xf32>
    %44 = arith.negf %43 : vector<1x64xf32>
    %45 = math.exp %44 : vector<1x64xf32>
    %cst_13 = arith.constant 1.000000e+00 : f32
    %46 = vector.broadcast %cst_13 : f32 to vector<1x64xf32>
    %47 = arith.addf %46, %45 : vector<1x64xf32>
    %48 = arith.divf %46, %47 : vector<1x64xf32>
    %49 = vector.extract_strided_slice %38 {offsets = [0, 64], sizes = [1, 64], strides = [1, 1]} : vector<1x192xf32> to vector<1x64xf32>
    %50 = vector.extract_strided_slice %40 {offsets = [0, 64], sizes = [1, 64], strides = [1, 1]} : vector<1x192xf32> to vector<1x64xf32>
    %51 = arith.addf %49, %50 : vector<1x64xf32>
    %52 = arith.negf %51 : vector<1x64xf32>
    %53 = math.exp %52 : vector<1x64xf32>
    %cst_14 = arith.constant 1.000000e+00 : f32
    %54 = vector.broadcast %cst_14 : f32 to vector<1x64xf32>
    %55 = arith.addf %54, %53 : vector<1x64xf32>
    %56 = arith.divf %54, %55 : vector<1x64xf32>
    %57 = vector.extract_strided_slice %38 {offsets = [0, 128], sizes = [1, 64], strides = [1, 1]} : vector<1x192xf32> to vector<1x64xf32>
    %58 = vector.extract_strided_slice %40 {offsets = [0, 128], sizes = [1, 64], strides = [1, 1]} : vector<1x192xf32> to vector<1x64xf32>
    %59 = arith.mulf %48, %58 : vector<1x64xf32>
    %60 = arith.addf %57, %59 : vector<1x64xf32>
    %61 = math.tanh %60 : vector<1x64xf32>
    %cst_15 = arith.constant 1.000000e+00 : f32
    %62 = vector.broadcast %cst_15 : f32 to vector<1x64xf32>
    %63 = arith.subf %62, %56 : vector<1x64xf32>
    %64 = arith.mulf %63, %61 : vector<1x64xf32>
    %65 = arith.mulf %56, %37 : vector<1x64xf32>
    %66 = arith.addf %64, %65 : vector<1x64xf32>
    %67 = vector.extract_strided_slice %7 {offsets = [2, 0], sizes = [1, 192], strides = [1, 1]} : vector<3x192xf32> to vector<1x192xf32>
    %cst_16 = arith.constant dense<0.000000e+00> : vector<1x192xf32>
    %68 = tpu.matmul %66, %1, %cst_16 {dimension_numbers = #tpu.dot_dimension_numbers<[1], [0], [0], [1], [0, 0, 1, 1], [], []>} : vector<1x64xf32>, vector<64x192xf32>, vector<1x192xf32> -> vector<1x192xf32>
    %69 = arith.addf %68, %3 : vector<1x192xf32>
    %70 = vector.extract_strided_slice %67 {offsets = [0, 0], sizes = [1, 64], strides = [1, 1]} : vector<1x192xf32> to vector<1x64xf32>
    %71 = vector.extract_strided_slice %69 {offsets = [0, 0], sizes = [1, 64], strides = [1, 1]} : vector<1x192xf32> to vector<1x64xf32>
    %72 = arith.addf %70, %71 : vector<1x64xf32>
    %73 = arith.negf %72 : vector<1x64xf32>
    %74 = math.exp %73 : vector<1x64xf32>
    %cst_17 = arith.constant 1.000000e+00 : f32
    %75 = vector.broadcast %cst_17 : f32 to vector<1x64xf32>
    %76 = arith.addf %75, %74 : vector<1x64xf32>
    %77 = arith.divf %75, %76 : vector<1x64xf32>
    %78 = vector.extract_strided_slice %67 {offsets = [0, 64], sizes = [1, 64], strides = [1, 1]} : vector<1x192xf32> to vector<1x64xf32>
    %79 = vector.extract_strided_slice %69 {offsets = [0, 64], sizes = [1, 64], strides = [1, 1]} : vector<1x192xf32> to vector<1x64xf32>
    %80 = arith.addf %78, %79 : vector<1x64xf32>
    %81 = arith.negf %80 : vector<1x64xf32>
    %82 = math.exp %81 : vector<1x64xf32>
    %cst_18 = arith.constant 1.000000e+00 : f32
    %83 = vector.broadcast %cst_18 : f32 to vector<1x64xf32>
    %84 = arith.addf %83, %82 : vector<1x64xf32>
    %85 = arith.divf %83, %84 : vector<1x64xf32>
    %86 = vector.extract_strided_slice %67 {offsets = [0, 128], sizes = [1, 64], strides = [1, 1]} : vector<1x192xf32> to vector<1x64xf32>
    %87 = vector.extract_strided_slice %69 {offsets = [0, 128], sizes = [1, 64], strides = [1, 1]} : vector<1x192xf32> to vector<1x64xf32>
    %88 = arith.mulf %77, %87 : vector<1x64xf32>
    %89 = arith.addf %86, %88 : vector<1x64xf32>
    %90 = math.tanh %89 : vector<1x64xf32>
    %cst_19 = arith.constant 1.000000e+00 : f32
    %91 = vector.broadcast %cst_19 : f32 to vector<1x64xf32>
    %92 = arith.subf %91, %85 : vector<1x64xf32>
    %93 = arith.mulf %92, %90 : vector<1x64xf32>
    %94 = arith.mulf %85, %66 : vector<1x64xf32>
    %95 = arith.addf %93, %94 : vector<1x64xf32>
    %c0_20 = arith.constant 0 : index
    %c0_21 = arith.constant 0 : index
    %96 = vector.load %arg3[%c0_20, %c0_21] : memref<65x32xf32, #tpu.memory_space<vmem>>, vector<64x32xf32>
    %c64_22 = arith.constant 64 : index
    %c0_23 = arith.constant 0 : index
    %97 = vector.load %arg3[%c64_22, %c0_23] : memref<65x32xf32, #tpu.memory_space<vmem>>, vector<1x32xf32>
    %cst_24 = arith.constant 0.000000e+00 : f32
    %98 = vector.broadcast %cst_24 : f32 to vector<1x64xf32>
    %99 = arith.maximumf %95, %98 : vector<1x64xf32>
    %cst_25 = arith.constant dense<0.000000e+00> : vector<1x32xf32>
    %100 = tpu.matmul %99, %96, %cst_25 {dimension_numbers = #tpu.dot_dimension_numbers<[1], [0], [0], [1], [0, 0, 1, 1], [], []>} : vector<1x64xf32>, vector<64x32xf32>, vector<1x32xf32> -> vector<1x32xf32>
    %101 = arith.addf %100, %97 : vector<1x32xf32>
    %c0_26 = arith.constant 0 : index
    %c0_27 = arith.constant 0 : index
    %102 = vector.load %arg4[%c0_26, %c0_27] : memref<18x64xf32, #tpu.memory_space<vmem>>, vector<18x64xf32>
    %c0_28 = arith.constant 0 : index
    %c0_29 = arith.constant 0 : index
    %103 = vector.load %arg5[%c0_28, %c0_29] : memref<64x32xf32, #tpu.memory_space<vmem>>, vector<64x32xf32>
    %cst_30 = arith.constant dense<0.000000e+00> : vector<18x32xf32>
    %104 = tpu.matmul %102, %103, %cst_30 {dimension_numbers = #tpu.dot_dimension_numbers<[1], [0], [0], [1], [0, 0, 1, 1], [], []>} : vector<18x64xf32>, vector<64x32xf32>, vector<18x32xf32> -> vector<18x32xf32>
    %c0_31 = arith.constant 0 : index
    %c0_32 = arith.constant 0 : index
    %105 = vector.load %arg6[%c0_31, %c0_32] : memref<18x18xf32, #tpu.memory_space<vmem>>, vector<18x18xf32>
    %c0_33 = arith.constant 0 : index
    %c0_34 = arith.constant 0 : index
    %c0_35 = arith.constant 0 : index
    %106 = vector.load %arg8[%c0_33, %c0_34, %c0_35] : memref<2x128x96xf32, #tpu.memory_space<vmem>>, vector<1x128x96xf32>
    %107 = vector.shape_cast %106 : vector<1x128x96xf32> to vector<128x96xf32>
    %c0_36 = arith.constant 0 : index
    %c0_37 = arith.constant 0 : index
    %c0_38 = arith.constant 0 : index
    %108 = vector.load %arg9[%c0_36, %c0_37, %c0_38] : memref<2x8x96xf32, #tpu.memory_space<vmem>>, vector<1x8x96xf32>
    %109 = vector.shape_cast %108 : vector<1x8x96xf32> to vector<8x96xf32>
    %110 = vector.extract_strided_slice %107 {offsets = [0, 0], sizes = [32, 96], strides = [1, 1]} : vector<128x96xf32> to vector<32x96xf32>
    %111 = vector.extract_strided_slice %107 {offsets = [32, 0], sizes = [32, 32], strides = [1, 1]} : vector<128x96xf32> to vector<32x32xf32>
    %112 = vector.extract_strided_slice %107 {offsets = [64, 0], sizes = [32, 32], strides = [1, 1]} : vector<128x96xf32> to vector<32x32xf32>
    %113 = vector.extract_strided_slice %107 {offsets = [96, 0], sizes = [32, 32], strides = [1, 1]} : vector<128x96xf32> to vector<32x32xf32>
    %114 = vector.extract_strided_slice %109 {offsets = [0, 0], sizes = [1, 96], strides = [1, 1]} : vector<8x96xf32> to vector<1x96xf32>
    %115 = vector.extract_strided_slice %109 {offsets = [1, 0], sizes = [1, 32], strides = [1, 1]} : vector<8x96xf32> to vector<1x32xf32>
    %116 = vector.extract_strided_slice %109 {offsets = [2, 0], sizes = [1, 32], strides = [1, 1]} : vector<8x96xf32> to vector<1x32xf32>
    %117 = vector.extract_strided_slice %109 {offsets = [3, 0], sizes = [1, 32], strides = [1, 1]} : vector<8x96xf32> to vector<1x32xf32>
    %118 = vector.extract_strided_slice %109 {offsets = [4, 0], sizes = [1, 32], strides = [1, 1]} : vector<8x96xf32> to vector<1x32xf32>
    %119 = vector.extract_strided_slice %109 {offsets = [5, 0], sizes = [1, 32], strides = [1, 1]} : vector<8x96xf32> to vector<1x32xf32>
    %120 = vector.extract_strided_slice %109 {offsets = [6, 0], sizes = [1, 32], strides = [1, 1]} : vector<8x96xf32> to vector<1x32xf32>
    %121 = vector.extract_strided_slice %109 {offsets = [7, 0], sizes = [1, 32], strides = [1, 1]} : vector<8x96xf32> to vector<1x32xf32>
    %cst_39 = arith.constant dense<0.000000e+00> : vector<18x96xf32>
    %122 = tpu.matmul %104, %110, %cst_39 {dimension_numbers = #tpu.dot_dimension_numbers<[1], [0], [0], [1], [0, 0, 1, 1], [], []>} : vector<18x32xf32>, vector<32x96xf32>, vector<18x96xf32> -> vector<18x96xf32>
    %123 = vector.broadcast %114 : vector<1x96xf32> to vector<18x96xf32>
    %124 = arith.addf %122, %123 : vector<18x96xf32>
    %125 = vector.extract_strided_slice %124 {offsets = [0, 0], sizes = [18, 16], strides = [1, 1]} : vector<18x96xf32> to vector<18x16xf32>
    %cst_40 = arith.constant 2.500000e-01 : f32
    %126 = vector.broadcast %cst_40 : f32 to vector<18x16xf32>
    %127 = arith.mulf %125, %126 : vector<18x16xf32>
    %128 = vector.extract_strided_slice %124 {offsets = [0, 32], sizes = [18, 16], strides = [1, 1]} : vector<18x96xf32> to vector<18x16xf32>
    %129 = vector.extract_strided_slice %124 {offsets = [0, 64], sizes = [18, 16], strides = [1, 1]} : vector<18x96xf32> to vector<18x16xf32>
    %cst_41 = arith.constant dense<0.000000e+00> : vector<18x18xf32>
    %130 = tpu.matmul %127, %128, %cst_41 {dimension_numbers = #tpu.dot_dimension_numbers<[1], [1], [0], [0], [0, 0, 1, 0], [], []>} : vector<18x16xf32>, vector<18x16xf32>, vector<18x18xf32> -> vector<18x18xf32>
    %131 = arith.addf %130, %105 : vector<18x18xf32>
    %cst_42 = arith.constant dense<0xFF800000> : vector<18xf32>
    %132 = vector.multi_reduction <maximumf>, %131, %cst_42 [1] : vector<18x18xf32> to vector<18xf32>
    %133 = vector.shape_cast %132 : vector<18xf32> to vector<18x1xf32>
    %134 = vector.broadcast %133 : vector<18x1xf32> to vector<18x18xf32>
    %135 = arith.subf %131, %134 : vector<18x18xf32>
    %136 = math.exp %135 : vector<18x18xf32>
    %cst_43 = arith.constant dense<0.000000e+00> : vector<18xf32>
    %137 = vector.multi_reduction <add>, %136, %cst_43 [1] : vector<18x18xf32> to vector<18xf32>
    %138 = vector.shape_cast %137 : vector<18xf32> to vector<18x1xf32>
    %139 = tpu.reciprocal %138 {approx = true} : vector<18x1xf32> -> vector<18x1xf32>
    %140 = vector.broadcast %139 : vector<18x1xf32> to vector<18x18xf32>
    %141 = arith.mulf %136, %140 : vector<18x18xf32>
    %cst_44 = arith.constant dense<0.000000e+00> : vector<18x16xf32>
    %142 = tpu.matmul %141, %129, %cst_44 {dimension_numbers = #tpu.dot_dimension_numbers<[1], [0], [0], [1], [0, 0, 1, 1], [], []>} : vector<18x18xf32>, vector<18x16xf32>, vector<18x16xf32> -> vector<18x16xf32>
    %143 = vector.extract_strided_slice %111 {offsets = [0, 0], sizes = [16, 32], strides = [1, 1]} : vector<32x32xf32> to vector<16x32xf32>
    %cst_45 = arith.constant dense<0.000000e+00> : vector<18x32xf32>
    %144 = tpu.matmul %142, %143, %cst_45 {dimension_numbers = #tpu.dot_dimension_numbers<[1], [0], [0], [1], [0, 0, 1, 1], [], []>} : vector<18x16xf32>, vector<16x32xf32>, vector<18x32xf32> -> vector<18x32xf32>
    %145 = vector.broadcast %115 : vector<1x32xf32> to vector<18x32xf32>
    %146 = arith.addf %145, %144 : vector<18x32xf32>
    %147 = vector.extract_strided_slice %124 {offsets = [0, 16], sizes = [18, 16], strides = [1, 1]} : vector<18x96xf32> to vector<18x16xf32>
    %cst_46 = arith.constant 2.500000e-01 : f32
    %148 = vector.broadcast %cst_46 : f32 to vector<18x16xf32>
    %149 = arith.mulf %147, %148 : vector<18x16xf32>
    %150 = vector.extract_strided_slice %124 {offsets = [0, 48], sizes = [18, 16], strides = [1, 1]} : vector<18x96xf32> to vector<18x16xf32>
    %151 = vector.extract_strided_slice %124 {offsets = [0, 80], sizes = [18, 16], strides = [1, 1]} : vector<18x96xf32> to vector<18x16xf32>
    %cst_47 = arith.constant dense<0.000000e+00> : vector<18x18xf32>
    %152 = tpu.matmul %149, %150, %cst_47 {dimension_numbers = #tpu.dot_dimension_numbers<[1], [1], [0], [0], [0, 0, 1, 0], [], []>} : vector<18x16xf32>, vector<18x16xf32>, vector<18x18xf32> -> vector<18x18xf32>
    %153 = arith.addf %152, %105 : vector<18x18xf32>
    %cst_48 = arith.constant dense<0xFF800000> : vector<18xf32>
    %154 = vector.multi_reduction <maximumf>, %153, %cst_48 [1] : vector<18x18xf32> to vector<18xf32>
    %155 = vector.shape_cast %154 : vector<18xf32> to vector<18x1xf32>
    %156 = vector.broadcast %155 : vector<18x1xf32> to vector<18x18xf32>
    %157 = arith.subf %153, %156 : vector<18x18xf32>
    %158 = math.exp %157 : vector<18x18xf32>
    %cst_49 = arith.constant dense<0.000000e+00> : vector<18xf32>
    %159 = vector.multi_reduction <add>, %158, %cst_49 [1] : vector<18x18xf32> to vector<18xf32>
    %160 = vector.shape_cast %159 : vector<18xf32> to vector<18x1xf32>
    %161 = tpu.reciprocal %160 {approx = true} : vector<18x1xf32> -> vector<18x1xf32>
    %162 = vector.broadcast %161 : vector<18x1xf32> to vector<18x18xf32>
    %163 = arith.mulf %158, %162 : vector<18x18xf32>
    %cst_50 = arith.constant dense<0.000000e+00> : vector<18x16xf32>
    %164 = tpu.matmul %163, %151, %cst_50 {dimension_numbers = #tpu.dot_dimension_numbers<[1], [0], [0], [1], [0, 0, 1, 1], [], []>} : vector<18x18xf32>, vector<18x16xf32>, vector<18x16xf32> -> vector<18x16xf32>
    %165 = vector.extract_strided_slice %111 {offsets = [16, 0], sizes = [16, 32], strides = [1, 1]} : vector<32x32xf32> to vector<16x32xf32>
    %cst_51 = arith.constant dense<0.000000e+00> : vector<18x32xf32>
    %166 = tpu.matmul %164, %165, %cst_51 {dimension_numbers = #tpu.dot_dimension_numbers<[1], [0], [0], [1], [0, 0, 1, 1], [], []>} : vector<18x16xf32>, vector<16x32xf32>, vector<18x32xf32> -> vector<18x32xf32>
    %167 = arith.addf %146, %166 : vector<18x32xf32>
    %168 = arith.addf %104, %167 : vector<18x32xf32>
    %cst_52 = arith.constant dense<0.000000e+00> : vector<18xf32>
    %169 = vector.multi_reduction <add>, %168, %cst_52 [1] : vector<18x32xf32> to vector<18xf32>
    %170 = vector.shape_cast %169 : vector<18xf32> to vector<18x1xf32>
    %cst_53 = arith.constant 3.200000e+01 : f32
    %171 = vector.broadcast %cst_53 : f32 to vector<18x1xf32>
    %172 = arith.divf %170, %171 : vector<18x1xf32>
    %173 = vector.broadcast %172 : vector<18x1xf32> to vector<18x32xf32>
    %174 = arith.subf %168, %173 : vector<18x32xf32>
    %175 = arith.mulf %174, %174 : vector<18x32xf32>
    %cst_54 = arith.constant dense<0.000000e+00> : vector<18xf32>
    %176 = vector.multi_reduction <add>, %175, %cst_54 [1] : vector<18x32xf32> to vector<18xf32>
    %177 = vector.shape_cast %176 : vector<18xf32> to vector<18x1xf32>
    %cst_55 = arith.constant 3.200000e+01 : f32
    %178 = vector.broadcast %cst_55 : f32 to vector<18x1xf32>
    %179 = arith.divf %177, %178 : vector<18x1xf32>
    %180 = vector.broadcast %172 : vector<18x1xf32> to vector<18x32xf32>
    %181 = arith.subf %168, %180 : vector<18x32xf32>
    %cst_56 = arith.constant 9.99999974E-6 : f32
    %182 = vector.broadcast %cst_56 : f32 to vector<18x1xf32>
    %183 = arith.addf %179, %182 : vector<18x1xf32>
    %184 = math.rsqrt %183 : vector<18x1xf32>
    %185 = vector.broadcast %184 : vector<18x1xf32> to vector<18x32xf32>
    %186 = arith.mulf %181, %185 : vector<18x32xf32>
    %187 = vector.broadcast %118 : vector<1x32xf32> to vector<18x32xf32>
    %188 = arith.mulf %186, %187 : vector<18x32xf32>
    %189 = vector.broadcast %119 : vector<1x32xf32> to vector<18x32xf32>
    %190 = arith.addf %188, %189 : vector<18x32xf32>
    %cst_57 = arith.constant dense<0.000000e+00> : vector<18x32xf32>
    %191 = tpu.matmul %190, %112, %cst_57 {dimension_numbers = #tpu.dot_dimension_numbers<[1], [0], [0], [1], [0, 0, 1, 1], [], []>} : vector<18x32xf32>, vector<32x32xf32>, vector<18x32xf32> -> vector<18x32xf32>
    %192 = vector.broadcast %116 : vector<1x32xf32> to vector<18x32xf32>
    %193 = arith.addf %191, %192 : vector<18x32xf32>
    %cst_58 = arith.constant 0.000000e+00 : f32
    %194 = vector.broadcast %cst_58 : f32 to vector<18x32xf32>
    %195 = arith.maximumf %193, %194 : vector<18x32xf32>
    %cst_59 = arith.constant dense<0.000000e+00> : vector<18x32xf32>
    %196 = tpu.matmul %195, %113, %cst_59 {dimension_numbers = #tpu.dot_dimension_numbers<[1], [0], [0], [1], [0, 0, 1, 1], [], []>} : vector<18x32xf32>, vector<32x32xf32>, vector<18x32xf32> -> vector<18x32xf32>
    %197 = arith.addf %190, %196 : vector<18x32xf32>
    %198 = vector.broadcast %117 : vector<1x32xf32> to vector<18x32xf32>
    %199 = arith.addf %197, %198 : vector<18x32xf32>
    %cst_60 = arith.constant dense<0.000000e+00> : vector<18xf32>
    %200 = vector.multi_reduction <add>, %199, %cst_60 [1] : vector<18x32xf32> to vector<18xf32>
    %201 = vector.shape_cast %200 : vector<18xf32> to vector<18x1xf32>
    %cst_61 = arith.constant 3.200000e+01 : f32
    %202 = vector.broadcast %cst_61 : f32 to vector<18x1xf32>
    %203 = arith.divf %201, %202 : vector<18x1xf32>
    %204 = vector.broadcast %203 : vector<18x1xf32> to vector<18x32xf32>
    %205 = arith.subf %199, %204 : vector<18x32xf32>
    %206 = arith.mulf %205, %205 : vector<18x32xf32>
    %cst_62 = arith.constant dense<0.000000e+00> : vector<18xf32>
    %207 = vector.multi_reduction <add>, %206, %cst_62 [1] : vector<18x32xf32> to vector<18xf32>
    %208 = vector.shape_cast %207 : vector<18xf32> to vector<18x1xf32>
    %cst_63 = arith.constant 3.200000e+01 : f32
    %209 = vector.broadcast %cst_63 : f32 to vector<18x1xf32>
    %210 = arith.divf %208, %209 : vector<18x1xf32>
    %211 = vector.broadcast %203 : vector<18x1xf32> to vector<18x32xf32>
    %212 = arith.subf %199, %211 : vector<18x32xf32>
    %cst_64 = arith.constant 9.99999974E-6 : f32
    %213 = vector.broadcast %cst_64 : f32 to vector<18x1xf32>
    %214 = arith.addf %210, %213 : vector<18x1xf32>
    %215 = math.rsqrt %214 : vector<18x1xf32>
    %216 = vector.broadcast %215 : vector<18x1xf32> to vector<18x32xf32>
    %217 = arith.mulf %212, %216 : vector<18x32xf32>
    %218 = vector.broadcast %120 : vector<1x32xf32> to vector<18x32xf32>
    %219 = arith.mulf %217, %218 : vector<18x32xf32>
    %220 = vector.broadcast %121 : vector<1x32xf32> to vector<18x32xf32>
    %221 = arith.addf %219, %220 : vector<18x32xf32>
    %c1_65 = arith.constant 1 : index
    %c0_66 = arith.constant 0 : index
    %c0_67 = arith.constant 0 : index
    %222 = vector.load %arg8[%c1_65, %c0_66, %c0_67] : memref<2x128x96xf32, #tpu.memory_space<vmem>>, vector<1x128x96xf32>
    %223 = vector.shape_cast %222 : vector<1x128x96xf32> to vector<128x96xf32>
    %c1_68 = arith.constant 1 : index
    %c0_69 = arith.constant 0 : index
    %c0_70 = arith.constant 0 : index
    %224 = vector.load %arg9[%c1_68, %c0_69, %c0_70] : memref<2x8x96xf32, #tpu.memory_space<vmem>>, vector<1x8x96xf32>
    %225 = vector.shape_cast %224 : vector<1x8x96xf32> to vector<8x96xf32>
    %226 = vector.extract_strided_slice %223 {offsets = [0, 0], sizes = [32, 96], strides = [1, 1]} : vector<128x96xf32> to vector<32x96xf32>
    %227 = vector.extract_strided_slice %223 {offsets = [32, 0], sizes = [32, 32], strides = [1, 1]} : vector<128x96xf32> to vector<32x32xf32>
    %228 = vector.extract_strided_slice %223 {offsets = [64, 0], sizes = [32, 32], strides = [1, 1]} : vector<128x96xf32> to vector<32x32xf32>
    %229 = vector.extract_strided_slice %223 {offsets = [96, 0], sizes = [32, 32], strides = [1, 1]} : vector<128x96xf32> to vector<32x32xf32>
    %230 = vector.extract_strided_slice %225 {offsets = [0, 0], sizes = [1, 96], strides = [1, 1]} : vector<8x96xf32> to vector<1x96xf32>
    %231 = vector.extract_strided_slice %225 {offsets = [1, 0], sizes = [1, 32], strides = [1, 1]} : vector<8x96xf32> to vector<1x32xf32>
    %232 = vector.extract_strided_slice %225 {offsets = [2, 0], sizes = [1, 32], strides = [1, 1]} : vector<8x96xf32> to vector<1x32xf32>
    %233 = vector.extract_strided_slice %225 {offsets = [3, 0], sizes = [1, 32], strides = [1, 1]} : vector<8x96xf32> to vector<1x32xf32>
    %234 = vector.extract_strided_slice %225 {offsets = [4, 0], sizes = [1, 32], strides = [1, 1]} : vector<8x96xf32> to vector<1x32xf32>
    %235 = vector.extract_strided_slice %225 {offsets = [5, 0], sizes = [1, 32], strides = [1, 1]} : vector<8x96xf32> to vector<1x32xf32>
    %236 = vector.extract_strided_slice %225 {offsets = [6, 0], sizes = [1, 32], strides = [1, 1]} : vector<8x96xf32> to vector<1x32xf32>
    %237 = vector.extract_strided_slice %225 {offsets = [7, 0], sizes = [1, 32], strides = [1, 1]} : vector<8x96xf32> to vector<1x32xf32>
    %cst_71 = arith.constant dense<0.000000e+00> : vector<18x96xf32>
    %238 = tpu.matmul %221, %226, %cst_71 {dimension_numbers = #tpu.dot_dimension_numbers<[1], [0], [0], [1], [0, 0, 1, 1], [], []>} : vector<18x32xf32>, vector<32x96xf32>, vector<18x96xf32> -> vector<18x96xf32>
    %239 = vector.broadcast %230 : vector<1x96xf32> to vector<18x96xf32>
    %240 = arith.addf %238, %239 : vector<18x96xf32>
    %241 = vector.extract_strided_slice %240 {offsets = [0, 0], sizes = [18, 16], strides = [1, 1]} : vector<18x96xf32> to vector<18x16xf32>
    %cst_72 = arith.constant 2.500000e-01 : f32
    %242 = vector.broadcast %cst_72 : f32 to vector<18x16xf32>
    %243 = arith.mulf %241, %242 : vector<18x16xf32>
    %244 = vector.extract_strided_slice %240 {offsets = [0, 32], sizes = [18, 16], strides = [1, 1]} : vector<18x96xf32> to vector<18x16xf32>
    %245 = vector.extract_strided_slice %240 {offsets = [0, 64], sizes = [18, 16], strides = [1, 1]} : vector<18x96xf32> to vector<18x16xf32>
    %cst_73 = arith.constant dense<0.000000e+00> : vector<18x18xf32>
    %246 = tpu.matmul %243, %244, %cst_73 {dimension_numbers = #tpu.dot_dimension_numbers<[1], [1], [0], [0], [0, 0, 1, 0], [], []>} : vector<18x16xf32>, vector<18x16xf32>, vector<18x18xf32> -> vector<18x18xf32>
    %247 = arith.addf %246, %105 : vector<18x18xf32>
    %cst_74 = arith.constant dense<0xFF800000> : vector<18xf32>
    %248 = vector.multi_reduction <maximumf>, %247, %cst_74 [1] : vector<18x18xf32> to vector<18xf32>
    %249 = vector.shape_cast %248 : vector<18xf32> to vector<18x1xf32>
    %250 = vector.broadcast %249 : vector<18x1xf32> to vector<18x18xf32>
    %251 = arith.subf %247, %250 : vector<18x18xf32>
    %252 = math.exp %251 : vector<18x18xf32>
    %cst_75 = arith.constant dense<0.000000e+00> : vector<18xf32>
    %253 = vector.multi_reduction <add>, %252, %cst_75 [1] : vector<18x18xf32> to vector<18xf32>
    %254 = vector.shape_cast %253 : vector<18xf32> to vector<18x1xf32>
    %255 = tpu.reciprocal %254 {approx = true} : vector<18x1xf32> -> vector<18x1xf32>
    %256 = vector.broadcast %255 : vector<18x1xf32> to vector<18x18xf32>
    %257 = arith.mulf %252, %256 : vector<18x18xf32>
    %cst_76 = arith.constant dense<0.000000e+00> : vector<18x16xf32>
    %258 = tpu.matmul %257, %245, %cst_76 {dimension_numbers = #tpu.dot_dimension_numbers<[1], [0], [0], [1], [0, 0, 1, 1], [], []>} : vector<18x18xf32>, vector<18x16xf32>, vector<18x16xf32> -> vector<18x16xf32>
    %259 = vector.extract_strided_slice %227 {offsets = [0, 0], sizes = [16, 32], strides = [1, 1]} : vector<32x32xf32> to vector<16x32xf32>
    %cst_77 = arith.constant dense<0.000000e+00> : vector<18x32xf32>
    %260 = tpu.matmul %258, %259, %cst_77 {dimension_numbers = #tpu.dot_dimension_numbers<[1], [0], [0], [1], [0, 0, 1, 1], [], []>} : vector<18x16xf32>, vector<16x32xf32>, vector<18x32xf32> -> vector<18x32xf32>
    %261 = vector.broadcast %231 : vector<1x32xf32> to vector<18x32xf32>
    %262 = arith.addf %261, %260 : vector<18x32xf32>
    %263 = vector.extract_strided_slice %240 {offsets = [0, 16], sizes = [18, 16], strides = [1, 1]} : vector<18x96xf32> to vector<18x16xf32>
    %cst_78 = arith.constant 2.500000e-01 : f32
    %264 = vector.broadcast %cst_78 : f32 to vector<18x16xf32>
    %265 = arith.mulf %263, %264 : vector<18x16xf32>
    %266 = vector.extract_strided_slice %240 {offsets = [0, 48], sizes = [18, 16], strides = [1, 1]} : vector<18x96xf32> to vector<18x16xf32>
    %267 = vector.extract_strided_slice %240 {offsets = [0, 80], sizes = [18, 16], strides = [1, 1]} : vector<18x96xf32> to vector<18x16xf32>
    %cst_79 = arith.constant dense<0.000000e+00> : vector<18x18xf32>
    %268 = tpu.matmul %265, %266, %cst_79 {dimension_numbers = #tpu.dot_dimension_numbers<[1], [1], [0], [0], [0, 0, 1, 0], [], []>} : vector<18x16xf32>, vector<18x16xf32>, vector<18x18xf32> -> vector<18x18xf32>
    %269 = arith.addf %268, %105 : vector<18x18xf32>
    %cst_80 = arith.constant dense<0xFF800000> : vector<18xf32>
    %270 = vector.multi_reduction <maximumf>, %269, %cst_80 [1] : vector<18x18xf32> to vector<18xf32>
    %271 = vector.shape_cast %270 : vector<18xf32> to vector<18x1xf32>
    %272 = vector.broadcast %271 : vector<18x1xf32> to vector<18x18xf32>
    %273 = arith.subf %269, %272 : vector<18x18xf32>
    %274 = math.exp %273 : vector<18x18xf32>
    %cst_81 = arith.constant dense<0.000000e+00> : vector<18xf32>
    %275 = vector.multi_reduction <add>, %274, %cst_81 [1] : vector<18x18xf32> to vector<18xf32>
    %276 = vector.shape_cast %275 : vector<18xf32> to vector<18x1xf32>
    %277 = tpu.reciprocal %276 {approx = true} : vector<18x1xf32> -> vector<18x1xf32>
    %278 = vector.broadcast %277 : vector<18x1xf32> to vector<18x18xf32>
    %279 = arith.mulf %274, %278 : vector<18x18xf32>
    %cst_82 = arith.constant dense<0.000000e+00> : vector<18x16xf32>
    %280 = tpu.matmul %279, %267, %cst_82 {dimension_numbers = #tpu.dot_dimension_numbers<[1], [0], [0], [1], [0, 0, 1, 1], [], []>} : vector<18x18xf32>, vector<18x16xf32>, vector<18x16xf32> -> vector<18x16xf32>
    %281 = vector.extract_strided_slice %227 {offsets = [16, 0], sizes = [16, 32], strides = [1, 1]} : vector<32x32xf32> to vector<16x32xf32>
    %cst_83 = arith.constant dense<0.000000e+00> : vector<18x32xf32>
    %282 = tpu.matmul %280, %281, %cst_83 {dimension_numbers = #tpu.dot_dimension_numbers<[1], [0], [0], [1], [0, 0, 1, 1], [], []>} : vector<18x16xf32>, vector<16x32xf32>, vector<18x32xf32> -> vector<18x32xf32>
    %283 = arith.addf %262, %282 : vector<18x32xf32>
    %284 = arith.addf %221, %283 : vector<18x32xf32>
    %cst_84 = arith.constant dense<0.000000e+00> : vector<18xf32>
    %285 = vector.multi_reduction <add>, %284, %cst_84 [1] : vector<18x32xf32> to vector<18xf32>
    %286 = vector.shape_cast %285 : vector<18xf32> to vector<18x1xf32>
    %cst_85 = arith.constant 3.200000e+01 : f32
    %287 = vector.broadcast %cst_85 : f32 to vector<18x1xf32>
    %288 = arith.divf %286, %287 : vector<18x1xf32>
    %289 = vector.broadcast %288 : vector<18x1xf32> to vector<18x32xf32>
    %290 = arith.subf %284, %289 : vector<18x32xf32>
    %291 = arith.mulf %290, %290 : vector<18x32xf32>
    %cst_86 = arith.constant dense<0.000000e+00> : vector<18xf32>
    %292 = vector.multi_reduction <add>, %291, %cst_86 [1] : vector<18x32xf32> to vector<18xf32>
    %293 = vector.shape_cast %292 : vector<18xf32> to vector<18x1xf32>
    %cst_87 = arith.constant 3.200000e+01 : f32
    %294 = vector.broadcast %cst_87 : f32 to vector<18x1xf32>
    %295 = arith.divf %293, %294 : vector<18x1xf32>
    %296 = vector.broadcast %288 : vector<18x1xf32> to vector<18x32xf32>
    %297 = arith.subf %284, %296 : vector<18x32xf32>
    %cst_88 = arith.constant 9.99999974E-6 : f32
    %298 = vector.broadcast %cst_88 : f32 to vector<18x1xf32>
    %299 = arith.addf %295, %298 : vector<18x1xf32>
    %300 = math.rsqrt %299 : vector<18x1xf32>
    %301 = vector.broadcast %300 : vector<18x1xf32> to vector<18x32xf32>
    %302 = arith.mulf %297, %301 : vector<18x32xf32>
    %303 = vector.broadcast %234 : vector<1x32xf32> to vector<18x32xf32>
    %304 = arith.mulf %302, %303 : vector<18x32xf32>
    %305 = vector.broadcast %235 : vector<1x32xf32> to vector<18x32xf32>
    %306 = arith.addf %304, %305 : vector<18x32xf32>
    %cst_89 = arith.constant dense<0.000000e+00> : vector<18x32xf32>
    %307 = tpu.matmul %306, %228, %cst_89 {dimension_numbers = #tpu.dot_dimension_numbers<[1], [0], [0], [1], [0, 0, 1, 1], [], []>} : vector<18x32xf32>, vector<32x32xf32>, vector<18x32xf32> -> vector<18x32xf32>
    %308 = vector.broadcast %232 : vector<1x32xf32> to vector<18x32xf32>
    %309 = arith.addf %307, %308 : vector<18x32xf32>
    %cst_90 = arith.constant 0.000000e+00 : f32
    %310 = vector.broadcast %cst_90 : f32 to vector<18x32xf32>
    %311 = arith.maximumf %309, %310 : vector<18x32xf32>
    %cst_91 = arith.constant dense<0.000000e+00> : vector<18x32xf32>
    %312 = tpu.matmul %311, %229, %cst_91 {dimension_numbers = #tpu.dot_dimension_numbers<[1], [0], [0], [1], [0, 0, 1, 1], [], []>} : vector<18x32xf32>, vector<32x32xf32>, vector<18x32xf32> -> vector<18x32xf32>
    %313 = arith.addf %306, %312 : vector<18x32xf32>
    %314 = vector.broadcast %233 : vector<1x32xf32> to vector<18x32xf32>
    %315 = arith.addf %313, %314 : vector<18x32xf32>
    %cst_92 = arith.constant dense<0.000000e+00> : vector<18xf32>
    %316 = vector.multi_reduction <add>, %315, %cst_92 [1] : vector<18x32xf32> to vector<18xf32>
    %317 = vector.shape_cast %316 : vector<18xf32> to vector<18x1xf32>
    %cst_93 = arith.constant 3.200000e+01 : f32
    %318 = vector.broadcast %cst_93 : f32 to vector<18x1xf32>
    %319 = arith.divf %317, %318 : vector<18x1xf32>
    %320 = vector.broadcast %319 : vector<18x1xf32> to vector<18x32xf32>
    %321 = arith.subf %315, %320 : vector<18x32xf32>
    %322 = arith.mulf %321, %321 : vector<18x32xf32>
    %cst_94 = arith.constant dense<0.000000e+00> : vector<18xf32>
    %323 = vector.multi_reduction <add>, %322, %cst_94 [1] : vector<18x32xf32> to vector<18xf32>
    %324 = vector.shape_cast %323 : vector<18xf32> to vector<18x1xf32>
    %cst_95 = arith.constant 3.200000e+01 : f32
    %325 = vector.broadcast %cst_95 : f32 to vector<18x1xf32>
    %326 = arith.divf %324, %325 : vector<18x1xf32>
    %327 = vector.broadcast %319 : vector<18x1xf32> to vector<18x32xf32>
    %328 = arith.subf %315, %327 : vector<18x32xf32>
    %cst_96 = arith.constant 9.99999974E-6 : f32
    %329 = vector.broadcast %cst_96 : f32 to vector<18x1xf32>
    %330 = arith.addf %326, %329 : vector<18x1xf32>
    %331 = math.rsqrt %330 : vector<18x1xf32>
    %332 = vector.broadcast %331 : vector<18x1xf32> to vector<18x32xf32>
    %333 = arith.mulf %328, %332 : vector<18x32xf32>
    %334 = vector.broadcast %236 : vector<1x32xf32> to vector<18x32xf32>
    %335 = arith.mulf %333, %334 : vector<18x32xf32>
    %336 = vector.broadcast %237 : vector<1x32xf32> to vector<18x32xf32>
    %337 = arith.addf %335, %336 : vector<18x32xf32>
    %c0_97 = arith.constant 0 : index
    %c0_98 = arith.constant 0 : index
    %338 = vector.load %arg7[%c0_97, %c0_98] : memref<6x18xf32, #tpu.memory_space<vmem>>, vector<6x18xf32>
    %cst_99 = arith.constant dense<0.000000e+00> : vector<6x32xf32>
    %339 = tpu.matmul %338, %337, %cst_99 {dimension_numbers = #tpu.dot_dimension_numbers<[1], [0], [0], [1], [0, 0, 1, 1], [], []>} : vector<6x18xf32>, vector<18x32xf32>, vector<6x32xf32> -> vector<6x32xf32>
    %c0_100 = arith.constant 0 : index
    %c0_101 = arith.constant 0 : index
    %340 = vector.load %arg10[%c0_100, %c0_101] : memref<6x32xf32, #tpu.memory_space<vmem>>, vector<6x32xf32>
    %341 = arith.addf %339, %340 : vector<6x32xf32>
    %c0_102 = arith.constant 0 : index
    %c0_103 = arith.constant 0 : index
    %342 = vector.load %arg11[%c0_102, %c0_103] : memref<8x32xf32, #tpu.memory_space<vmem>>, vector<8x32xf32>
    %cst_104 = arith.constant dense<0.000000e+00> : vector<8x6xf32>
    %343 = tpu.matmul %342, %341, %cst_104 {dimension_numbers = #tpu.dot_dimension_numbers<[1], [1], [0], [0], [0, 0, 1, 0], [], []>} : vector<8x32xf32>, vector<6x32xf32>, vector<8x6xf32> -> vector<8x6xf32>
    %cst_105 = arith.constant dense<0xFF800000> : vector<8xf32>
    %344 = vector.multi_reduction <maximumf>, %343, %cst_105 [1] : vector<8x6xf32> to vector<8xf32>
    %345 = vector.shape_cast %344 : vector<8xf32> to vector<8x1xf32>
    %346 = vector.broadcast %345 : vector<8x1xf32> to vector<8x6xf32>
    %347 = arith.subf %343, %346 : vector<8x6xf32>
    %348 = math.exp %347 : vector<8x6xf32>
    %cst_106 = arith.constant dense<0.000000e+00> : vector<8xf32>
    %349 = vector.multi_reduction <add>, %348, %cst_106 [1] : vector<8x6xf32> to vector<8xf32>
    %350 = vector.shape_cast %349 : vector<8xf32> to vector<8x1xf32>
    %351 = tpu.reciprocal %350 {approx = true} : vector<8x1xf32> -> vector<8x1xf32>
    %352 = vector.broadcast %351 : vector<8x1xf32> to vector<8x6xf32>
    %353 = arith.mulf %348, %352 : vector<8x6xf32>
    %cst_107 = arith.constant dense<0.000000e+00> : vector<8x32xf32>
    %354 = tpu.matmul %353, %341, %cst_107 {dimension_numbers = #tpu.dot_dimension_numbers<[1], [0], [0], [1], [0, 0, 1, 1], [], []>} : vector<8x6xf32>, vector<6x32xf32>, vector<8x32xf32> -> vector<8x32xf32>
    %355 = arith.mulf %354, %354 : vector<8x32xf32>
    %cst_108 = arith.constant dense<0.000000e+00> : vector<8xf32>
    %356 = vector.multi_reduction <add>, %355, %cst_108 [1] : vector<8x32xf32> to vector<8xf32>
    %357 = vector.shape_cast %356 : vector<8xf32> to vector<8x1xf32>
    %cst_109 = arith.constant 1.000000e-24 : f32
    %358 = vector.broadcast %cst_109 : f32 to vector<8x1xf32>
    %359 = arith.maximumf %357, %358 : vector<8x1xf32>
    %360 = math.rsqrt %359 : vector<8x1xf32>
    %361 = vector.broadcast %360 : vector<8x1xf32> to vector<8x32xf32>
    %362 = arith.mulf %354, %361 : vector<8x32xf32>
    %363 = arith.addf %362, %342 : vector<8x32xf32>
    %cst_110 = arith.constant dense<0.000000e+00> : vector<1x8xf32>
    %364 = tpu.matmul %101, %363, %cst_110 {dimension_numbers = #tpu.dot_dimension_numbers<[1], [1], [0], [0], [0, 0, 1, 0], [], []>} : vector<1x32xf32>, vector<8x32xf32>, vector<1x8xf32> -> vector<1x8xf32>
    %365 = arith.negf %364 : vector<1x8xf32>
    %366 = math.exp %365 : vector<1x8xf32>
    %cst_111 = arith.constant 1.000000e+00 : f32
    %367 = vector.broadcast %cst_111 : f32 to vector<1x8xf32>
    %368 = arith.addf %367, %366 : vector<1x8xf32>
    %369 = arith.divf %367, %368 : vector<1x8xf32>
    %c0_112 = arith.constant 0 : index
    %c0_113 = arith.constant 0 : index
    %370 = vector.load %arg12[%c0_112, %c0_113] : memref<11x8xf32, #tpu.memory_space<vmem>>, vector<8x8xf32>
    %c8 = arith.constant 8 : index
    %c0_114 = arith.constant 0 : index
    %371 = vector.load %arg12[%c8, %c0_114] : memref<11x8xf32, #tpu.memory_space<vmem>>, vector<1x8xf32>
    %c9 = arith.constant 9 : index
    %c0_115 = arith.constant 0 : index
    %372 = vector.load %arg12[%c9, %c0_115] : memref<11x8xf32, #tpu.memory_space<vmem>>, vector<1x8xf32>
    %c10 = arith.constant 10 : index
    %c0_116 = arith.constant 0 : index
    %373 = vector.load %arg12[%c10, %c0_116] : memref<11x8xf32, #tpu.memory_space<vmem>>, vector<1x8xf32>
    %cst_117 = arith.constant dense<0.000000e+00> : vector<1x8xf32>
    %374 = tpu.matmul %369, %370, %cst_117 {dimension_numbers = #tpu.dot_dimension_numbers<[1], [0], [0], [1], [0, 0, 1, 1], [], []>} : vector<1x8xf32>, vector<8x8xf32>, vector<1x8xf32> -> vector<1x8xf32>
    %375 = arith.addf %369, %374 : vector<1x8xf32>
    %376 = arith.addf %375, %371 : vector<1x8xf32>
    %cst_118 = arith.constant dense<0.000000e+00> : vector<1xf32>
    %377 = vector.multi_reduction <add>, %376, %cst_118 [1] : vector<1x8xf32> to vector<1xf32>
    %378 = vector.shape_cast %377 : vector<1xf32> to vector<1x1xf32>
    %cst_119 = arith.constant 8.000000e+00 : f32
    %379 = vector.broadcast %cst_119 : f32 to vector<1x1xf32>
    %380 = arith.divf %378, %379 : vector<1x1xf32>
    %381 = vector.broadcast %380 : vector<1x1xf32> to vector<1x8xf32>
    %382 = arith.subf %376, %381 : vector<1x8xf32>
    %383 = arith.mulf %382, %382 : vector<1x8xf32>
    %cst_120 = arith.constant dense<0.000000e+00> : vector<1xf32>
    %384 = vector.multi_reduction <add>, %383, %cst_120 [1] : vector<1x8xf32> to vector<1xf32>
    %385 = vector.shape_cast %384 : vector<1xf32> to vector<1x1xf32>
    %cst_121 = arith.constant 8.000000e+00 : f32
    %386 = vector.broadcast %cst_121 : f32 to vector<1x1xf32>
    %387 = arith.divf %385, %386 : vector<1x1xf32>
    %388 = vector.broadcast %380 : vector<1x1xf32> to vector<1x8xf32>
    %389 = arith.subf %376, %388 : vector<1x8xf32>
    %cst_122 = arith.constant 9.99999974E-6 : f32
    %390 = vector.broadcast %cst_122 : f32 to vector<1x1xf32>
    %391 = arith.addf %387, %390 : vector<1x1xf32>
    %392 = math.rsqrt %391 : vector<1x1xf32>
    %393 = vector.broadcast %392 : vector<1x1xf32> to vector<1x8xf32>
    %394 = arith.mulf %389, %393 : vector<1x8xf32>
    %395 = arith.mulf %394, %372 : vector<1x8xf32>
    %396 = arith.addf %395, %373 : vector<1x8xf32>
    %cst_123 = arith.constant 0.000000e+00 : f32
    %397 = vector.broadcast %cst_123 : f32 to vector<1x64xf32>
    %398 = arith.maximumf %66, %397 : vector<1x64xf32>
    %cst_124 = arith.constant dense<0.000000e+00> : vector<1x32xf32>
    %399 = tpu.matmul %398, %96, %cst_124 {dimension_numbers = #tpu.dot_dimension_numbers<[1], [0], [0], [1], [0, 0, 1, 1], [], []>} : vector<1x64xf32>, vector<64x32xf32>, vector<1x32xf32> -> vector<1x32xf32>
    %400 = arith.addf %399, %97 : vector<1x32xf32>
    %401 = arith.subf %101, %400 : vector<1x32xf32>
    %c0_125 = arith.constant 0 : index
    %c0_126 = arith.constant 0 : index
    %402 = vector.load %arg19[%c0_125, %c0_126] : memref<96x32xf32, #tpu.memory_space<vmem>>, vector<32x32xf32>
    %c32 = arith.constant 32 : index
    %c0_127 = arith.constant 0 : index
    %403 = vector.load %arg19[%c32, %c0_127] : memref<96x32xf32, #tpu.memory_space<vmem>>, vector<32x32xf32>
    %c64_128 = arith.constant 64 : index
    %c0_129 = arith.constant 0 : index
    %404 = vector.load %arg19[%c64_128, %c0_129] : memref<96x32xf32, #tpu.memory_space<vmem>>, vector<32x32xf32>
    %cst_130 = arith.constant dense<0.000000e+00> : vector<1x32xf32>
    %405 = tpu.matmul %401, %402, %cst_130 {dimension_numbers = #tpu.dot_dimension_numbers<[1], [0], [0], [1], [0, 0, 1, 1], [], []>} : vector<1x32xf32>, vector<32x32xf32>, vector<1x32xf32> -> vector<1x32xf32>
    %cst_131 = arith.constant 0.000000e+00 : f32
    %406 = vector.broadcast %cst_131 : f32 to vector<1x32xf32>
    %407 = arith.maximumf %405, %406 : vector<1x32xf32>
    %cst_132 = arith.constant dense<0.000000e+00> : vector<1x32xf32>
    %408 = tpu.matmul %407, %403, %cst_132 {dimension_numbers = #tpu.dot_dimension_numbers<[1], [0], [0], [1], [0, 0, 1, 1], [], []>} : vector<1x32xf32>, vector<32x32xf32>, vector<1x32xf32> -> vector<1x32xf32>
    %cst_133 = arith.constant dense<0.000000e+00> : vector<1x32xf32>
    %409 = tpu.matmul %407, %404, %cst_133 {dimension_numbers = #tpu.dot_dimension_numbers<[1], [0], [0], [1], [0, 0, 1, 1], [], []>} : vector<1x32xf32>, vector<32x32xf32>, vector<1x32xf32> -> vector<1x32xf32>
    %410 = math.exp %409 : vector<1x32xf32>
    %c0_134 = arith.constant 0 : index
    %c0_135 = arith.constant 0 : index
    %411 = vector.load %arg18[%c0_134, %c0_135] : memref<2x32xf32, #tpu.memory_space<vmem>>, vector<2x32xf32>
    %412 = vector.extract_strided_slice %411 {offsets = [0, 0], sizes = [1, 32], strides = [1, 1]} : vector<2x32xf32> to vector<1x32xf32>
    %413 = arith.mulf %412, %410 : vector<1x32xf32>
    %414 = arith.addf %408, %413 : vector<1x32xf32>
    %415 = vector.extract_strided_slice %411 {offsets = [1, 0], sizes = [1, 32], strides = [1, 1]} : vector<2x32xf32> to vector<1x32xf32>
    %416 = arith.mulf %415, %410 : vector<1x32xf32>
    %417 = arith.addf %408, %416 : vector<1x32xf32>
    %418 = tpu.concatenate %414, %417, %401 in 1 : vector<1x32xf32>, vector<1x32xf32>, vector<1x32xf32> -> vector<1x96xf32>
    %c0_136 = arith.constant 0 : index
    %c0_137 = arith.constant 0 : index
    %419 = vector.load %arg20[%c0_136, %c0_137] : memref<129x96xf32, #tpu.memory_space<vmem>>, vector<96x96xf32>
    %c96 = arith.constant 96 : index
    %c0_138 = arith.constant 0 : index
    %420 = vector.load %arg20[%c96, %c0_138] : memref<129x96xf32, #tpu.memory_space<vmem>>, vector<32x96xf32>
    %c128 = arith.constant 128 : index
    %c0_139 = arith.constant 0 : index
    %421 = vector.load %arg20[%c128, %c0_139] : memref<129x96xf32, #tpu.memory_space<vmem>>, vector<1x96xf32>
    %c0_140 = arith.constant 0 : index
    %c0_141 = arith.constant 0 : index
    %422 = vector.load %arg14[%c0_140, %c0_141] : memref<12x32xf32, #tpu.memory_space<vmem>>, vector<12x32xf32>
    %cst_142 = arith.constant dense<0.000000e+00> : vector<1x96xf32>
    %423 = tpu.matmul %418, %419, %cst_142 {dimension_numbers = #tpu.dot_dimension_numbers<[1], [0], [0], [1], [0, 0, 1, 1], [], []>} : vector<1x96xf32>, vector<96x96xf32>, vector<1x96xf32> -> vector<1x96xf32>
    %424 = arith.addf %423, %421 : vector<1x96xf32>
    %cst_143 = arith.constant dense<0.000000e+00> : vector<12x96xf32>
    %425 = tpu.matmul %422, %420, %cst_143 {dimension_numbers = #tpu.dot_dimension_numbers<[1], [0], [0], [1], [0, 0, 1, 1], [], []>} : vector<12x32xf32>, vector<32x96xf32>, vector<12x96xf32> -> vector<12x96xf32>
    %426 = vector.broadcast %424 : vector<1x96xf32> to vector<12x96xf32>
    %427 = arith.addf %425, %426 : vector<12x96xf32>
    %428 = math.tanh %427 : vector<12x96xf32>
    %c0_144 = arith.constant 0 : index
    %c0_145 = arith.constant 0 : index
    %429 = vector.load %arg21[%c0_144, %c0_145] : memref<96x3xf32, #tpu.memory_space<vmem>>, vector<96x3xf32>
    %cst_146 = arith.constant dense<0.000000e+00> : vector<12x3xf32>
    %430 = tpu.matmul %428, %429, %cst_146 {dimension_numbers = #tpu.dot_dimension_numbers<[1], [0], [0], [1], [0, 0, 1, 1], [], []>} : vector<12x96xf32>, vector<96x3xf32>, vector<12x3xf32> -> vector<12x3xf32>
    %cst_147 = arith.constant dense<0xFF800000> : vector<3xf32>
    %431 = vector.multi_reduction <maximumf>, %430, %cst_147 [0] : vector<12x3xf32> to vector<3xf32>
    %432 = vector.shape_cast %431 : vector<3xf32> to vector<1x3xf32>
    %433 = vector.broadcast %432 : vector<1x3xf32> to vector<12x3xf32>
    %434 = arith.subf %430, %433 : vector<12x3xf32>
    %435 = math.exp %434 : vector<12x3xf32>
    %cst_148 = arith.constant dense<0.000000e+00> : vector<3xf32>
    %436 = vector.multi_reduction <add>, %435, %cst_148 [0] : vector<12x3xf32> to vector<3xf32>
    %437 = vector.shape_cast %436 : vector<3xf32> to vector<1x3xf32>
    %438 = tpu.reciprocal %437 {approx = true} : vector<1x3xf32> -> vector<1x3xf32>
    %439 = vector.broadcast %438 : vector<1x3xf32> to vector<12x3xf32>
    %440 = arith.mulf %435, %439 : vector<12x3xf32>
    %441 = vector.extract_strided_slice %440 {offsets = [0, 0], sizes = [12, 1], strides = [1, 1]} : vector<12x3xf32> to vector<12x1xf32>
    %c0_149 = arith.constant 0 : index
    %c0_150 = arith.constant 0 : index
    %442 = vector.load %arg15[%c0_149, %c0_150] : memref<12x16xf32, #tpu.memory_space<vmem>>, vector<12x16xf32>
    %443 = vector.broadcast %441 : vector<12x1xf32> to vector<12x16xf32>
    %444 = arith.mulf %443, %442 : vector<12x16xf32>
    %cst_151 = arith.constant dense<0.000000e+00> : vector<16xf32>
    %445 = vector.multi_reduction <add>, %444, %cst_151 [0] : vector<12x16xf32> to vector<16xf32>
    %446 = vector.shape_cast %445 : vector<16xf32> to vector<1x16xf32>
    %447 = vector.extract_strided_slice %440 {offsets = [0, 1], sizes = [12, 1], strides = [1, 1]} : vector<12x3xf32> to vector<12x1xf32>
    %448 = vector.broadcast %447 : vector<12x1xf32> to vector<12x32xf32>
    %449 = arith.mulf %448, %422 : vector<12x32xf32>
    %cst_152 = arith.constant dense<0.000000e+00> : vector<32xf32>
    %450 = vector.multi_reduction <add>, %449, %cst_152 [0] : vector<12x32xf32> to vector<32xf32>
    %451 = vector.shape_cast %450 : vector<32xf32> to vector<1x32xf32>
    %452 = vector.extract_strided_slice %440 {offsets = [0, 2], sizes = [12, 1], strides = [1, 1]} : vector<12x3xf32> to vector<12x1xf32>
    %453 = vector.broadcast %452 : vector<12x1xf32> to vector<12x32xf32>
    %454 = arith.mulf %453, %422 : vector<12x32xf32>
    %cst_153 = arith.constant dense<0.000000e+00> : vector<32xf32>
    %455 = vector.multi_reduction <add>, %454, %cst_153 [0] : vector<12x32xf32> to vector<32xf32>
    %456 = vector.shape_cast %455 : vector<32xf32> to vector<1x32xf32>
    %c0_154 = arith.constant 0 : index
    %c0_155 = arith.constant 0 : index
    %457 = vector.load %arg16[%c0_154, %c0_155] : memref<8x16xf32, #tpu.memory_space<vmem>>, vector<8x16xf32>
    %cst_156 = arith.constant dense<0.000000e+00> : vector<1x8xf32>
    %458 = tpu.matmul %446, %457, %cst_156 {dimension_numbers = #tpu.dot_dimension_numbers<[1], [1], [0], [0], [0, 0, 1, 0], [], []>} : vector<1x16xf32>, vector<8x16xf32>, vector<1x8xf32> -> vector<1x8xf32>
    %459 = arith.negf %458 : vector<1x8xf32>
    %460 = math.exp %459 : vector<1x8xf32>
    %cst_157 = arith.constant 1.000000e+00 : f32
    %461 = vector.broadcast %cst_157 : f32 to vector<1x8xf32>
    %462 = arith.addf %461, %460 : vector<1x8xf32>
    %463 = arith.divf %461, %462 : vector<1x8xf32>
    %c0_158 = arith.constant 0 : index
    %c0_159 = arith.constant 0 : index
    %464 = vector.load %arg17[%c0_158, %c0_159] : memref<34x16xf32, #tpu.memory_space<vmem>>, vector<32x16xf32>
    %c32_160 = arith.constant 32 : index
    %c0_161 = arith.constant 0 : index
    %465 = vector.load %arg17[%c32_160, %c0_161] : memref<34x16xf32, #tpu.memory_space<vmem>>, vector<1x16xf32>
    %c33 = arith.constant 33 : index
    %c0_162 = arith.constant 0 : index
    %466 = vector.load %arg17[%c33, %c0_162] : memref<34x16xf32, #tpu.memory_space<vmem>>, vector<1x16xf32>
    %cst_163 = arith.constant dense<0.000000e+00> : vector<1x16xf32>
    %467 = tpu.matmul %451, %464, %cst_163 {dimension_numbers = #tpu.dot_dimension_numbers<[1], [0], [0], [1], [0, 0, 1, 1], [], []>} : vector<1x32xf32>, vector<32x16xf32>, vector<1x16xf32> -> vector<1x16xf32>
    %468 = arith.addf %467, %465 : vector<1x16xf32>
    %469 = arith.addf %468, %466 : vector<1x16xf32>
    %cst_164 = arith.constant dense<0xFF800000> : vector<1xf32>
    %470 = vector.multi_reduction <maximumf>, %469, %cst_164 [1] : vector<1x16xf32> to vector<1xf32>
    %471 = vector.shape_cast %470 : vector<1xf32> to vector<1x1xf32>
    %472 = vector.broadcast %471 : vector<1x1xf32> to vector<1x16xf32>
    %473 = arith.subf %469, %472 : vector<1x16xf32>
    %474 = math.exp %473 : vector<1x16xf32>
    %cst_165 = arith.constant dense<0.000000e+00> : vector<1xf32>
    %475 = vector.multi_reduction <add>, %474, %cst_165 [1] : vector<1x16xf32> to vector<1xf32>
    %476 = vector.shape_cast %475 : vector<1xf32> to vector<1x1xf32>
    %477 = tpu.reciprocal %476 {approx = true} : vector<1x1xf32> -> vector<1x1xf32>
    %478 = vector.broadcast %477 : vector<1x1xf32> to vector<1x16xf32>
    %479 = arith.mulf %474, %478 : vector<1x16xf32>
    %cst_166 = arith.constant dense<0.000000e+00> : vector<1x8xf32>
    %480 = tpu.matmul %479, %457, %cst_166 {dimension_numbers = #tpu.dot_dimension_numbers<[1], [1], [0], [0], [0, 0, 1, 0], [], []>} : vector<1x16xf32>, vector<8x16xf32>, vector<1x8xf32> -> vector<1x8xf32>
    %481 = arith.negf %480 : vector<1x8xf32>
    %482 = math.exp %481 : vector<1x8xf32>
    %cst_167 = arith.constant 1.000000e+00 : f32
    %483 = vector.broadcast %cst_167 : f32 to vector<1x8xf32>
    %484 = arith.addf %483, %482 : vector<1x8xf32>
    %485 = arith.divf %483, %484 : vector<1x8xf32>
    %c0_168 = arith.constant 0 : index
    %c0_169 = arith.constant 0 : index
    %486 = vector.load %arg22[%c0_168, %c0_169] : memref<33x2xf32, #tpu.memory_space<vmem>>, vector<32x2xf32>
    %cst_170 = arith.constant dense<0.000000e+00> : vector<1x2xf32>
    %487 = tpu.matmul %456, %486, %cst_170 {dimension_numbers = #tpu.dot_dimension_numbers<[1], [0], [0], [1], [0, 0, 1, 1], [], []>} : vector<1x32xf32>, vector<32x2xf32>, vector<1x2xf32> -> vector<1x2xf32>
    %c32_171 = arith.constant 32 : index
    %c0_172 = arith.constant 0 : index
    %488 = vector.load %arg22[%c32_171, %c0_172] : memref<33x2xf32, #tpu.memory_space<vmem>>, vector<1x2xf32>
    %489 = arith.addf %487, %488 : vector<1x2xf32>
    %cst_173 = arith.constant dense<0xFF800000> : vector<1xf32>
    %490 = vector.multi_reduction <maximumf>, %489, %cst_173 [1] : vector<1x2xf32> to vector<1xf32>
    %491 = vector.shape_cast %490 : vector<1xf32> to vector<1x1xf32>
    %492 = vector.broadcast %491 : vector<1x1xf32> to vector<1x2xf32>
    %493 = arith.subf %489, %492 : vector<1x2xf32>
    %494 = math.exp %493 : vector<1x2xf32>
    %cst_174 = arith.constant dense<0.000000e+00> : vector<1xf32>
    %495 = vector.multi_reduction <add>, %494, %cst_174 [1] : vector<1x2xf32> to vector<1xf32>
    %496 = vector.shape_cast %495 : vector<1xf32> to vector<1x1xf32>
    %497 = tpu.reciprocal %496 {approx = true} : vector<1x1xf32> -> vector<1x1xf32>
    %498 = vector.broadcast %497 : vector<1x1xf32> to vector<1x2xf32>
    %499 = arith.mulf %494, %498 : vector<1x2xf32>
    %500 = vector.extract_strided_slice %499 {offsets = [0, 0], sizes = [1, 1], strides = [1, 1]} : vector<1x2xf32> to vector<1x1xf32>
    %501 = vector.broadcast %500 : vector<1x1xf32> to vector<1x8xf32>
    %502 = arith.mulf %501, %463 : vector<1x8xf32>
    %503 = vector.extract_strided_slice %499 {offsets = [0, 1], sizes = [1, 1], strides = [1, 1]} : vector<1x2xf32> to vector<1x1xf32>
    %504 = vector.broadcast %503 : vector<1x1xf32> to vector<1x8xf32>
    %505 = arith.mulf %504, %485 : vector<1x8xf32>
    %506 = arith.addf %502, %505 : vector<1x8xf32>
    %507 = arith.mulf %506, %396 : vector<1x8xf32>
    %508 = arith.negf %507 : vector<1x8xf32>
    %509 = math.exp %508 : vector<1x8xf32>
    %cst_175 = arith.constant 1.000000e+00 : f32
    %510 = vector.broadcast %cst_175 : f32 to vector<1x8xf32>
    %511 = arith.addf %510, %509 : vector<1x8xf32>
    %512 = arith.divf %510, %511 : vector<1x8xf32>
    %c0_176 = arith.constant 0 : index
    %c0_177 = arith.constant 0 : index
    %513 = vector.load %arg13[%c0_176, %c0_177] : memref<8x8xf32, #tpu.memory_space<vmem>>, vector<8x8xf32>
    %cst_178 = arith.constant dense<0.000000e+00> : vector<1x8xf32>
    %514 = tpu.matmul %512, %513, %cst_178 {dimension_numbers = #tpu.dot_dimension_numbers<[1], [0], [0], [1], [0, 0, 1, 1], [], []>} : vector<1x8xf32>, vector<8x8xf32>, vector<1x8xf32> -> vector<1x8xf32>
    %515 = arith.mulf %514, %512 : vector<1x8xf32>
    %516 = vector.shape_cast %515 : vector<1x8xf32> to vector<1x1x8xf32>
    %cst_179 = arith.constant dense<0.000000e+00> : vector<1xf32>
    %517 = vector.multi_reduction <add>, %516, %cst_179 [1, 2] : vector<1x1x8xf32> to vector<1xf32>
    %518 = vector.shape_cast %517 : vector<1xf32> to vector<1x1x1xf32>
    %519 = vector.extract %518[0, 0, 0] : f32 from vector<1x1x1xf32>
    %520 = vector.broadcast %519 : f32 to vector<1x1xf32>
    %cst_180 = arith.constant 5.000000e-04 : f32
    %521 = vector.broadcast %cst_180 : f32 to vector<1x1xf32>
    %522 = arith.mulf %521, %520 : vector<1x1xf32>
    %cst_181 = arith.constant 0.000000e+00 : f32
    %523 = vector.broadcast %cst_181 : f32 to vector<1x119xf32>
    %524 = tpu.concatenate %507, %522, %523 in 1 : vector<1x8xf32>, vector<1x1xf32>, vector<1x119xf32> -> vector<1x128xf32>
    %c0_182 = arith.constant 0 : index
    %c0_183 = arith.constant 0 : index
    %525 = vector.load %arg23[%c0_182, %c0_183] : memref<1x128xf32, #tpu.memory_space<vmem>>, vector<1x128xf32>
    tpu.vector_store %arg23[%c0_182, %c0_183], %524 {strides = array<i32>} : memref<1x128xf32, #tpu.memory_space<vmem>>, vector<1x128xf32>,
    return
  }
}

</mosaic_0001>

<bundles_post_ra>
// kernel: _drugrec_fused.1
= control target key start
LH: loop header
LB: loop body
LE: loop exit
PB: predicated region body
PF: predicated region fallthrough
CT: control target
= control target key end

     0   :  { %v5737_v3 = vmov 0.0   ;;  %vm121_vm0 = vcmask 523264   ;;  %v111_v50 = vlaneseq  ;;  %s5738_s30 = smov 64   ;;  %vm5740_vm1 = vmmov 0   ;;  %s6999_s1 = inlined_call_operand.vmem [shape: f32[128,192], index: 1, kind: input, shape index: {}]   ;;  %s7000_s0 = inlined_call_operand.vmem [shape: f32[3,64], index: 0, kind: input, shape index: {}]   ;;  %s7001_s2 = inlined_call_operand.vmem [shape: f32[2,192], index: 2, kind: input, shape index: {}]   ;;  %s7002_s5 = inlined_call_operand.vmem [shape: f32[64,32], index: 5, kind: input, shape index: {}]   ;;  %s7003_s4 = inlined_call_operand.vmem [shape: f32[18,64], index: 4, kind: input, shape index: {}]   ;;  %s7004_s3 = inlined_call_operand.vmem [shape: f32[65,32], index: 3, kind: input, shape index: {}]   ;;  %s7005_s8 = inlined_call_operand.vmem [shape: f32[2,128,96], index: 8, kind: input, shape index: {}]   ;;  %s7006_s9 = inlined_call_operand.vmem [shape: f32[2,8,96], index: 9, kind: input, shape index: {}]   ;;  %s7007_s6 = inlined_call_operand.vmem [shape: f32[18,18], index: 6, kind: input, shape index: {}]   ;;  %s7008_s7 = inlined_call_operand.vmem [shape: f32[6,18], index: 7, kind: input, shape index: {}]   ;;  %s7009_s10 = inlined_call_operand.vmem [shape: f32[6,32], index: 10, kind: input, shape index: {}]   ;;  %s7010_s11 = inlined_call_operand.vmem [shape: f32[8,32], index: 11, kind: input, shape index: {}]   ;;  %s7011_s12 = inlined_call_operand.vmem [shape: f32[11,8], index: 12, kind: input, shape index: {}]   ;;  %s7012_s19 = inlined_call_operand.vmem [shape: f32[96,32], index: 19, kind: input, shape index: {}]   ;;  %s7013_s20 = inlined_call_operand.vmem [shape: f32[129,96], index: 20, kind: input, shape index: {}]   ;;  %s7014_s18 = inlined_call_operand.vmem [shape: f32[2,32], index: 18, kind: input, shape index: {}]   ;;  %s7015_s14 = inlined_call_operand.vmem [shape: f32[12,32], index: 14, kind: input, shape index: {}]   ;;  %s7016_s21 = inlined_call_operand.vmem [shape: f32[96,3], index: 21, kind: input, shape index: {}]   ;;  %s7017_s16 = inlined_call_operand.vmem [shape: f32[8,16], index: 16, kind: input, shape index: {}]   ;;  %s7018_s22 = inlined_call_operand.vmem [shape: f32[33,2], index: 22, kind: input, shape index: {}]   ;;  %s7019_s15 = inlined_call_operand.vmem [shape: f32[12,16], index: 15, kind: input, shape index: {}]   ;;  %s7020_s17 = inlined_call_operand.vmem [shape: f32[34,16], index: 17, kind: input, shape index: {}]   ;;  %s7021_s13 = inlined_call_operand.vmem [shape: f32[8,8], index: 13, kind: input, shape index: {}]   ;;  %s7022_s23 = inlined_call_operand.vmem [shape: f32[1,128], index: 23, kind: output, shape index: {}]  }
   0x1   :  { %7032 = sst [smem:[#allocation2_spill]] %s6999_s1  ;;  %189 = vmatprep.mubr.f32.mxu0 %v5737_v3  ;;  %274 = vmatprep.mubr.f32.mxu1 %v5737_v3  ;;  %vm714_vm2 = vcmask 261120   ;;  %vm816_vm3 = vcmask 130048   ;;  %vm912_vm5 = vcmask 146432   ;;  %vm919_vm6 = vcmask 140288  }
   0x2   :  { %7033 = sst [smem:[#allocation3_spill]] %s7000_s0  ;;  %s7040_s24 = sld [smem:[#allocation2_spill]]  ;;  %v5974_v51 = vshrl.u32 %v111_v50, 7  ;;  %vm6170_vm4 = vmpackc.low %vm816_vm3, %vm816_vm3  ;;  %vm964_vm7 = vcmask 1041408   ;;  %vm1480_vm8 = vcmask 254976   ;;  %vm3026_vm9 = vcmask 1045504  }
   0x3   :  { %7034 = sst [smem:[#allocation4_spill]] %s7001_s2  ;;  %s7041_s28 = sld [smem:[#allocation3_spill]]  ;;  %vm3011_vm10 = vcmask 48128   ;;  %vm3193_vm11 = vcmask 64512   ;;  %vm3634_vm12 = vcmask 785408   ;;  %vm3890_vm13 = vcmask 19456  }
   0x4   :  { %7035 = sst [smem:[#allocation5_spill]] %s7002_s5  ;;  %v5977_v52 = vsub.s32 0, %v5974_v51  ;;  %s7042_s5 = sld [smem:[#allocation4_spill]]  ;;  %vm3888_vm14 = vcmask 23552   ;;  %vm3932_vm15 = vcmask 125952  }
   0x5   :  { %7036 = sst [smem:[#allocation6_spill]] %s7003_s4  ;;  %s7043_s0 = sld [smem:[#allocation5_spill]] }
   0x6   :  { %7037 = sst [smem:[#allocation7_spill]] %s7004_s3  ;;  %s7044_s27 = sld [smem:[#allocation6_spill]] }
   0x7   :  { %7038 = sst [smem:[#allocation8_spill]] %s7005_s8  ;;  %s7045_s1 = sld [smem:[#allocation7_spill]] }
   0x8   :  { %7039 = sst [smem:[#allocation9_spill]] %s7006_s9  ;;  %v75_v0 = vld [vmem:[%s7040_s24 + $0x8] sm:$0xff]  ;;  %v77_v1 = vld [vmem:[%s7040_s24 + $0x18] sm:$0xff]  ;;  %v74_v6 = vld [vmem:[%s7040_s24] sm:$0xff]  ;;  %s7046_s26 = sld [smem:[#allocation8_spill]] }
   0x9   :  { %v91_v2 = vld [vmem:[%s7040_s24 + $0x88] sm:$0xff]  ;;  %v5281_v4 = vpack.c.bf16 %v77_v1, %v75_v0  ;;  %v93_v5 = vld [vmem:[%s7040_s24 + $0x98] sm:$0xff]  ;;  %v76_v7 = vld [vmem:[%s7040_s24 + $0x10] sm:$0xff]  ;;  %s5741_s4 = smov 96   ;;  %s7030_s2 = smov 48  }
   0xa   :  { %v5297_v8 = vpack.c.bf16 %v93_v5, %v91_v2  ;;  %v5283_v9 = vpack.c.bf16 %v76_v7, %v74_v6  ;;  %v90_v10 = vld [vmem:[%s7040_s24 + $0x80] sm:$0xff]  ;;  %v92_v11 = vld [vmem:[%s7040_s24 + $0x90] sm:$0xff]  ;;  %v79_v12 = vld [vmem:[%s7040_s24 + $0x28] sm:$0xff] }
   0xb   :  { %5282 = vmatprep.subr.bf16.mxu0 %v5281_v4  ;;  %v5299_v13 = vpack.c.bf16 %v92_v11, %v90_v10  ;;  %v81_v14 = vld [vmem:[%s7040_s24 + $0x38] sm:$0xff]  ;;  %v95_v15 = vld [vmem:[%s7040_s24 + $0xa8] sm:$0xff]  ;;  %v78_v19 = vld [vmem:[%s7040_s24 + $0x20] sm:$0xff]  ;;  %v5994_v4 = vsub.s32 1, %v5974_v51 }
   0xc   :  { %v97_v16 = vld [vmem:[%s7040_s24 + $0xb8] sm:$0xff]  ;;  %5298 = vmatprep.subr.bf16.mxu1 %v5297_v8  ;;  %5284 = vmatpush1.bf16.msra.mxu0 %v5283_v9  ;;  %v5285_v17 = vpack.c.bf16 %v81_v14, %v79_v12  ;;  %v80_v20 = vld [vmem:[%s7040_s24 + $0x30] sm:$0xff]  ;;  %v94_v21 = vld [vmem:[%s7040_s24 + $0xa0] sm:$0xff] }
   0xd   :  { %v5301_v18 = vpack.c.bf16 %v97_v16, %v95_v15  ;;  %5300 = vmatpush1.bf16.msra.mxu1 %v5299_v13  ;;  %v5287_v22 = vpack.c.bf16 %v80_v20, %v78_v19  ;;  %v96_v23 = vld [vmem:[%s7040_s24 + $0xb0] sm:$0xff]  ;;  %v83_v24 = vld [vmem:[%s7040_s24 + $0x48] sm:$0xff]  ;;  %v85_v25 = vld [vmem:[%s7040_s24 + $0x58] sm:$0xff] }
   0xe   :  { %5286 = vmatprep.subr.bf16.mxu0 %v5285_v17  ;;  %v5303_v26 = vpack.c.bf16 %v96_v23, %v94_v21  ;;  %v5289_v27 = vpack.c.bf16 %v85_v25, %v83_v24  ;;  %v99_v28 = vld [vmem:[%s7040_s24 + $0xc8] sm:$0xff]  ;;  %v101_v29 = vld [vmem:[%s7040_s24 + $0xd8] sm:$0xff]  ;;  %v82_v30 = vld [vmem:[%s7040_s24 + $0x40] sm:$0xff] }
   0xf   :  { %5302 = vmatprep.subr.bf16.mxu1 %v5301_v18  ;;  %v5305_v31 = vpack.c.bf16 %v101_v29, %v99_v28  ;;  %v84_v32 = vld [vmem:[%s7040_s24 + $0x50] sm:$0xff]  ;;  %v98_v33 = vld [vmem:[%s7040_s24 + $0xc0] sm:$0xff]  ;;  %v87_v36 = vld [vmem:[%s7040_s24 + $0x68] sm:$0xff] }
  0x10   :  { %v100_v34 = vld [vmem:[%s7040_s24 + $0xd0] sm:$0xff]  ;;  %5288 = vmatpush1.bf16.msra.mxu0 %v5287_v22  ;;  %v5291_v35 = vpack.c.bf16 %v84_v32, %v82_v30  ;;  %v89_v37 = vld [vmem:[%s7040_s24 + $0x78] sm:$0xff]  ;;  %v103_v38 = vld [vmem:[%s7040_s24 + $0xe8] sm:$0xff] }
  0x11   :  { %5304 = vmatpush1.bf16.msra.mxu1 %v5303_v26  ;;  %5290 = vmatprep.subr.bf16.mxu0 %v5289_v27  ;;  %v5307_v39 = vpack.c.bf16 %v100_v34, %v98_v33  ;;  %v5293_v40 = vpack.c.bf16 %v89_v37, %v87_v36  ;;  %v105_v41 = vld [vmem:[%s7040_s24 + $0xf8] sm:$0xff]  ;;  %v86_v42 = vld [vmem:[%s7040_s24 + $0x60] sm:$0xff]  ;;  %v88_v43 = vld [vmem:[%s7040_s24 + $0x70] sm:$0xff] }
  0x12   :  { %5306 = vmatprep.subr.bf16.mxu1 %v5305_v31  ;;  %v5309_v44 = vpack.c.bf16 %v105_v41, %v103_v38  ;;  %v102_v45 = vld [vmem:[%s7040_s24 + $0xe0] sm:$0xff]  ;;  %v104_v46 = vld [vmem:[%s7040_s24 + $0xf0] sm:$0xff]  ;;  %v5295_v47 = vpack.c.bf16 %v88_v43, %v86_v42  ;;  %v5739_v41 = vmov 0.0|0.0   ;;  %v594_v43 = vld [vmem:[%s7043_s0 + $0x8] sm:$0xff] }
  0x13   :  { %v5311_v48 = vpack.c.bf16 %v104_v46, %v102_v45  ;;  %v109_v49 = vld [vmem:[%s7041_s28] sm:$0x7]  ;;  %v596_v46 = vld [vmem:[%s7043_s0 + $0x18] sm:$0xff]  ;;  %s5742_s28 = smov 80  }
  0x14   :  { %5292 = vmatpush1.bf16.msra.mxu0 %v5291_v35  ;;  %v106_v53 = vld [vmem:[%s7042_s5] ss:$2 sm:$0x3]  ;;  %v4438_v54 = vld [vmem:[%s7042_s5 + $0x1] ss:$2 sm:$0x3] }
  0x15   :  { %5308 = vmatpush1.bf16.msra.mxu1 %v5307_v39  ;;  %5294 = vmatprep.subr.bf16.mxu0 %v5293_v40  ;;  %v114_v55 = vrot.slane %v106_v53, %v5977_v52  ;;  %v5987_v56 = vrot.slane %v4438_v54, %v5977_v52  ;;  %v5997_v5 = vrot.slane %v4438_v54, %v5994_v4  ;;  %v593_v42 = vld [vmem:[%s7043_s0] sm:$0xff]  ;;  %v600_v54 = vld [vmem:[%s7043_s0 + $0x38] sm:$0xff]  ;;  %s7047_s5 = sld [smem:[#allocation9_spill]] }
  0x16   :  { %5310 = vmatprep.subr.bf16.mxu1 %v5309_v44  ;;  %v118_v6 = vrot.slane %v106_v53, %v5994_v4  ;;  %v5358_v45 = vpack.c.bf16 %v594_v43, %v593_v42  ;;  %v599_v53 = vld [vmem:[%s7043_s0 + $0x30] sm:$0xff]  ;;  %v696_v43 = vld [vmem:[%s7046_s26 + $0x18] sm:$0xff] }
  0x17   :  { %v695_v42 = vld [vmem:[%s7046_s26 + $0x10] sm:$0xff] }
  0x18   :  { %5296 = vmatpush1.bf16.msra.mxu0 %v5295_v47 }
  0x19   :  { %5312 = vmatpush1.bf16.msra.mxu1 %v5311_v48  ;;  %5314 = vmatprep.subr.bf16.mxu0 %v5297_v8 }
  0x1a   :  { %5330 = vmatprep.subr.bf16.mxu1 %v5297_v8 }
  0x1b   :  { %4439 = vmatmul.mubr.msk.f32.vlgmr.msra.gmra.mrb[0].mxu0 %vm121_vm0, %v109_v49  ;;  %v598_v49 = vld [vmem:[%s7043_s0 + $0x28] sm:$0xff] }
  0x1c   :  { %275 = vmatmul.mubr.f32.vlgmr.msra.gmra.mrb[0].mxu1 %v5737_v3  ;;  %5316 = vmatpush1.bf16.msra.mxu0 %v5299_v13 }
  0x1d   :  { %5318 = vmatprep.subr.bf16.mxu0 %v5301_v18  ;;  %368 = vmatprep.mubr.f32.mxu0 %v5737_v3 }
  0x1e   :  { %5332 = vmatpush1.bf16.msra.mxu1 %v5299_v13  ;;  %471 = vmatprep.mubr.f32.mxu1 %v5737_v3 }
  0x1f   :  { %5334 = vmatprep.subr.bf16.mxu1 %v5301_v18 }
  0x20   :  { %5320 = vmatpush1.bf16.msra.mxu0 %v5303_v26 }
  0x21   :  { %5322 = vmatprep.subr.bf16.mxu0 %v5305_v31 }
  0x22   :  { %5336 = vmatpush1.bf16.msra.mxu1 %v5303_v26 }
  0x23   :  { %5338 = vmatprep.subr.bf16.mxu1 %v5305_v31 }
  0x24   :  { %5324 = vmatpush1.bf16.msra.mxu0 %v5307_v39 }
  0x25   :  { %5326 = vmatprep.subr.bf16.mxu0 %v5309_v44 }
  0x26   :  { %5340 = vmatpush1.bf16.msra.mxu1 %v5307_v39 }
  0x27   :  { %5342 = vmatprep.subr.bf16.mxu1 %v5309_v44  ;;  %v595_v44 = vld [vmem:[%s7043_s0 + $0x10] sm:$0xff] }
  0x28   :  { %5328 = vmatpush1.bf16.msra.mxu0 %v5311_v48  ;;  %v5361_v47 = vpack.c.bf16 %v596_v46, %v595_v44 }
  0x29   :  { %5345 = vmatprep.subr.bf16.mxu0 %v5739_v41 }
  0x2a   :  { %5344 = vmatpush1.bf16.msra.mxu1 %v5311_v48  ;;  %v597_v48 = vld [vmem:[%s7043_s0 + $0x20] sm:$0xff]  ;;  %s5743_s0 = smov 112  }
  0x2b   :  { %5357 = vmatprep.subr.bf16.mxu1 %v5739_v41  ;;  %v5364_v50 = vpack.c.bf16 %v598_v49, %v597_v48  ;;  %v6156_v48 = vld [vmem:[%s7047_s5] sm:$0xff] }
  0xee   :  { %v191_v57 = vpop.f32.mrb[0].mxu0 }
  0xef   :  { %v5989_v58 = vadd.f32 %v191_v57, %v114_v55  ;;  %v276_v59 = vpop.f32.mrb[0].mxu1  ;;  %v193_v60 = vpop.f32.mrb[1].mxu0  ;;  %v5367_v55 = vpack.c.bf16 %v600_v54, %v599_v53  ;;  %v590_v57 = vld [vmem:[%s7044_s27] sm:$0xff] }
  0xf0   :  { %v277_v61 = vadd.f32 %v276_v59, %v5987_v56  ;;  %v278_v62 = vpop.f32.mrb[1].mxu1  ;;  %v6001_v9 = vadd.f32 %v193_v60, %v118_v6  ;;  %v591_v59 = vld [vmem:[%s7044_s27 + $0x8] sm:$0xff]  ;;  %v592_v60 = vld [vmem:[%s7044_s27 + $0x10] sm:$0x3]  ;;  %s5745_s27 = smov 32  }
  0xf1   :  { %v279_v7 = vadd.f32 %v278_v62, %v5997_v5 }
  0xf2   :  { %v281_v63 = vadd.f32 %v277_v61, %v5989_v58 }
  0xf4   :  { %v4440_v0 = vmul.f32 -1.442695, %v281_v63 }
  0xf6   :  { %5600 = vpow2.f32 %v4440_v0 }
 0x100   :  { %v5601_v1 = vpop.eup %5600 }
 0x101   :  { %v285_v2 = vadd.f32 1.0, %v5601_v1 }
 0x103   :  { %5602 = vrcp.f32 %v285_v2 }
 0x10d   :  { %v5603_v8 = vpop.eup %5602 }
 0x10e   :  { %v288_v10 = vmul.f32 %v5603_v8, %v279_v7  ;;  %v291_v13 = vsub.f32 1.0, %v5603_v8  ;;  %v297_v15 = vmul.f32 0.0, %v5603_v8 }
 0x110   :  { %v289_v11 = vadd.f32 %v288_v10, %v6001_v9 }
 0x112   :  { %5604 = vtanh.f32 %v289_v11 }
 0x11c   :  { %v5605_v12 = vpop.eup %5604 }
 0x11d   :  { %293 = vrot.lane.b32.xlu0 %v5605_v12, %s5738_s30 }
 0x18f   :  { %v294_v14 = vpop.permute.xlu0 %293 }
 0x190   :  { %v296_v16 = vmul.f32 %v294_v14, %v291_v13 }
 0x192   :  { %v298_v17 = vadd.f32 %v297_v15, %v296_v16 }
 0x194   :  { %300 = vrot.lane.b32.xlu0 %v298_v17, %s5738_s30  ;;  %v397_v28 = vrot.slane %v298_v17, 7  ;;  %v507_v17 = vld [vmem:[%s7045_s1 + $0x18] sm:$0xff] }
 0x206   :  { %v301_v18 = vpop.permute.xlu0 %300 }
 0x207   :  { %4441 = vmatmul.mubr.msk.f32.vlgmr.msra.gmra.mrb[2].mxu0 %vm121_vm0, %v301_v18 }
 0x208   :  { %4796 = vmatprep.mubr.msk.f32.mxu0 %vm5740_vm1, %v5737_v3 }
 0x2da   :  { %v370_v19 = vpop.f32.mrb[2].mxu0 }
 0x2db   :  { %v371_v20 = vadd.f32 %v370_v19, %v5987_v56  ;;  %v372_v21 = vpop.f32.mrb[3].mxu0  ;;  %v508_v19 = vld [vmem:[%s7045_s1 + $0x20] sm:$0xff] }
 0x2dc   :  { %v373_v27 = vadd.f32 %v372_v21, %v5997_v5 }
 0x2dd   :  { %v376_v22 = vrot.slane %v371_v20, 7  ;;  %v509_v20 = vld [vmem:[%s7045_s1 + $0x28] sm:$0xff] }
 0x2de   :  { %v386_v29 = vrot.slane %v373_v27, 7  ;;  %v6100_v21 = vpack.c.bf16 %v509_v20, %v508_v19  ;;  %v6208_v20 = vld [vmem:[%s7007_s6 + $0x10] sm:$0x3] }
 0x2df   :  { %v378_v23 = vadd.f32 %v376_v22, %v5989_v58  ;;  %v510_v22 = vld [vmem:[%s7045_s1 + $0x30] sm:$0xff] }
 0x2e1   :  { %v4442_v24 = vmul.f32 -1.442695, %v378_v23  ;;  %v511_v23 = vld [vmem:[%s7045_s1 + $0x38] sm:$0xff] }
 0x2e3   :  { %5606 = vpow2.f32 %v4442_v24  ;;  %v6110_v24 = vpack.c.bf16 %v511_v23, %v510_v22 }
 0x2ed   :  { %v5607_v25 = vpop.eup %5606 }
 0x2ee   :  { %v382_v26 = vadd.f32 1.0, %v5607_v25 }
 0x2f0   :  { %5608 = vrcp.f32 %v382_v26 }
 0x2fa   :  { %v5609_v30 = vpop.eup %5608 }
 0x2fb   :  { %v388_v31 = vmul.f32 %v5609_v30, %v386_v29  ;;  %v399_v32 = vmul.f32 %v5609_v30, %v397_v28  ;;  %v391_v35 = vsub.f32 1.0, %v5609_v30 }
 0x2fd   :  { %v389_v33 = vadd.f32 %v388_v31, %v6001_v9 }
 0x2ff   :  { %5610 = vtanh.f32 %v389_v33 }
 0x309   :  { %v5611_v34 = vpop.eup %5610 }
 0x30a   :  { %393 = vrot.lane.b32.xlu1 %v5611_v34, %s5738_s30 }
 0x37c   :  { %v394_v36 = vpop.permute.xlu1 %393 }
 0x37d   :  { %v396_v37 = vmul.f32 %v394_v36, %v391_v35 }
 0x37f   :  { %v6012_v38 = vadd.f32 %v399_v32, %v396_v37  ;;  %v693_v37 = vld [vmem:[%s7046_s26] sm:$0xff] }
 0x381   :  { %v402_v39 = vrot.slane %v6012_v38, 1  ;;  %v500_v11 = vrot.slane %v6012_v38, 7 }
 0x383   :  { %403 = vrot.lane.b32.xlu1 %v402_v39, %s5738_s30  ;;  %v694_v39 = vld [vmem:[%s7046_s26 + $0x8] sm:$0xff] }
 0x3f5   :  { %v404_v40 = vpop.permute.xlu1 %403 }
 0x3f6   :  { %4443 = vmatmul.mubr.msk.f32.vlgmr.msra.gmra.mrb[2].mxu1 %vm121_vm0, %v404_v40  ;;  %v5370_v40 = vpack.c.bf16 %v694_v39, %v693_v37 }
 0x3f7   :  { %4815 = vmatprep.mubr.msk.f32.mxu1 %vm5740_vm1, %v5737_v3  ;;  %5359 = vmatpush3.bf16.msra.mxu1 %v5358_v45  ;;  %v5373_v45 = vpack.c.bf16 %v696_v43, %v695_v42 }
 0x3f8   :  { %5360 = vmatprep.subr.bf16.mxu1 %v5739_v41 }
 0x3fb   :  { %5362 = vmatpush3.bf16.msra.mxu1 %v5361_v47 }
 0x3fc   :  { %5363 = vmatprep.subr.bf16.mxu1 %v5739_v41 }
 0x3ff   :  { %5365 = vmatpush3.bf16.msra.mxu1 %v5364_v50  ;;  %v713_v50 = vrot.slane %v6156_v48, %v5977_v52 }
 0x400   :  { %5366 = vmatprep.subr.bf16.mxu1 %v5739_v41 }
 0x403   :  { %5368 = vmatpush3.bf16.msra.mxu1 %v5367_v55 }
 0x404   :  { %5375 = vmatprep.subr.bf16.mxu1 %v5739_v41 }
 0x406   :  { %4816 = vmatmul.mubr.msk.f32.vlgmr.msra.gmra.mrb[4].mxu1 %vm121_vm0, %v590_v57 }
 0x407   :  { %4818 = vmatprep.mubr.msk.f32.mxu1 %vm5740_vm1, %v5737_v3 }
 0x40a   :  { %4819 = vmatmul.mubr.msk.f32.gmra.mrb[6].mxu1 %vm121_vm0, %v591_v59 }
 0x40b   :  { %4821 = vmatprep.mubr.msk.f32.mxu1 %vm5740_vm1, %v5737_v3 }
 0x40e   :  { %4822 = vmatmul.mubr.msk.f32.gmra.mrb[8].mxu1 %vm121_vm0, %v592_v60 }
 0x40f   :  { %4847 = vmatprep.mubr.msk.f32.mxu1 %vm5740_vm1, %v5737_v3 }
 0x4c9   :  { %v473_v61 = vpop.f32.mrb[2].mxu1 }
 0x4ca   :  { %v474_v62 = vadd.f32 %v473_v61, %v5987_v56  ;;  %v475_v63 = vpop.f32.mrb[3].mxu1  ;;  %v504_v56 = vld [vmem:[%s7045_s1] sm:$0xff] }
 0x4cb   :  { %v476_v8 = vadd.f32 %v475_v63, %v5997_v5  ;;  %v506_v5 = vld [vmem:[%s7045_s1 + $0x10] sm:$0xff] }
 0x4cc   :  { %v479_v0 = vrot.slane %v474_v62, 6  ;;  %v6089_v18 = vpack.c.bf16 %v507_v17, %v506_v5 }
 0x4cd   :  { %v489_v10 = vrot.slane %v476_v8, 6 }
 0x4ce   :  { %v481_v1 = vadd.f32 %v479_v0, %v5989_v58  ;;  %v505_v58 = vld [vmem:[%s7045_s1 + $0x8] sm:$0xff] }
 0x4cf   :  { %v6083_v16 = vpack.c.bf16 %v505_v58, %v504_v56  ;;  %v6201_v58 = vld [vmem:[%s7007_s6 + $0x8] sm:$0xff] }
 0x4d0   :  { %v4444_v2 = vmul.f32 -1.442695, %v481_v1 }
 0x4d1   :  { %5347 = vmatpush3.bf16.msra.mxu0 %v6083_v16 }
 0x4d2   :  { %5612 = vpow2.f32 %v4444_v2  ;;  %5348 = vmatprep.subr.bf16.mxu0 %v5739_v41 }
 0x4d5   :  { %5350 = vmatpush3.bf16.msra.mxu0 %v6089_v18 }
 0x4d6   :  { %5351 = vmatprep.subr.bf16.mxu0 %v5739_v41 }
 0x4d9   :  { %5353 = vmatpush3.bf16.msra.mxu0 %v6100_v21  ;;  %v6115_v28 = vpop.f32.mrb[4].mxu1 }
 0x4da   :  { %5354 = vmatprep.subr.bf16.mxu0 %v5739_v41  ;;  %v4817_v29 = vpop.f32.mrb[5].mxu1 }
 0x4dc   :  { %v5613_v6 = vpop.eup %5612 }
 0x4dd   :  { %v485_v7 = vadd.f32 1.0, %v5613_v6  ;;  %5356 = vmatpush3.bf16.msra.mxu0 %v6110_v24  ;;  %v6117_v31 = vpop.f32.mrb[6].mxu1 }
 0x4de   :  { %5369 = vmatprep.subr.bf16.mxu0 %v5739_v41  ;;  %v4820_v33 = vpop.f32.mrb[7].mxu1 }
 0x4df   :  { %5614 = vrcp.f32 %v485_v7 }
 0x4e1   :  { %v6119_v35 = vpop.f32.mrb[8].mxu1 }
 0x4e2   :  { %v4823_v36 = vpop.f32.mrb[9].mxu1 }
 0x4e9   :  { %v5615_v12 = vpop.eup %5614 }
 0x4ea   :  { %v491_v13 = vmul.f32 %v5615_v12, %v489_v10  ;;  %v502_v14 = vmul.f32 %v5615_v12, %v500_v11  ;;  %v494_v25 = vsub.f32 1.0, %v5615_v12 }
 0x4ec   :  { %v492_v15 = vadd.f32 %v491_v13, %v6001_v9  ;;  %v6195_v13 = vld [vmem:[%s7007_s6] sm:$0xff] }
 0x4ee   :  { %5616 = vtanh.f32 %v492_v15 }
 0x4f8   :  { %v5617_v9 = vpop.eup %5616 }
 0x4f9   :  { %496 = vrot.lane.b32.xlu0 %v5617_v9, %s5738_s30 }
 0x56b   :  { %v497_v26 = vpop.permute.xlu0 %496 }
 0x56c   :  { %v499_v27 = vmul.f32 %v497_v26, %v494_v25 }
 0x56e   :  { %v503_v30 = vadd.f32 %v502_v14, %v499_v27 }
 0x570   :  { %v513_v32 = vmax.f32 %v503_v30, 0.0 }
 0x572   :  { %v515_v34 = vrot.slane %v513_v32, 2 }
 0x574   :  { %516 = vrot.lane.b32.xlu1 %v515_v34, %s5738_s30 }
 0x5e6   :  { %v517_v44 = vpop.permute.xlu1 %516 }
 0x5e7   :  { %4797 = vmatmul.mubr.msk.f32.vlgmr.msra.gmra.mrb[4].mxu0 %vm121_vm0, %v517_v44 }
 0x5e8   :  { %5371 = vmatpush3.bf16.msra.mxu0 %v5370_v40  ;;  %4832 = vmatprep.mubr.msk.f32.mxu0 %vm5740_vm1, %v5737_v3 }
 0x5e9   :  { %5372 = vmatprep.subr.bf16.mxu0 %v5739_v41 }
 0x5ec   :  { %5374 = vmatpush3.bf16.msra.mxu0 %v5373_v45 }
 0x5ed   :  { %5379 = vmatprep.subr.bf16.mxu0 %v5739_v41 }
 0x5ef   :  { %4833 = vmatmul.mubr.msk.f32.vlgmr.msra.gmra.mrb[6].mxu0 %vm714_vm2, %v6115_v28 }
 0x5f0   :  { %4835 = vmatprep.mubr.msk.f32.mxu0 %vm5740_vm1, %v5737_v3 }
 0x5f3   :  { %4836 = vmatmul.mubr.msk.f32.gmra.mrb[8].mxu0 %vm714_vm2, %v6117_v31 }
 0x5f4   :  { %4838 = vmatprep.mubr.msk.f32.mxu0 %vm5740_vm1, %v5737_v3 }
 0x5f7   :  { %4839 = vmatmul.mubr.msk.f32.gmra.mrb[10].mxu0 %vm714_vm2, %v6119_v35 }
 0x5f8   :  { %4862 = vmatprep.mubr.msk.f32.mxu0 %vm5740_vm1, %v5737_v3 }
 0x6ba   :  { %v6151_v46 = vpop.f32.mrb[4].mxu0 }
 0x6bb   :  { %v4798_v47 = vpop.f32.mrb[5].mxu0 }
 0x6c2   :  { %v790_v49 = vpop.f32.mrb[6].mxu0 }
 0x6c3   :  { %v4834_v53 = vpop.f32.mrb[7].mxu0  ;;  %v791_v55 = vadd.f32 %v790_v49, %v713_v50 }
 0x6c5   :  { %v6178_v10 = vmul.f32 0.25, %v791_v55 }
 0x6c6   :  { %v795_v54 = vpop.f32.mrb[8].mxu0 }
 0x6c7   :  { %v796_v57 = vadd.f32 %v795_v54, %v713_v50  ;;  %v4837_v59 = vpop.f32.mrb[9].mxu0 }
 0x6c8   :  { %v698_v59 = vld [vmem:[%s7046_s26 + $0x28] sm:$0xff] }
 0x6c9   :  { %v6160_v60 = vpack.i.bf16 %v796_v57, %v791_v55  ;;  %v805_v11 = vmul.f32 0.25, %v796_v57  ;;  %v697_v57 = vld [vmem:[%s7046_s26 + $0x20] sm:$0xff] }
 0x6ca   :  { %v800_v61 = vpop.f32.mrb[10].mxu0 }
 0x6cb   :  { %5555 = vrot.lane.b32.xlu0 %v6160_v60, %s5741_s4  ;;  %v6164_v62 = vadd.f32 %v800_v61, %v713_v50  ;;  %v4840_v63 = vpop.f32.mrb[11].mxu0  ;;  %v5383_v61 = vpack.c.bf16 %v698_v59, %v697_v57 }
 0x6cd   :  { %814 = vrot.lane.b32.xlu1 %v6164_v62, %s5741_s4  ;;  %v806_v12 = vmul.f32 0.25, %v6164_v62 }
 0x73d   :  { %v5556_v0 = vpop.permute.xlu0 %5555 }
 0x73e   :  { %v5558_v1 = vunpack.i.h.bf16 %v5556_v0  ;;  %v5557_v2 = vunpack.i.l.bf16 %v5556_v0 }
 0x73f   :  { %v815_v8 = vpop.permute.xlu1 %814 }
 0x740   :  { %v5376_v7 = vpack.c.bf16 %v5558_v1, %v5557_v2 }
 0x742   :  { %5378 = vmatpush3.bf16.xpose.msk.msra.mxu1 %vm6170_vm4, %v5376_v7 }
 0x743   :  { %4845 = vmatprep.subr.mxu1 %v5737_v3 }
 0x74a   :  { %4846 = vmatpush3.xpose.msk.msra.mxu1 %vm816_vm3, %v815_v8 }
 0x74b   :  { %5382 = vmatprep.subr.bf16.mxu1 %v5739_v41 }
 0x74d   :  { %4848 = vmatmul.mubr.msk.f32.vlgmr.msra.gmra.mrb[10].mxu1 %vm816_vm3, %v6178_v10 }
 0x74e   :  { %4850 = vmatprep.mubr.msk.f32.mxu1 %vm5740_vm1, %v5737_v3  ;;  %5384 = vmatpush3.bf16.msra.mxu1 %v5383_v61 }
 0x74f   :  { %5389 = vmatprep.subr.bf16.mxu1 %v5739_v41 }
 0x751   :  { %4851 = vmatmul.mubr.msk.f32.gmra.mrb[12].mxu1 %vm816_vm3, %v805_v11 }
 0x752   :  { %4853 = vmatprep.mubr.msk.f32.mxu1 %vm5740_vm1, %v5737_v3 }
 0x755   :  { %4854 = vmatmul.mubr.msk.f32.gmra.mrb[14].mxu1 %vm816_vm3, %v806_v12 }
 0x756   :  { %4875 = vmatprep.mubr.msk.f32.mxu1 %vm5740_vm1, %v5737_v3 }
 0x820   :  { %v898_v14 = vpop.f32.mrb[10].mxu1 }
 0x821   :  { %v899_v15 = vadd.f32 %v898_v14, %v6195_v13  ;;  %v4849_v56 = vpop.f32.mrb[11].mxu1 }
 0x823   :  { %v913_v5 = vsel %vm912_vm5, %v899_v15, -inf }
 0x824   :  { %914 = vmax.xlane.f32.xlu0 %v913_v5  ;;  %v903_v17 = vpop.f32.mrb[12].mxu1 }
 0x825   :  { %v904_v9 = vadd.f32 %v903_v17, %v6201_v58  ;;  %v4852_v19 = vpop.f32.mrb[13].mxu1 }
 0x827   :  { %v916_v22 = vsel %vm912_vm5, %v904_v9, -inf }
 0x828   :  { %917 = vmax.xlane.f32.xlu1 %v916_v22  ;;  %v908_v23 = vpop.f32.mrb[14].mxu1 }
 0x829   :  { %v909_v25 = vadd.f32 %v908_v23, %v6208_v20  ;;  %v4855_v26 = vpop.f32.mrb[15].mxu1 }
 0x82b   :  { %v920_v27 = vsel %vm919_vm6, %v909_v25, -inf }
 0x82c   :  { %921 = vmax.xlane.f32.xlu0 %v920_v27 }
 0x839   :  { %5560 = vrot.lane.b32.xlu1 %v6160_v60, %s5738_s30 }
 0x83d   :  { %5565 = vrot.lane.b32.xlu1 %v6160_v60, %s5742_s28 }
 0x8b1   :  { %v915_v29 = vpop.xlane.xlu0 %914 }
 0x8b2   :  { %v923_v30 = vsub.f32 %v899_v15, %v915_v29 }
 0x8b4   :  { %v926_v32 = vmul.f32 1.442695, %v923_v30 }
 0x8b5   :  { %v918_v33 = vpop.xlane.xlu1 %917 }
 0x8b6   :  { %5618 = vpow2.f32 %v926_v32  ;;  %v924_v34 = vsub.f32 %v904_v9, %v918_v33 }
 0x8b8   :  { %v928_v36 = vmul.f32 1.442695, %v924_v34 }
 0x8b9   :  { %v5561_v37 = vpop.permute.xlu1 %5560  ;;  %v922_v49 = vpop.xlane.xlu0 %921 }
 0x8ba   :  { %5620 = vpow2.f32 %v928_v36  ;;  %v5563_v39 = vunpack.i.h.bf16 %v5561_v37  ;;  %v5562_v40 = vunpack.i.l.bf16 %v5561_v37  ;;  %v925_v50 = vsub.f32 %v909_v25, %v922_v49 }
 0x8bc   :  { %v5380_v42 = vpack.c.bf16 %v5563_v39, %v5562_v40  ;;  %v930_v53 = vmul.f32 1.442695, %v925_v50 }
 0x8bd   :  { %v5566_v63 = vpop.permute.xlu1 %5565 }
 0x8be   :  { %5381 = vmatpush3.bf16.msra.mxu0 %v5380_v42  ;;  %5622 = vpow2.f32 %v930_v53  ;;  %v5568_v7 = vunpack.i.h.bf16 %v5566_v63  ;;  %v5567_v8 = vunpack.i.l.bf16 %v5566_v63 }
 0x8bf   :  { %4860 = vmatprep.subr.mxu0 %v5737_v3 }
 0x8c0   :  { %v5619_v43 = vpop.eup %5618 }
 0x8c1   :  { %v932_v44 = vsel %vm912_vm5, %v5619_v43, 0.0 }
 0x8c2   :  { %933 = vadd.xlane.f32.xlu0 %v932_v44 }
 0x8c4   :  { %v5621_v45 = vpop.eup %5620 }
 0x8c5   :  { %v935_v47 = vsel %vm912_vm5, %v5621_v45, 0.0 }
 0x8c6   :  { %936 = vadd.xlane.f32.xlu1 %v935_v47 }
 0x8c8   :  { %v5623_v54 = vpop.eup %5622 }
 0x8c9   :  { %v938_v55 = vsel %vm919_vm6, %v5623_v54, 0.0 }
 0x8d7   :  { %1153 = vrot.lane.b32.xlu1 %v6164_v62, %s5742_s28 }
 0x8d8   :  { %951 = vrot.lane.b32.xlu0 %v6164_v62, %s5738_s30 }
 0x8db   :  { %1145 = vrot.lane.b32.xlu1 %v805_v11, %s5743_s0 }
 0x8f7   :  { %939 = vadd.xlane.f32.xlu0 %v938_v55 }
 0x90d   :  { %1143 = vrot.lane.b32.xlu0 %v6178_v10, %s5743_s0 }
 0x911   :  { %1147 = vrot.lane.b32.xlu0 %v806_v12, %s5743_s0  ;;  %v5386_v12 = vpack.c.bf16 %v5568_v7, %v5567_v8 }
 0x94f   :  { %v934_v0 = vpop.xlane.xlu0 %933 }
 0x950   :  { %5624 = vrcp.f32 %v934_v0 }
 0x953   :  { %v937_v1 = vpop.xlane.xlu1 %936  ;;  %v952_v2 = vpop.permute.xlu0 %951 }
 0x954   :  { %5626 = vrcp.f32 %v937_v1  ;;  %4861 = vmatpush3.msk.msra.mxu0 %vm964_vm7, %v952_v2 }
 0x955   :  { %5385 = vmatprep.subr.bf16.mxu0 %v5739_v41 }
 0x957   :  { %v1154_v56 = vpop.permute.xlu1 %1153 }
 0x95a   :  { %v5625_v10 = vpop.eup %5624 }
 0x95b   :  { %v944_v11 = vmul.f32 %v5625_v10, %v5619_v43  ;;  %v1146_v22 = vpop.permute.xlu1 %1145 }
 0x95d   :  { %4863 = vmatmul.mubr.msk.f32.vlgmr.msra.gmra.mrb[12].mxu0 %vm912_vm5, %v944_v11 }
 0x95e   :  { %v5627_v14 = vpop.eup %5626  ;;  %5388 = vmatpush3.bf16.xpose.msk.msra.mxu0 %vm6170_vm4, %v5386_v12  ;;  %4865 = vmatprep.mubr.msk.f32.mxu0 %vm5740_vm1, %v5737_v3 }
 0x95f   :  { %v945_v15 = vmul.f32 %v5627_v14, %v5621_v45  ;;  %4888 = vmatprep.subr.mxu0 %v5737_v3 }
 0x961   :  { %4866 = vmatmul.mubr.msk.f32.gmra.mrb[14].mxu0 %vm912_vm5, %v945_v15 }
 0x962   :  { %4868 = vmatprep.mubr.msk.f32.mxu0 %vm5740_vm1, %v5737_v3 }
 0x966   :  { %4889 = vmatpush3.xpose.msk.msra.mxu0 %vm816_vm3, %v1154_v56 }
 0x967   :  { %5392 = vmatprep.subr.bf16.mxu0 %v5739_v41 }
 0x984   :  { %v940_v5 = vpop.xlane.xlu0 %939 }
 0x985   :  { %5628 = vrcp.f32 %v940_v5  ;;  %v699_v5 = vld [vmem:[%s7046_s26 + $0x30] sm:$0xff] }
 0x988   :  { %v1144_v19 = vpop.permute.xlu0 %1143 }
 0x98c   :  { %v1148_v23 = vpop.permute.xlu0 %1147 }
 0x98f   :  { %v5629_v17 = vpop.eup %5628 }
 0x990   :  { %v946_v9 = vmul.f32 %v5629_v17, %v5623_v54  ;;  %v700_v17 = vld [vmem:[%s7046_s26 + $0x38] sm:$0xff] }
 0x992   :  { %4869 = vmatmul.mubr.msk.f32.gmra.mrb[16].mxu0 %vm912_vm5, %v946_v9  ;;  %v5393_v9 = vpack.c.bf16 %v700_v17, %v699_v5 }
 0x993   :  { %4890 = vmatprep.mubr.msk.f32.mxu0 %vm5740_vm1, %v5737_v3 }
 0x996   :  { %4891 = vmatmul.mubr.msk.f32.vlgmr.msra.gmra.mrb[18].mxu0 %vm816_vm3, %v1144_v19 }
 0x997   :  { %4893 = vmatprep.mubr.msk.f32.mxu0 %vm5740_vm1, %v5737_v3  ;;  %5394 = vmatpush3.bf16.msra.mxu0 %v5393_v9 }
 0x998   :  { %5401 = vmatprep.subr.bf16.mxu0 %v5739_v41 }
 0x99a   :  { %4894 = vmatmul.mubr.msk.f32.gmra.mrb[20].mxu0 %vm816_vm3, %v1146_v22 }
 0x99b   :  { %4896 = vmatprep.mubr.msk.f32.mxu0 %vm5740_vm1, %v5737_v3 }
 0x99e   :  { %4897 = vmatmul.mubr.msk.f32.gmra.mrb[22].mxu0 %vm816_vm3, %v1148_v23 }
 0x99f   :  { %4918 = vmatprep.mubr.msk.f32.mxu0 %vm5740_vm1, %v5737_v3 }
 0xa30   :  { %v1033_v25 = vpop.f32.mrb[12].mxu0 }
 0xa31   :  { %v4864_v26 = vpop.f32.mrb[13].mxu0  ;;  %4876 = vmatmul.mubr.msk.f32.vlgmr.msra.gmra.mrb[16].mxu1 %vm816_vm3, %v1033_v25 }
 0xa32   :  { %4878 = vmatprep.mubr.msk.f32.mxu1 %vm5740_vm1, %v5737_v3 }
 0xa34   :  { %v1038_v27 = vpop.f32.mrb[14].mxu0 }
 0xa35   :  { %v4867_v29 = vpop.f32.mrb[15].mxu0  ;;  %4879 = vmatmul.mubr.msk.f32.gmra.mrb[18].mxu1 %vm816_vm3, %v1038_v27 }
 0xa36   :  { %4881 = vmatprep.mubr.msk.f32.mxu1 %vm5740_vm1, %v5737_v3 }
 0xa65   :  { %v1043_v30 = vpop.f32.mrb[16].mxu0 }
 0xa66   :  { %v4870_v32 = vpop.f32.mrb[17].mxu0  ;;  %4882 = vmatmul.mubr.msk.f32.gmra.mrb[20].mxu1 %vm816_vm3, %v1043_v30 }
 0xa67   :  { %4905 = vmatprep.mubr.msk.f32.mxu1 %vm5740_vm1, %v5737_v3 }
 0xa69   :  { %v1233_v33 = vpop.f32.mrb[18].mxu0 }
 0xa6a   :  { %v1234_v34 = vadd.f32 %v1233_v33, %v6195_v13  ;;  %v4892_v36 = vpop.f32.mrb[19].mxu0 }
 0xa6c   :  { %v1247_v37 = vsel %vm912_vm5, %v1234_v34, -inf }
 0xa6d   :  { %1248 = vmax.xlane.f32.xlu1 %v1247_v37  ;;  %v1238_v39 = vpop.f32.mrb[20].mxu0 }
 0xa6e   :  { %v1239_v40 = vadd.f32 %v1238_v39, %v6201_v58  ;;  %v4895_v42 = vpop.f32.mrb[21].mxu0 }
 0xa70   :  { %v1250_v43 = vsel %vm912_vm5, %v1239_v40, -inf }
 0xa71   :  { %1251 = vmax.xlane.f32.xlu0 %v1250_v43  ;;  %v1243_v44 = vpop.f32.mrb[22].mxu0 }
 0xa72   :  { %v1244_v45 = vadd.f32 %v1243_v44, %v6208_v20  ;;  %v4898_v47 = vpop.f32.mrb[23].mxu0 }
 0xa74   :  { %v1253_v49 = vsel %vm919_vm6, %v1244_v45, -inf }
 0xa75   :  { %1254 = vmax.xlane.f32.xlu0 %v1253_v49  ;;  %v1139_v49 = vrot.slane %v6156_v48, %v5994_v4 }
 0xafa   :  { %v1249_v50 = vpop.xlane.xlu1 %1248 }
 0xafb   :  { %v1256_v53 = vsub.f32 %v1234_v34, %v1249_v50 }
 0xafd   :  { %v1259_v54 = vmul.f32 1.442695, %v1256_v53 }
 0xafe   :  { %v1252_v55 = vpop.xlane.xlu0 %1251 }
 0xaff   :  { %5630 = vpow2.f32 %v1259_v54  ;;  %v1257_v57 = vsub.f32 %v1239_v40, %v1252_v55 }
 0xb01   :  { %v1261_v59 = vmul.f32 1.442695, %v1257_v57 }
 0xb02   :  { %v1255_v61 = vpop.xlane.xlu0 %1254 }
 0xb03   :  { %5632 = vpow2.f32 %v1261_v59  ;;  %v1258_v63 = vsub.f32 %v1244_v45, %v1255_v61 }
 0xb04   :  { %v6276_v0 = vpop.f32.mrb[16].mxu1 }
 0xb05   :  { %v1263_v1 = vmul.f32 1.442695, %v1258_v63  ;;  %v4877_v2 = vpop.f32.mrb[17].mxu1  ;;  %v1140_v50 = vadd.f32 %v1139_v49, %v6276_v0 }
 0xb07   :  { %5634 = vpow2.f32 %v1263_v1 }
 0xb08   :  { %v6278_v7 = vpop.f32.mrb[18].mxu1 }
 0xb09   :  { %v5631_v8 = vpop.eup %5630  ;;  %v4880_v10 = vpop.f32.mrb[19].mxu1  ;;  %v1141_v57 = vadd.f32 %v1139_v49, %v6278_v7 }
 0xb0a   :  { %v1265_v11 = vsel %vm912_vm5, %v5631_v8, 0.0 }
 0xb0b   :  { %1266 = vadd.xlane.f32.xlu1 %v1265_v11 }
 0xb0d   :  { %v5633_v12 = vpop.eup %5632 }
 0xb0e   :  { %v1268_v14 = vsel %vm912_vm5, %v5633_v12, 0.0 }
 0xb0f   :  { %1269 = vadd.xlane.f32.xlu0 %v1268_v14 }
 0xb11   :  { %v5635_v15 = vpop.eup %5634 }
 0xb12   :  { %v1271_v56 = vsel %vm919_vm6, %v5635_v15, 0.0 }
 0xb13   :  { %1272 = vadd.xlane.f32.xlu1 %v1271_v56 }
 0xb24   :  { %1284 = vrot.lane.b32.xlu1 %v6164_v62, %s7030_s2 }
 0xb25   :  { %5570 = vrot.lane.b32.xlu0 %v6160_v60, %s7030_s2 }
 0xb39   :  { %v1132_v19 = vpop.f32.mrb[20].mxu1 }
 0xb3a   :  { %v4883_v22 = vpop.f32.mrb[21].mxu1 }
 0xb98   :  { %v1267_v23 = vpop.xlane.xlu1 %1266 }
 0xb99   :  { %5636 = vrcp.f32 %v1267_v23 }
 0xb9c   :  { %v1270_v62 = vpop.xlane.xlu0 %1269 }
 0xb9d   :  { %5638 = vrcp.f32 %v1270_v62 }
 0xba0   :  { %v1273_v25 = vpop.xlane.xlu1 %1272  ;;  %v5571_v60 = vpop.permute.xlu0 %5570 }
 0xba1   :  { %v5573_v26 = vunpack.i.h.bf16 %v5571_v60  ;;  %v5572_v27 = vunpack.i.l.bf16 %v5571_v60  ;;  %5640 = vrcp.f32 %v1273_v25 }
 0xba3   :  { %v5390_v29 = vpack.c.bf16 %v5573_v26, %v5572_v27  ;;  %v5637_v30 = vpop.eup %5636 }
 0xba4   :  { %v1277_v32 = vmul.f32 %v5637_v30, %v5631_v8  ;;  %v1285_v33 = vpop.permute.xlu1 %1284  ;;  %v1142_v8 = vadd.f32 %v1139_v49, %v1132_v19  ;;  %v702_v30 = vld [vmem:[%s7046_s26 + $0x48] sm:$0xff] }
 0xba5   :  { %5391 = vmatpush3.bf16.msra.mxu1 %v5390_v29  ;;  %v701_v29 = vld [vmem:[%s7046_s26 + $0x40] sm:$0xff] }
 0xba6   :  { %4903 = vmatprep.subr.mxu1 %v5737_v3 }
 0xba7   :  { %v5639_v34 = vpop.eup %5638 }
 0xba8   :  { %v1278_v36 = vmul.f32 %v5639_v34, %v5633_v12  ;;  %v704_v34 = vld [vmem:[%s7046_s26 + $0x58] sm:$0xff] }
 0xba9   :  { %4904 = vmatpush3.msk.msra.mxu1 %vm964_vm7, %v1285_v33  ;;  %v703_v33 = vld [vmem:[%s7046_s26 + $0x50] sm:$0xff] }
 0xbaa   :  { %4906 = vmatmul.mubr.msk.f32.vlgmr.msra.gmra.mrb[22].mxu1 %vm912_vm5, %v1277_v32  ;;  %5395 = vmatprep.subr.bf16.mxu1 %v5739_v41  ;;  %v5396_v32 = vpack.c.bf16 %v702_v30, %v701_v29 }
 0xbab   :  { %4908 = vmatprep.mubr.msk.f32.mxu1 %vm5740_vm1, %v5737_v3  ;;  %v5641_v37 = vpop.eup %5640 }
 0xbac   :  { %v1279_v39 = vmul.f32 %v5641_v37, %v5635_v15  ;;  %5397 = vmatpush3.bf16.msra.mxu1 %v5396_v32  ;;  %v705_v37 = vld [vmem:[%s7046_s26 + $0x60] sm:$0xff] }
 0xbad   :  { %5398 = vmatprep.subr.bf16.mxu1 %v5739_v41 }
 0xbae   :  { %4909 = vmatmul.mubr.msk.f32.gmra.mrb[24].mxu1 %vm912_vm5, %v1278_v36  ;;  %v5399_v36 = vpack.c.bf16 %v704_v34, %v703_v33  ;;  %v1719_v33 = vsub.s32 3, %v5974_v51 }
 0xbaf   :  { %4911 = vmatprep.mubr.msk.f32.mxu1 %vm5740_vm1, %v5737_v3 }
 0xbb0   :  { %5400 = vmatpush3.bf16.msra.mxu1 %v5399_v36  ;;  %v1720_v34 = vrot.slane %v6156_v48, %v1719_v33 }
 0xbb1   :  { %5407 = vmatprep.subr.bf16.mxu1 %v5739_v41 }
 0xbb2   :  { %4912 = vmatmul.mubr.msk.f32.gmra.mrb[26].mxu1 %vm912_vm5, %v1279_v39  ;;  %v706_v39 = vld [vmem:[%s7046_s26 + $0x68] sm:$0xff] }
 0xbb3   :  { %4935 = vmatprep.mubr.msk.f32.mxu1 %vm5740_vm1, %v5737_v3 }
 0xc7d   :  { %v1365_v40 = vpop.f32.mrb[22].mxu1 }
 0xc7e   :  { %v4907_v42 = vpop.f32.mrb[23].mxu1  ;;  %4919 = vmatmul.mubr.msk.f32.vlgmr.msra.gmra.mrb[24].mxu0 %vm816_vm3, %v1365_v40  ;;  %v5402_v40 = vpack.c.bf16 %v706_v39, %v705_v37 }
 0xc7f   :  { %4921 = vmatprep.mubr.msk.f32.mxu0 %vm5740_vm1, %v5737_v3 }
 0xc80   :  { %5403 = vmatpush3.bf16.msra.mxu0 %v5402_v40 }
 0xc81   :  { %v1370_v43 = vpop.f32.mrb[24].mxu1  ;;  %5404 = vmatprep.subr.bf16.mxu0 %v5739_v41 }
 0xc82   :  { %v4910_v44 = vpop.f32.mrb[25].mxu1  ;;  %4922 = vmatmul.mubr.msk.f32.gmra.mrb[26].mxu0 %vm816_vm3, %v1370_v43 }
 0xc83   :  { %4924 = vmatprep.mubr.msk.f32.mxu0 %vm5740_vm1, %v5737_v3 }
 0xc85   :  { %v1375_v45 = vpop.f32.mrb[26].mxu1 }
 0xc86   :  { %v4913_v47 = vpop.f32.mrb[27].mxu1  ;;  %4925 = vmatmul.mubr.msk.f32.gmra.mrb[28].mxu0 %vm816_vm3, %v1375_v45 }
 0xc87   :  { %4952 = vmatprep.mubr.msk.f32.mxu0 %vm5740_vm1, %v5737_v3 }
 0xd51   :  { %v1454_v53 = vpop.f32.mrb[24].mxu0 }
 0xd52   :  { %v1468_v54 = vadd.f32 %v1454_v53, %v1140_v50  ;;  %v4920_v55 = vpop.f32.mrb[25].mxu0 }
 0xd54   :  { %v1471_v59 = vadd.f32 %v1468_v54, %v6115_v28  ;;  %v1517_v54 = vsub.s32 4, %v5974_v51 }
 0xd55   :  { %v1459_v61 = vpop.f32.mrb[26].mxu0 }
 0xd56   :  { %v1469_v63 = vadd.f32 %v1459_v61, %v1141_v57  ;;  %v4923_v1 = vpop.f32.mrb[27].mxu0  ;;  %v1474_v2 = vsel %vm714_vm2, %v1471_v59, 0.0  ;;  %v1524_v57 = vsub.s32 5, %v5974_v51 }
 0xd57   :  { %1475 = vadd.xlane.f32.xlu1 %v1474_v2 }
 0xd58   :  { %v1472_v10 = vadd.f32 %v1469_v63, %v6117_v31  ;;  %v1525_v63 = vrot.slane %v6156_v48, %v1524_v57 }
 0xd59   :  { %v1464_v11 = vpop.f32.mrb[28].mxu0 }
 0xd5a   :  { %v1470_v12 = vadd.f32 %v1464_v11, %v1142_v8  ;;  %v4926_v14 = vpop.f32.mrb[29].mxu0  ;;  %v1477_v0 = vsel %vm714_vm2, %v1472_v10, 0.0 }
 0xd5b   :  { %1478 = vadd.xlane.f32.xlu0 %v1477_v0 }
 0xd5c   :  { %v1473_v7 = vadd.f32 %v1470_v12, %v6119_v35 }
 0xd5e   :  { %v1481_v28 = vsel %vm1480_vm8, %v1473_v7, 0.0 }
 0xd5f   :  { %1482 = vadd.xlane.f32.xlu0 %v1481_v28 }
 0xde4   :  { %v1476_v15 = vpop.xlane.xlu1 %1475 }
 0xde5   :  { %v1485_v56 = vmul.f32 0.03125, %v1476_v15 }
 0xde7   :  { %v1488_v5 = vsub.f32 %v1471_v59, %v1485_v56  ;;  %v1518_v59 = vrot.slane %v6156_v48, %v1517_v54  ;;  %v707_v56 = vld [vmem:[%s7046_s26 + $0x70] sm:$0xff] }
 0xde8   :  { %v1479_v17 = vpop.xlane.xlu0 %1478 }
 0xde9   :  { %v1486_v9 = vmul.f32 0.03125, %v1479_v17  ;;  %v1491_v19 = vmul.f32 %v1488_v5, %v1488_v5 }
 0xdeb   :  { %v1489_v22 = vsub.f32 %v1472_v10, %v1486_v9  ;;  %v1494_v31 = vsel %vm714_vm2, %v1491_v19, 0.0  ;;  %v1531_v9 = vsub.s32 2, %v5974_v51 }
 0xdec   :  { %1495 = vadd.xlane.f32.xlu1 %v1494_v31  ;;  %v1483_v23 = vpop.xlane.xlu0 %1482 }
 0xded   :  { %v1487_v62 = vmul.f32 0.03125, %v1483_v23  ;;  %v1492_v25 = vmul.f32 %v1489_v22, %v1489_v22  ;;  %v1532_v19 = vrot.slane %v6156_v48, %v1531_v9 }
 0xdef   :  { %v1490_v60 = vsub.f32 %v1473_v7, %v1487_v62  ;;  %v1497_v26 = vsel %vm714_vm2, %v1492_v25, 0.0 }
 0xdf0   :  { %1498 = vadd.xlane.f32.xlu0 %v1497_v26 }
 0xdf1   :  { %v1493_v35 = vmul.f32 %v1490_v60, %v1490_v60 }
 0xdf3   :  { %v1500_v27 = vsel %vm1480_vm8, %v1493_v35, 0.0 }
 0xdf4   :  { %1501 = vadd.xlane.f32.xlu1 %v1500_v27 }
 0xe79   :  { %v1496_v42 = vpop.xlane.xlu1 %1495 }
 0xe7a   :  { %v1503_v43 = vmul.f32 0.03125, %v1496_v42 }
 0xe7c   :  { %v1506_v44 = vadd.f32 1e-05, %v1503_v43 }
 0xe7d   :  { %v1499_v45 = vpop.xlane.xlu0 %1498 }
 0xe7e   :  { %5642 = vrsqrt.f32 %v1506_v44  ;;  %v1504_v47 = vmul.f32 0.03125, %v1499_v45 }
 0xe80   :  { %v1507_v49 = vadd.f32 1e-05, %v1504_v47 }
 0xe81   :  { %v1502_v50 = vpop.xlane.xlu1 %1501 }
 0xe82   :  { %5644 = vrsqrt.f32 %v1507_v49  ;;  %v1505_v53 = vmul.f32 0.03125, %v1502_v50 }
 0xe84   :  { %v1508_v55 = vadd.f32 1e-05, %v1505_v53 }
 0xe86   :  { %5646 = vrsqrt.f32 %v1508_v55 }
 0xe88   :  { %v5643_v61 = vpop.eup %5642 }
 0xe89   :  { %v1512_v1 = vmul.f32 %v5643_v61, %v1488_v5  ;;  %v708_v5 = vld [vmem:[%s7046_s26 + $0x78] sm:$0xff] }
 0xe8a   :  { %v5405_v17 = vpack.c.bf16 %v708_v5, %v707_v56 }
 0xe8b   :  { %v1519_v2 = vmul.f32 %v1518_v59, %v1512_v1 }
 0xe8c   :  { %v5645_v8 = vpop.eup %5644  ;;  %5406 = vmatpush3.bf16.msra.mxu0 %v5405_v17 }
 0xe8d   :  { %v1526_v10 = vadd.f32 %v1525_v63, %v1519_v2  ;;  %v1513_v11 = vmul.f32 %v5645_v8, %v1489_v22  ;;  %5413 = vmatprep.subr.bf16.mxu0 %v5739_v41 }
 0xe8f   :  { %4936 = vmatmul.mubr.msk.f32.vlgmr.msra.gmra.mrb[28].mxu1 %vm714_vm2, %v1526_v10  ;;  %v1520_v12 = vmul.f32 %v1518_v59, %v1513_v11 }
 0xe90   :  { %v5647_v14 = vpop.eup %5646  ;;  %4938 = vmatprep.mubr.msk.f32.mxu1 %vm5740_vm1, %v5737_v3 }
 0xe91   :  { %v1527_v0 = vadd.f32 %v1525_v63, %v1520_v12  ;;  %v1514_v7 = vmul.f32 %v5647_v14, %v1490_v60 }
 0xe93   :  { %4939 = vmatmul.mubr.msk.f32.gmra.mrb[30].mxu1 %vm714_vm2, %v1527_v0  ;;  %v1521_v28 = vmul.f32 %v1518_v59, %v1514_v7 }
 0xe94   :  { %4941 = vmatprep.mubr.msk.f32.mxu1 %vm5740_vm1, %v5737_v3 }
 0xe95   :  { %v1528_v15 = vadd.f32 %v1525_v63, %v1521_v28 }
 0xe97   :  { %4942 = vmatmul.mubr.msk.f32.gmra.mrb[32].mxu1 %vm714_vm2, %v1528_v15 }
 0xe98   :  { %4969 = vmatprep.mubr.msk.f32.mxu1 %vm5740_vm1, %v5737_v3 }
 0xf62   :  { %v1608_v22 = vpop.f32.mrb[28].mxu1 }
 0xf63   :  { %v1609_v31 = vadd.f32 %v1608_v22, %v1532_v19  ;;  %v4937_v23 = vpop.f32.mrb[29].mxu1  ;;  %v4485_v22 = vld [vmem:[%s7046_s26 + $0x88] sm:$0xff] }
 0xf64   :  { %v4486_v23 = vld [vmem:[%s7046_s26 + $0x90] sm:$0xff] }
 0xf65   :  { %v1622_v62 = vmax.f32 %v1609_v31, 0.0 }
 0xf66   :  { %v1613_v25 = vpop.f32.mrb[30].mxu1 }
 0xf67   :  { %v1614_v60 = vadd.f32 %v1613_v25, %v1532_v19  ;;  %v4940_v26 = vpop.f32.mrb[31].mxu1  ;;  %4953 = vmatmul.mubr.msk.f32.vlgmr.msra.gmra.mrb[30].mxu0 %vm714_vm2, %v1622_v62  ;;  %v4487_v62 = vld [vmem:[%s7046_s26 + $0x98] sm:$0xff] }
 0xf68   :  { %4955 = vmatprep.mubr.msk.f32.mxu0 %vm5740_vm1, %v5737_v3  ;;  %v5411_v25 = vpack.c.bf16 %v4487_v62, %v4486_v23 }
 0xf69   :  { %v1623_v35 = vmax.f32 %v1614_v60, 0.0 }
 0xf6a   :  { %v1618_v27 = vpop.f32.mrb[32].mxu1 }
 0xf6b   :  { %v1619_v29 = vadd.f32 %v1618_v27, %v1532_v19  ;;  %v4943_v30 = vpop.f32.mrb[33].mxu1  ;;  %4956 = vmatmul.mubr.msk.f32.gmra.mrb[32].mxu0 %vm714_vm2, %v1623_v35  ;;  %v4484_v19 = vld [vmem:[%s7046_s26 + $0x80] sm:$0xff] }
 0xf6c   :  { %4958 = vmatprep.mubr.msk.f32.mxu0 %vm5740_vm1, %v5737_v3  ;;  %v5408_v31 = vpack.c.bf16 %v4485_v22, %v4484_v19 }
 0xf6d   :  { %v1624_v32 = vmax.f32 %v1619_v29, 0.0 }
 0xf6e   :  { %5409 = vmatpush3.bf16.msra.mxu1 %v5408_v31 }
 0xf6f   :  { %4959 = vmatmul.mubr.msk.f32.gmra.mrb[34].mxu0 %vm714_vm2, %v1624_v32  ;;  %5410 = vmatprep.subr.bf16.mxu1 %v5739_v41 }
 0xf70   :  { %4984 = vmatprep.mubr.msk.f32.mxu0 %vm5740_vm1, %v5737_v3 }
 0xf72   :  { %5412 = vmatpush3.bf16.msra.mxu1 %v5411_v25 }
 0xf73   :  { %5417 = vmatprep.subr.bf16.mxu1 %v5739_v41 }
0x103a   :  { %v1700_v36 = vpop.f32.mrb[30].mxu0 }
0x103b   :  { %v1714_v37 = vadd.f32 %v1700_v36, %v1526_v10  ;;  %v4954_v39 = vpop.f32.mrb[31].mxu0  ;;  %v1765_v36 = vsub.s32 6, %v5974_v51 }
0x103c   :  { %v1772_v39 = vsub.s32 7, %v5974_v51  ;;  %v2857_v51 = vld [vmem:[%s7009_s10] sm:$0x3f] }
0x103d   :  { %v1721_v40 = vadd.f32 %v1720_v34, %v1714_v37 }
0x103e   :  { %v1705_v42 = vpop.f32.mrb[32].mxu0 }
0x103f   :  { %v1715_v43 = vadd.f32 %v1705_v42, %v1527_v0  ;;  %v4957_v44 = vpop.f32.mrb[33].mxu0  ;;  %v1724_v45 = vsel %vm714_vm2, %v1721_v40, 0.0 }
0x1040   :  { %1725 = vadd.xlane.f32.xlu0 %v1724_v45 }
0x1041   :  { %v1722_v47 = vadd.f32 %v1720_v34, %v1715_v43  ;;  %v1773_v43 = vrot.slane %v6156_v48, %v1772_v39 }
0x1042   :  { %v1710_v49 = vpop.f32.mrb[34].mxu0 }
0x1043   :  { %v1716_v50 = vadd.f32 %v1710_v49, %v1528_v15  ;;  %v4960_v53 = vpop.f32.mrb[35].mxu0  ;;  %v1727_v55 = vsel %vm714_vm2, %v1722_v47, 0.0 }
0x1044   :  { %1728 = vadd.xlane.f32.xlu1 %v1727_v55 }
0x1045   :  { %v1723_v59 = vadd.f32 %v1720_v34, %v1716_v50 }
0x1047   :  { %v1730_v61 = vsel %vm1480_vm8, %v1723_v59, 0.0 }
0x1048   :  { %1731 = vadd.xlane.f32.xlu0 %v1730_v61 }
0x10cd   :  { %v1726_v63 = vpop.xlane.xlu0 %1725 }
0x10ce   :  { %v1733_v1 = vmul.f32 0.03125, %v1726_v63 }
0x10d0   :  { %v1736_v2 = vsub.f32 %v1721_v40, %v1733_v1  ;;  %v1766_v40 = vrot.slane %v6156_v48, %v1765_v36  ;;  %v6439_v1 = vld [vmem:[%s7047_s5 + $0x8] sm:$0xff] }
0x10d1   :  { %v1729_v8 = vpop.xlane.xlu1 %1728 }
0x10d2   :  { %v1734_v10 = vmul.f32 0.03125, %v1729_v8  ;;  %v1739_v11 = vmul.f32 %v1736_v2, %v1736_v2  ;;  %v1799_v8 = vrot.slane %v6439_v1, %v5977_v52 }
0x10d4   :  { %v1737_v12 = vsub.f32 %v1722_v47, %v1734_v10  ;;  %v1742_v14 = vsel %vm714_vm2, %v1739_v11, 0.0 }
0x10d5   :  { %1743 = vadd.xlane.f32.xlu1 %v1742_v14  ;;  %v1732_v0 = vpop.xlane.xlu0 %1731 }
0x10d6   :  { %v1735_v7 = vmul.f32 0.03125, %v1732_v0  ;;  %v1740_v28 = vmul.f32 %v1737_v12, %v1737_v12 }
0x10d8   :  { %v1738_v15 = vsub.f32 %v1723_v59, %v1735_v7  ;;  %v1745_v56 = vsel %vm714_vm2, %v1740_v28, 0.0 }
0x10d9   :  { %1746 = vadd.xlane.f32.xlu0 %v1745_v56 }
0x10da   :  { %v1741_v5 = vmul.f32 %v1738_v15, %v1738_v15 }
0x10dc   :  { %v1748_v17 = vsel %vm1480_vm8, %v1741_v5, 0.0 }
0x10dd   :  { %1749 = vadd.xlane.f32.xlu1 %v1748_v17 }
0x1162   :  { %v1744_v60 = vpop.xlane.xlu1 %1743 }
0x1163   :  { %v1751_v26 = vmul.f32 0.03125, %v1744_v60 }
0x1165   :  { %v1754_v35 = vadd.f32 1e-05, %v1751_v26 }
0x1166   :  { %v1747_v27 = vpop.xlane.xlu0 %1746 }
0x1167   :  { %5648 = vrsqrt.f32 %v1754_v35  ;;  %v1752_v29 = vmul.f32 0.03125, %v1747_v27 }
0x1169   :  { %v1755_v30 = vadd.f32 1e-05, %v1752_v29 }
0x116a   :  { %v1750_v32 = vpop.xlane.xlu1 %1749 }
0x116b   :  { %5650 = vrsqrt.f32 %v1755_v30  ;;  %v1753_v34 = vmul.f32 0.03125, %v1750_v32 }
0x116d   :  { %v1756_v37 = vadd.f32 1e-05, %v1753_v34 }
0x116f   :  { %5652 = vrsqrt.f32 %v1756_v37 }
0x1171   :  { %v5649_v42 = vpop.eup %5648 }
0x1172   :  { %v1760_v44 = vmul.f32 %v5649_v42, %v1736_v2 }
0x1174   :  { %v1767_v45 = vmul.f32 %v1766_v40, %v1760_v44 }
0x1175   :  { %v5651_v47 = vpop.eup %5650 }
0x1176   :  { %v6418_v49 = vadd.f32 %v1773_v43, %v1767_v45  ;;  %v1761_v50 = vmul.f32 %v5651_v47, %v1737_v12 }
0x1178   :  { %4970 = vmatmul.mubr.msk.f32.vlgmr.msra.gmra.mrb[34].mxu1 %vm714_vm2, %v6418_v49  ;;  %v1768_v53 = vmul.f32 %v1766_v40, %v1761_v50 }
0x1179   :  { %v5653_v55 = vpop.eup %5652  ;;  %4972 = vmatprep.mubr.msk.f32.mxu1 %vm5740_vm1, %v5737_v3 }
0x117a   :  { %v6424_v59 = vadd.f32 %v1773_v43, %v1768_v53  ;;  %v1762_v61 = vmul.f32 %v5653_v55, %v1738_v15 }
0x117c   :  { %4973 = vmatmul.mubr.msk.f32.gmra.mrb[36].mxu1 %vm714_vm2, %v6424_v59  ;;  %v1769_v48 = vmul.f32 %v1766_v40, %v1762_v61 }
0x117d   :  { %4975 = vmatprep.mubr.msk.f32.mxu1 %vm5740_vm1, %v5737_v3 }
0x117e   :  { %v6430_v63 = vadd.f32 %v1773_v43, %v1769_v48 }
0x1180   :  { %4976 = vmatmul.mubr.msk.f32.gmra.mrb[38].mxu1 %vm714_vm2, %v6430_v63 }
0x1181   :  { %4999 = vmatprep.mubr.msk.f32.mxu1 %vm5740_vm1, %v5737_v3 }
0x124b   :  { %v1875_v2 = vpop.f32.mrb[34].mxu1 }
0x124c   :  { %v4971_v10 = vpop.f32.mrb[35].mxu1  ;;  %v1876_v12 = vadd.f32 %v1875_v2, %v1799_v8 }
0x124e   :  { %v1889_v23 = vmul.f32 0.25, %v1876_v12 }
0x124f   :  { %v1880_v11 = vpop.f32.mrb[36].mxu1 }
0x1250   :  { %v1881_v14 = vadd.f32 %v1880_v11, %v1799_v8  ;;  %v4974_v0 = vpop.f32.mrb[37].mxu1 }
0x1252   :  { %v6443_v7 = vpack.i.bf16 %v1881_v14, %v1876_v12  ;;  %v1890_v62 = vmul.f32 0.25, %v1881_v14  ;;  %v4488_v12 = vld [vmem:[%s7046_s26 + $0xa0] sm:$0xff]  ;;  %v4489_v14 = vld [vmem:[%s7046_s26 + $0xa8] sm:$0xff] }
0x1253   :  { %v1885_v28 = vpop.f32.mrb[38].mxu1  ;;  %v5421_v0 = vpack.c.bf16 %v4489_v14, %v4488_v12  ;;  %v5736_v14 = vld [vmem:[%s7007_s6 + $0x10] sm:$0x3] }
0x1254   :  { %v6445_v15 = vadd.f32 %v1885_v28, %v1799_v8  ;;  %5575 = vrot.lane.b32.xlu0 %v6443_v7, %s5741_s4  ;;  %v4977_v56 = vpop.f32.mrb[39].mxu1 }
0x1256   :  { %1899 = vrot.lane.b32.xlu1 %v6445_v15, %s5741_s4  ;;  %v1891_v25 = vmul.f32 0.25, %v6445_v15 }
0x12c6   :  { %v5576_v5 = vpop.permute.xlu0 %5575 }
0x12c7   :  { %v5578_v17 = vunpack.i.h.bf16 %v5576_v5  ;;  %v5577_v19 = vunpack.i.l.bf16 %v5576_v5 }
0x12c8   :  { %v1900_v31 = vpop.permute.xlu1 %1899 }
0x12c9   :  { %v5414_v22 = vpack.c.bf16 %v5578_v17, %v5577_v19 }
0x12cb   :  { %5416 = vmatpush3.bf16.xpose.msk.msra.mxu0 %vm6170_vm4, %v5414_v22 }
0x12cc   :  { %4982 = vmatprep.subr.mxu0 %v5737_v3 }
0x12d3   :  { %4983 = vmatpush3.xpose.msk.msra.mxu0 %vm816_vm3, %v1900_v31 }
0x12d4   :  { %5420 = vmatprep.subr.bf16.mxu0 %v5739_v41 }
0x12d6   :  { %4985 = vmatmul.mubr.msk.f32.vlgmr.msra.gmra.mrb[36].mxu0 %vm816_vm3, %v1889_v23 }
0x12d7   :  { %4987 = vmatprep.mubr.msk.f32.mxu0 %vm5740_vm1, %v5737_v3  ;;  %5422 = vmatpush3.bf16.msra.mxu0 %v5421_v0 }
0x12d8   :  { %5427 = vmatprep.subr.bf16.mxu0 %v5739_v41 }
0x12da   :  { %4988 = vmatmul.mubr.msk.f32.gmra.mrb[38].mxu0 %vm816_vm3, %v1890_v62 }
0x12db   :  { %4990 = vmatprep.mubr.msk.f32.mxu0 %vm5740_vm1, %v5737_v3 }
0x12de   :  { %4991 = vmatmul.mubr.msk.f32.gmra.mrb[40].mxu0 %vm816_vm3, %v1891_v25 }
0x12df   :  { %5012 = vmatprep.mubr.msk.f32.mxu0 %vm5740_vm1, %v5737_v3 }
0x13a9   :  { %v1982_v60 = vpop.f32.mrb[36].mxu0 }
0x13aa   :  { %v1983_v26 = vadd.f32 %v1982_v60, %v6195_v13  ;;  %v4986_v35 = vpop.f32.mrb[37].mxu0 }
0x13ac   :  { %v1996_v27 = vsel %vm912_vm5, %v1983_v26, -inf }
0x13ad   :  { %1997 = vmax.xlane.f32.xlu1 %v1996_v27  ;;  %v1987_v29 = vpop.f32.mrb[38].mxu0 }
0x13ae   :  { %v1988_v30 = vadd.f32 %v1987_v29, %v6201_v58  ;;  %v4989_v32 = vpop.f32.mrb[39].mxu0 }
0x13b0   :  { %v1999_v34 = vsel %vm912_vm5, %v1988_v30, -inf }
0x13b1   :  { %2000 = vmax.xlane.f32.xlu0 %v1999_v34  ;;  %v1992_v37 = vpop.f32.mrb[40].mxu0 }
0x13b2   :  { %v1993_v40 = vadd.f32 %v1992_v37, %v6208_v20  ;;  %v4992_v42 = vpop.f32.mrb[41].mxu0 }
0x13b4   :  { %v2002_v43 = vsel %vm919_vm6, %v1993_v40, -inf }
0x13b5   :  { %2003 = vmax.xlane.f32.xlu0 %v2002_v43 }
0x143a   :  { %v1998_v44 = vpop.xlane.xlu1 %1997 }
0x143b   :  { %v2005_v13 = vsub.f32 %v1983_v26, %v1998_v44 }
0x143d   :  { %v2008_v45 = vmul.f32 1.442695, %v2005_v13 }
0x143e   :  { %v2001_v47 = vpop.xlane.xlu0 %2000 }
0x143f   :  { %5654 = vpow2.f32 %v2008_v45  ;;  %v2006_v50 = vsub.f32 %v1988_v30, %v2001_v47 }
0x1441   :  { %v2010_v53 = vmul.f32 1.442695, %v2006_v50 }
0x1442   :  { %v2004_v20 = vpop.xlane.xlu0 %2003 }
0x1443   :  { %5656 = vpow2.f32 %v2010_v53  ;;  %v2007_v2 = vsub.f32 %v1993_v40, %v2004_v20 }
0x1445   :  { %v2012_v8 = vmul.f32 1.442695, %v2007_v2  ;;  %v5735_v2 = vld [vmem:[%s7007_s6 + $0x8] sm:$0xff] }
0x1447   :  { %5658 = vpow2.f32 %v2012_v8 }
0x1449   :  { %v5655_v58 = vpop.eup %5654 }
0x144a   :  { %v2014_v55 = vsel %vm912_vm5, %v5655_v58, 0.0 }
0x144b   :  { %2015 = vadd.xlane.f32.xlu1 %v2014_v55 }
0x144d   :  { %v5657_v61 = vpop.eup %5656 }
0x144e   :  { %v2017_v48 = vsel %vm912_vm5, %v5657_v61, 0.0 }
0x144f   :  { %2018 = vadd.xlane.f32.xlu0 %v2017_v48 }
0x1451   :  { %v5659_v10 = vpop.eup %5658 }
0x1452   :  { %v2020_v11 = vsel %vm919_vm6, %v5659_v10, 0.0 }
0x145c   :  { %2033 = vrot.lane.b32.xlu1 %v6445_v15, %s5738_s30 }
0x1460   :  { %5585 = vrot.lane.b32.xlu1 %v6443_v7, %s5742_s28 }
0x1465   :  { %5580 = vrot.lane.b32.xlu0 %v6443_v7, %s5738_s30 }
0x1469   :  { %2234 = vrot.lane.b32.xlu0 %v6445_v15, %s5742_s28 }
0x146d   :  { %2226 = vrot.lane.b32.xlu0 %v1890_v62, %s5743_s0 }
0x1484   :  { %2021 = vadd.xlane.f32.xlu1 %v2020_v11 }
0x1495   :  { %2224 = vrot.lane.b32.xlu1 %v1889_v23, %s5743_s0 }
0x1499   :  { %2228 = vrot.lane.b32.xlu1 %v1891_v25, %s5743_s0 }
0x14d8   :  { %v2016_v28 = vpop.xlane.xlu1 %2015 }
0x14d9   :  { %5660 = vrcp.f32 %v2016_v28 }
0x14dc   :  { %v2019_v56 = vpop.xlane.xlu0 %2018  ;;  %v2034_v17 = vpop.permute.xlu1 %2033 }
0x14dd   :  { %5662 = vrcp.f32 %v2019_v56 }
0x14e0   :  { %v5581_v5 = vpop.permute.xlu0 %5580  ;;  %v5586_v62 = vpop.permute.xlu1 %5585 }
0x14e1   :  { %v5583_v19 = vunpack.i.h.bf16 %v5581_v5  ;;  %v5582_v22 = vunpack.i.l.bf16 %v5581_v5  ;;  %v5588_v26 = vunpack.i.h.bf16 %v5586_v62  ;;  %v5587_v35 = vunpack.i.l.bf16 %v5586_v62 }
0x14e3   :  { %v5418_v31 = vpack.c.bf16 %v5583_v19, %v5582_v22  ;;  %v5661_v23 = vpop.eup %5660  ;;  %v5424_v29 = vpack.c.bf16 %v5588_v26, %v5587_v35 }
0x14e4   :  { %v2026_v25 = vmul.f32 %v5661_v23, %v5655_v58  ;;  %v2235_v30 = vpop.permute.xlu0 %2234  ;;  %v5734_v58 = vld [vmem:[%s7007_s6] sm:$0xff]  ;;  %s7050_s6 = smov 48  }
0x14e5   :  { %5419 = vmatpush3.bf16.msra.mxu1 %v5418_v31 }
0x14e6   :  { %4997 = vmatprep.subr.mxu1 %v5737_v3 }
0x14e7   :  { %v5663_v60 = vpop.eup %5662 }
0x14e8   :  { %v2027_v27 = vmul.f32 %v5663_v60, %v5657_v61  ;;  %v2227_v6 = vpop.permute.xlu0 %2226 }
0x14e9   :  { %4998 = vmatpush3.msk.msra.mxu1 %vm964_vm7, %v2034_v17 }
0x14ea   :  { %5000 = vmatmul.mubr.msk.f32.vlgmr.msra.gmra.mrb[40].mxu1 %vm912_vm5, %v2026_v25  ;;  %5423 = vmatprep.subr.bf16.mxu1 %v5739_v41 }
0x14eb   :  { %5002 = vmatprep.mubr.msk.f32.mxu1 %vm5740_vm1, %v5737_v3 }
0x14ee   :  { %5003 = vmatmul.mubr.msk.f32.gmra.mrb[42].mxu1 %vm912_vm5, %v2027_v27 }
0x14ef   :  { %5005 = vmatprep.mubr.msk.f32.mxu1 %vm5740_vm1, %v5737_v3 }
0x14f0   :  { %5426 = vmatpush3.bf16.xpose.msk.msra.mxu1 %vm6170_vm4, %v5424_v29  ;;  %vm4143_vm4 = vcmask 122880  }
0x14f1   :  { %5025 = vmatprep.subr.mxu1 %v5737_v3 }
0x14f8   :  { %5026 = vmatpush3.xpose.msk.msra.mxu1 %vm816_vm3, %v2235_v30 }
0x14f9   :  { %5430 = vmatprep.subr.bf16.mxu1 %v5739_v41 }
0x1511   :  { %v2022_v32 = vpop.xlane.xlu1 %2021 }
0x1512   :  { %5664 = vrcp.f32 %v2022_v32 }
0x1515   :  { %v2225_v40 = vpop.permute.xlu1 %2224 }
0x1519   :  { %v2229_v42 = vpop.permute.xlu1 %2228 }
0x151c   :  { %v5665_v34 = vpop.eup %5664 }
0x151d   :  { %v2028_v37 = vmul.f32 %v5665_v34, %v5659_v10 }
0x151f   :  { %5006 = vmatmul.mubr.msk.f32.gmra.mrb[44].mxu1 %vm912_vm5, %v2028_v37 }
0x1520   :  { %5027 = vmatprep.mubr.msk.f32.mxu1 %vm5740_vm1, %v5737_v3 }
0x1523   :  { %5028 = vmatmul.mubr.msk.f32.vlgmr.msra.gmra.mrb[46].mxu1 %vm816_vm3, %v2225_v40 }
0x1524   :  { %5030 = vmatprep.mubr.msk.f32.mxu1 %vm5740_vm1, %v5737_v3 }
0x1527   :  { %5031 = vmatmul.mubr.msk.f32.gmra.mrb[48].mxu1 %vm816_vm3, %v2227_v6 }
0x1528   :  { %5033 = vmatprep.mubr.msk.f32.mxu1 %vm5740_vm1, %v5737_v3 }
0x152b   :  { %5034 = vmatmul.mubr.msk.f32.gmra.mrb[50].mxu1 %vm816_vm3, %v2229_v42  ;;  %v4490_v42 = vld [vmem:[%s7046_s26 + $0xb0] sm:$0xff] }
0x152c   :  { %5055 = vmatprep.mubr.msk.f32.mxu1 %vm5740_vm1, %v5737_v3 }
0x15bd   :  { %v2114_v43 = vpop.f32.mrb[40].mxu1 }
0x15be   :  { %v5001_v44 = vpop.f32.mrb[41].mxu1  ;;  %5013 = vmatmul.mubr.msk.f32.vlgmr.msra.gmra.mrb[42].mxu0 %vm816_vm3, %v2114_v43  ;;  %v4491_v43 = vld [vmem:[%s7046_s26 + $0xb8] sm:$0xff] }
0x15bf   :  { %5015 = vmatprep.mubr.msk.f32.mxu0 %vm5740_vm1, %v5737_v3  ;;  %v5431_v44 = vpack.c.bf16 %v4491_v43, %v4490_v42 }
0x15c1   :  { %v2119_v13 = vpop.f32.mrb[42].mxu1  ;;  %5432 = vmatpush3.bf16.msra.mxu1 %v5431_v44 }
0x15c2   :  { %v5004_v45 = vpop.f32.mrb[43].mxu1  ;;  %5016 = vmatmul.mubr.msk.f32.gmra.mrb[44].mxu0 %vm816_vm3, %v2119_v13  ;;  %5439 = vmatprep.subr.bf16.mxu1 %v5739_v41 }
0x15c3   :  { %5018 = vmatprep.mubr.msk.f32.mxu0 %vm5740_vm1, %v5737_v3 }
0x15f2   :  { %v2124_v47 = vpop.f32.mrb[44].mxu1 }
0x15f3   :  { %v5007_v50 = vpop.f32.mrb[45].mxu1  ;;  %5019 = vmatmul.mubr.msk.f32.gmra.mrb[46].mxu0 %vm816_vm3, %v2124_v47 }
0x15f4   :  { %5042 = vmatprep.mubr.msk.f32.mxu0 %vm5740_vm1, %v5737_v3 }
0x15f6   :  { %v2314_v53 = vpop.f32.mrb[46].mxu1 }
0x15f7   :  { %v2315_v55 = vadd.f32 %v5734_v58, %v2314_v53  ;;  %v5029_v61 = vpop.f32.mrb[47].mxu1 }
0x15f9   :  { %v2328_v48 = vsel %vm912_vm5, %v2315_v55, -inf }
0x15fa   :  { %2329 = vmax.xlane.f32.xlu0 %v2328_v48  ;;  %v2319_v20 = vpop.f32.mrb[48].mxu1 }
0x15fb   :  { %v2320_v8 = vadd.f32 %v5735_v2, %v2319_v20  ;;  %v5032_v10 = vpop.f32.mrb[49].mxu1 }
0x15fd   :  { %v2331_v11 = vsel %vm912_vm5, %v2320_v8, -inf }
0x15fe   :  { %2332 = vmax.xlane.f32.xlu1 %v2331_v11  ;;  %v2324_v12 = vpop.f32.mrb[50].mxu1 }
0x15ff   :  { %v2325_v0 = vadd.f32 %v5736_v14, %v2324_v12  ;;  %v5035_v28 = vpop.f32.mrb[51].mxu1 }
0x1601   :  { %v2334_v56 = vsel %vm919_vm6, %v2325_v0, -inf }
0x1602   :  { %2335 = vmax.xlane.f32.xlu0 %v2334_v56 }
0x1687   :  { %v2330_v5 = vpop.xlane.xlu0 %2329 }
0x1688   :  { %v2337_v17 = vsub.f32 %v2315_v55, %v2330_v5 }
0x168a   :  { %v2340_v19 = vmul.f32 1.442695, %v2337_v17  ;;  %v2220_v17 = vrot.slane %v6439_v1, %v5994_v4 }
0x168b   :  { %v2333_v22 = vpop.xlane.xlu1 %2332 }
0x168c   :  { %5666 = vpow2.f32 %v2340_v19  ;;  %v2338_v31 = vsub.f32 %v2320_v8, %v2333_v22 }
0x168e   :  { %v2342_v23 = vmul.f32 1.442695, %v2338_v31 }
0x168f   :  { %v2336_v62 = vpop.xlane.xlu0 %2335 }
0x1690   :  { %5668 = vpow2.f32 %v2342_v23  ;;  %v2339_v25 = vsub.f32 %v2325_v0, %v2336_v62 }
0x1691   :  { %v6540_v60 = vpop.f32.mrb[42].mxu0 }
0x1692   :  { %v2344_v26 = vmul.f32 1.442695, %v2339_v25  ;;  %v5014_v35 = vpop.f32.mrb[43].mxu0  ;;  %v2221_v19 = vadd.f32 %v2220_v17, %v6540_v60 }
0x1694   :  { %5670 = vpow2.f32 %v2344_v26 }
0x1695   :  { %v6542_v27 = vpop.f32.mrb[44].mxu0 }
0x1696   :  { %v5667_v29 = vpop.eup %5666  ;;  %v5017_v30 = vpop.f32.mrb[45].mxu0  ;;  %v2222_v62 = vadd.f32 %v2220_v17, %v6542_v27 }
0x1697   :  { %v2346_v32 = vsel %vm912_vm5, %v5667_v29, 0.0 }
0x1698   :  { %2347 = vadd.xlane.f32.xlu0 %v2346_v32 }
0x169a   :  { %v5669_v34 = vpop.eup %5668 }
0x169b   :  { %v2349_v37 = vsel %vm912_vm5, %v5669_v34, 0.0 }
0x169c   :  { %2350 = vadd.xlane.f32.xlu1 %v2349_v37 }
0x169e   :  { %v5671_v40 = vpop.eup %5670 }
0x169f   :  { %v2352_v6 = vsel %vm919_vm6, %v5671_v40, 0.0 }
0x16a0   :  { %2353 = vadd.xlane.f32.xlu0 %v2352_v6 }
0x16ad   :  { %5590 = vrot.lane.b32.xlu1 %v6443_v7, %s7050_s6 }
0x16b6   :  { %2365 = vrot.lane.b32.xlu0 %v6445_v15, %s7050_s6 }
0x16c6   :  { %v2213_v13 = vpop.f32.mrb[46].mxu0 }
0x16c7   :  { %v5020_v45 = vpop.f32.mrb[47].mxu0  ;;  %v2223_v32 = vadd.f32 %v2220_v17, %v2213_v13 }
0x1725   :  { %v2348_v47 = vpop.xlane.xlu0 %2347 }
0x1726   :  { %5672 = vrcp.f32 %v2348_v47 }
0x1729   :  { %v2351_v7 = vpop.xlane.xlu1 %2350 }
0x172a   :  { %5674 = vrcp.f32 %v2351_v7 }
0x172d   :  { %v5591_v50 = vpop.permute.xlu1 %5590  ;;  %v2354_v15 = vpop.xlane.xlu0 %2353 }
0x172e   :  { %v5593_v53 = vunpack.i.h.bf16 %v5591_v50  ;;  %v5592_v58 = vunpack.i.l.bf16 %v5591_v50  ;;  %5676 = vrcp.f32 %v2354_v15 }
0x1730   :  { %v5428_v55 = vpack.c.bf16 %v5593_v53, %v5592_v58  ;;  %v5673_v61 = vpop.eup %5672 }
0x1731   :  { %v2358_v48 = vmul.f32 %v5673_v61, %v5667_v29  ;;  %v2366_v20 = vpop.permute.xlu0 %2365  ;;  %v4492_v61 = vld [vmem:[%s7046_s26 + $0xc0] sm:$0xff] }
0x1732   :  { %5429 = vmatpush3.bf16.msra.mxu0 %v5428_v55 }
0x1733   :  { %5040 = vmatprep.subr.mxu0 %v5737_v3 }
0x1734   :  { %v5675_v2 = vpop.eup %5674 }
0x1735   :  { %v2359_v8 = vmul.f32 %v5675_v2, %v5669_v34  ;;  %v4494_v2 = vld [vmem:[%s7046_s26 + $0xd0] sm:$0xff] }
0x1736   :  { %5041 = vmatpush3.msk.msra.mxu0 %vm964_vm7, %v2366_v20 }
0x1737   :  { %5043 = vmatmul.mubr.msk.f32.vlgmr.msra.gmra.mrb[48].mxu0 %vm912_vm5, %v2358_v48  ;;  %5433 = vmatprep.subr.bf16.mxu0 %v5739_v41  ;;  %v4493_v48 = vld [vmem:[%s7046_s26 + $0xc8] sm:$0xff] }
0x1738   :  { %5045 = vmatprep.mubr.msk.f32.mxu0 %vm5740_vm1, %v5737_v3  ;;  %v5677_v10 = vpop.eup %5676  ;;  %v5434_v20 = vpack.c.bf16 %v4493_v48, %v4492_v61 }
0x1739   :  { %v2360_v11 = vmul.f32 %v5677_v10, %v5671_v40 }
0x173a   :  { %5435 = vmatpush3.bf16.msra.mxu0 %v5434_v20 }
0x173b   :  { %5046 = vmatmul.mubr.msk.f32.gmra.mrb[50].mxu0 %vm912_vm5, %v2359_v8  ;;  %5436 = vmatprep.subr.bf16.mxu0 %v5739_v41  ;;  %v4495_v8 = vld [vmem:[%s7046_s26 + $0xd8] sm:$0xff] }
0x173c   :  { %5048 = vmatprep.mubr.msk.f32.mxu0 %vm5740_vm1, %v5737_v3  ;;  %v5437_v10 = vpack.c.bf16 %v4495_v8, %v4494_v2 }
0x173e   :  { %5438 = vmatpush3.bf16.msra.mxu0 %v5437_v10 }
0x173f   :  { %5049 = vmatmul.mubr.msk.f32.gmra.mrb[52].mxu0 %vm912_vm5, %v2360_v11  ;;  %5445 = vmatprep.subr.bf16.mxu0 %v5739_v41  ;;  %v4496_v11 = vld [vmem:[%s7046_s26 + $0xe0] sm:$0xff] }
0x1740   :  { %5072 = vmatprep.mubr.msk.f32.mxu0 %vm5740_vm1, %v5737_v3 }
0x180a   :  { %v2446_v12 = vpop.f32.mrb[48].mxu0 }
0x180b   :  { %v5044_v14 = vpop.f32.mrb[49].mxu0  ;;  %5056 = vmatmul.mubr.msk.f32.vlgmr.msra.gmra.mrb[52].mxu1 %vm816_vm3, %v2446_v12  ;;  %v4497_v12 = vld [vmem:[%s7046_s26 + $0xe8] sm:$0xff] }
0x180c   :  { %5058 = vmatprep.mubr.msk.f32.mxu1 %vm5740_vm1, %v5737_v3  ;;  %v5440_v14 = vpack.c.bf16 %v4497_v12, %v4496_v11 }
0x180e   :  { %v2451_v0 = vpop.f32.mrb[50].mxu0  ;;  %5441 = vmatpush3.bf16.msra.mxu1 %v5440_v14 }
0x180f   :  { %v5047_v28 = vpop.f32.mrb[51].mxu0  ;;  %5059 = vmatmul.mubr.msk.f32.gmra.mrb[54].mxu1 %vm816_vm3, %v2451_v0  ;;  %5442 = vmatprep.subr.bf16.mxu1 %v5739_v41 }
0x1810   :  { %5061 = vmatprep.mubr.msk.f32.mxu1 %vm5740_vm1, %v5737_v3 }
0x1812   :  { %v2456_v56 = vpop.f32.mrb[52].mxu0 }
0x1813   :  { %v5050_v5 = vpop.f32.mrb[53].mxu0  ;;  %5062 = vmatmul.mubr.msk.f32.gmra.mrb[56].mxu1 %vm816_vm3, %v2456_v56 }
0x1814   :  { %5089 = vmatprep.mubr.msk.f32.mxu1 %vm5740_vm1, %v5737_v3 }
0x18de   :  { %v2535_v22 = vpop.f32.mrb[52].mxu1 }
0x18df   :  { %v2549_v31 = vadd.f32 %v2535_v22, %v2221_v19  ;;  %v5057_v23 = vpop.f32.mrb[53].mxu1 }
0x18e1   :  { %v2552_v25 = vadd.f32 %v2549_v31, %v6418_v49 }
0x18e2   :  { %v2540_v26 = vpop.f32.mrb[54].mxu1 }
0x18e3   :  { %v2550_v35 = vadd.f32 %v2540_v26, %v2222_v62  ;;  %v5060_v29 = vpop.f32.mrb[55].mxu1  ;;  %v2555_v30 = vsel %vm714_vm2, %v2552_v25, 0.0  ;;  %v2597_v62 = vrot.slane %v6439_v1, %v1517_v54  ;;  %v2604_v26 = vrot.slane %v6439_v1, %v1524_v57 }
0x18e4   :  { %2556 = vadd.xlane.f32.xlu1 %v2555_v30 }
0x18e5   :  { %v2553_v34 = vadd.f32 %v2550_v35, %v6424_v59 }
0x18e6   :  { %v2545_v37 = vpop.f32.mrb[56].mxu1 }
0x18e7   :  { %v2551_v4 = vadd.f32 %v2545_v37, %v2223_v32  ;;  %v5063_v40 = vpop.f32.mrb[57].mxu1  ;;  %v2558_v60 = vsel %vm714_vm2, %v2553_v34, 0.0 }
0x18e8   :  { %2559 = vadd.xlane.f32.xlu0 %v2558_v60 }
0x18e9   :  { %v2554_v6 = vadd.f32 %v2551_v4, %v6430_v63 }
0x18eb   :  { %v2561_v27 = vsel %vm1480_vm8, %v2554_v6, 0.0 }
0x18ec   :  { %2562 = vadd.xlane.f32.xlu1 %v2561_v27  ;;  %v4499_v27 = vld [vmem:[%s7046_s26 + $0xf8] sm:$0xff] }
0x1971   :  { %v2557_v49 = vpop.xlane.xlu1 %2556 }
0x1972   :  { %v2564_v42 = vmul.f32 0.03125, %v2557_v49 }
0x1974   :  { %v2567_v43 = vsub.f32 %v2552_v25, %v2564_v42  ;;  %v2611_v42 = vrot.slane %v6439_v1, %v1531_v9 }
0x1975   :  { %v2560_v44 = vpop.xlane.xlu0 %2559 }
0x1976   :  { %v2565_v45 = vmul.f32 0.03125, %v2560_v44  ;;  %v2570_v47 = vmul.f32 %v2567_v43, %v2567_v43 }
0x1978   :  { %v2568_v13 = vsub.f32 %v2553_v34, %v2565_v45  ;;  %v2573_v59 = vsel %vm714_vm2, %v2570_v47, 0.0 }
0x1979   :  { %2574 = vadd.xlane.f32.xlu0 %v2573_v59  ;;  %v2563_v7 = vpop.xlane.xlu1 %2562 }
0x197a   :  { %v2566_v50 = vmul.f32 0.03125, %v2563_v7  ;;  %v2571_v15 = vmul.f32 %v2568_v13, %v2568_v13 }
0x197c   :  { %v2569_v53 = vsub.f32 %v2554_v6, %v2566_v50  ;;  %v2576_v58 = vsel %vm714_vm2, %v2571_v15, 0.0  ;;  %v4498_v6 = vld [vmem:[%s7046_s26 + $0xf0] sm:$0xff] }
0x197d   :  { %2577 = vadd.xlane.f32.xlu1 %v2576_v58  ;;  %v5443_v49 = vpack.c.bf16 %v4499_v27, %v4498_v6 }
0x197e   :  { %v2572_v63 = vmul.f32 %v2569_v53, %v2569_v53 }
0x197f   :  { %5444 = vmatpush3.bf16.msra.mxu1 %v5443_v49 }
0x1980   :  { %v2579_v55 = vsel %vm1480_vm8, %v2572_v63, 0.0  ;;  %5112 = vmatprep.subr.mxu1 %v5737_v3  ;;  %v2799_v63 = vrot.slane %v6439_v1, %v1719_v33 }
0x1981   :  { %2580 = vadd.xlane.f32.xlu0 %v2579_v55 }
0x1a06   :  { %v2575_v0 = vpop.xlane.xlu0 %2574 }
0x1a07   :  { %v2582_v28 = vmul.f32 0.03125, %v2575_v0 }
0x1a09   :  { %v2585_v56 = vadd.f32 1e-05, %v2582_v28 }
0x1a0a   :  { %v2578_v5 = vpop.xlane.xlu1 %2577 }
0x1a0b   :  { %5678 = vrsqrt.f32 %v2585_v56  ;;  %v2583_v17 = vmul.f32 0.03125, %v2578_v5 }
0x1a0d   :  { %v2586_v19 = vadd.f32 1e-05, %v2583_v17 }
0x1a0e   :  { %v2581_v22 = vpop.xlane.xlu0 %2580 }
0x1a0f   :  { %5680 = vrsqrt.f32 %v2586_v19  ;;  %v2584_v31 = vmul.f32 0.03125, %v2581_v22 }
0x1a11   :  { %v2587_v23 = vadd.f32 1e-05, %v2584_v31 }
0x1a13   :  { %5682 = vrsqrt.f32 %v2587_v23 }
0x1a15   :  { %v5679_v25 = vpop.eup %5678 }
0x1a16   :  { %v2591_v35 = vmul.f32 %v5679_v25, %v2567_v43 }
0x1a18   :  { %v2598_v29 = vmul.f32 %v2597_v62, %v2591_v35 }
0x1a19   :  { %v5681_v30 = vpop.eup %5680 }
0x1a1a   :  { %v2605_v32 = vadd.f32 %v2604_v26, %v2598_v29  ;;  %v2592_v34 = vmul.f32 %v5681_v30, %v2568_v13 }
0x1a1c   :  { %5073 = vmatmul.mubr.msk.f32.vlgmr.msra.gmra.mrb[54].mxu0 %vm714_vm2, %v2605_v32  ;;  %v2599_v37 = vmul.f32 %v2597_v62, %v2592_v34 }
0x1a1d   :  { %v5683_v4 = vpop.eup %5682  ;;  %5075 = vmatprep.mubr.msk.f32.mxu0 %vm5740_vm1, %v5737_v3 }
0x1a1e   :  { %v2606_v40 = vadd.f32 %v2604_v26, %v2599_v37  ;;  %v2593_v60 = vmul.f32 %v5683_v4, %v2569_v53 }
0x1a20   :  { %5076 = vmatmul.mubr.msk.f32.gmra.mrb[56].mxu0 %vm714_vm2, %v2606_v40  ;;  %v2600_v54 = vmul.f32 %v2597_v62, %v2593_v60 }
0x1a21   :  { %5078 = vmatprep.mubr.msk.f32.mxu0 %vm5740_vm1, %v5737_v3 }
0x1a22   :  { %v2607_v57 = vadd.f32 %v2604_v26, %v2600_v54 }
0x1a24   :  { %5079 = vmatmul.mubr.msk.f32.gmra.mrb[58].mxu0 %vm714_vm2, %v2607_v57 }
0x1a25   :  { %5104 = vmatprep.mubr.msk.f32.mxu0 %vm5740_vm1, %v5737_v3 }
0x1aef   :  { %v2687_v43 = vpop.f32.mrb[54].mxu0 }
0x1af0   :  { %v2688_v44 = vadd.f32 %v2687_v43, %v2611_v42  ;;  %v5074_v45 = vpop.f32.mrb[55].mxu0 }
0x1af2   :  { %v2701_v47 = vmax.f32 %v2688_v44, 0.0 }
0x1af3   :  { %v2692_v13 = vpop.f32.mrb[56].mxu0 }
0x1af4   :  { %v2693_v59 = vadd.f32 %v2692_v13, %v2611_v42  ;;  %v5077_v7 = vpop.f32.mrb[57].mxu0  ;;  %5090 = vmatmul.mubr.msk.f32.vlgmr.msra.gmra.mrb[58].mxu1 %vm714_vm2, %v2701_v47  ;;  %v2845_v47 = vrot.slane %v6439_v1, %v1765_v36  ;;  %v2856_v36 = vld [vmem:[%s7008_s7] sm:$0x3f] }
0x1af5   :  { %5092 = vmatprep.mubr.msk.f32.mxu1 %vm5740_vm1, %v5737_v3 }
0x1af6   :  { %v2702_v50 = vmax.f32 %v2693_v59, 0.0 }
0x1af7   :  { %v2697_v15 = vpop.f32.mrb[58].mxu0 }
0x1af8   :  { %v2698_v53 = vadd.f32 %v2697_v15, %v2611_v42  ;;  %v5080_v58 = vpop.f32.mrb[59].mxu0  ;;  %5093 = vmatmul.mubr.msk.f32.gmra.mrb[60].mxu1 %vm714_vm2, %v2702_v50  ;;  %v2852_v50 = vrot.slane %v6439_v1, %v1772_v39 }
0x1af9   :  { %5095 = vmatprep.mubr.msk.f32.mxu1 %vm5740_vm1, %v5737_v3 }
0x1afa   :  { %v2703_v9 = vmax.f32 %v2698_v53, 0.0 }
0x1afc   :  { %5096 = vmatmul.mubr.msk.f32.gmra.mrb[62].mxu1 %vm714_vm2, %v2703_v9 }
0x1afd   :  { %5114 = vmatprep.mubr.msk.f32.mxu1 %vm5740_vm1, %v5737_v3 }
0x1bc7   :  { %v2779_v55 = vpop.f32.mrb[58].mxu1 }
0x1bc8   :  { %v2793_v61 = vadd.f32 %v2779_v55, %v2605_v32  ;;  %v5091_v48 = vpop.f32.mrb[59].mxu1 }
0x1bca   :  { %v2800_v20 = vadd.f32 %v2799_v63, %v2793_v61 }
0x1bcb   :  { %v2784_v2 = vpop.f32.mrb[60].mxu1 }
0x1bcc   :  { %v2794_v8 = vadd.f32 %v2784_v2, %v2606_v40  ;;  %v5094_v10 = vpop.f32.mrb[61].mxu1  ;;  %v2803_v11 = vsel %vm714_vm2, %v2800_v20, 0.0  ;;  %v2934_v2 = vld [vmem:[%s7010_s11] sm:$0xff] }
0x1bcd   :  { %2804 = vadd.xlane.f32.xlu1 %v2803_v11 }
0x1bce   :  { %v2801_v12 = vadd.f32 %v2799_v63, %v2794_v8 }
0x1bcf   :  { %v2789_v14 = vpop.f32.mrb[62].mxu1 }
0x1bd0   :  { %v2795_v0 = vadd.f32 %v2789_v14, %v2607_v57  ;;  %v5097_v28 = vpop.f32.mrb[63].mxu1  ;;  %v2806_v56 = vsel %vm714_vm2, %v2801_v12, 0.0 }
0x1bd1   :  { %2807 = vadd.xlane.f32.xlu0 %v2806_v56 }
0x1bd2   :  { %v2802_v5 = vadd.f32 %v2799_v63, %v2795_v0 }
0x1bd4   :  { %v2809_v33 = vsel %vm1480_vm8, %v2802_v5, 0.0 }
0x1bd5   :  { %2810 = vadd.xlane.f32.xlu1 %v2809_v33 }
0x1c5a   :  { %v2805_v17 = vpop.xlane.xlu1 %2804 }
0x1c5b   :  { %v2812_v19 = vmul.f32 0.03125, %v2805_v17 }
0x1c5d   :  { %v2815_v22 = vsub.f32 %v2800_v20, %v2812_v19 }
0x1c5e   :  { %v2808_v31 = vpop.xlane.xlu0 %2807 }
0x1c5f   :  { %v2813_v23 = vmul.f32 0.03125, %v2808_v31  ;;  %v2818_v62 = vmul.f32 %v2815_v22, %v2815_v22 }
0x1c61   :  { %v2816_v25 = vsub.f32 %v2801_v12, %v2813_v23  ;;  %v2821_v26 = vsel %vm714_vm2, %v2818_v62, 0.0 }
0x1c62   :  { %2822 = vadd.xlane.f32.xlu0 %v2821_v26  ;;  %v2811_v35 = vpop.xlane.xlu1 %2810 }
0x1c63   :  { %v2814_v29 = vmul.f32 0.03125, %v2811_v35  ;;  %v2819_v30 = vmul.f32 %v2816_v25, %v2816_v25 }
0x1c65   :  { %v2817_v32 = vsub.f32 %v2802_v5, %v2814_v29  ;;  %v2824_v34 = vsel %vm714_vm2, %v2819_v30, 0.0  ;;  %v3286_v5 = vmax.f32 %v6012_v38, 0.0  ;;  %v512_v30 = vld [vmem:[%s7045_s1 + $0x40] sm:$0x1] }
0x1c66   :  { %2825 = vadd.xlane.f32.xlu1 %v2824_v34  ;;  %v587_v34 = vadd.f32 %v6151_v46, %v512_v30 }
0x1c67   :  { %v2820_v37 = vmul.f32 %v2817_v32, %v2817_v32  ;;  %v3288_v33 = vrot.slane %v3286_v5, 1  ;;  %v3622_v5 = vld [vmem:[%s7013_s20 + $0x38] sm:$0xff] }
0x1c69   :  { %v2827_v4 = vsel %vm1480_vm8, %v2820_v37, 0.0 }
0x1c6a   :  { %2828 = vadd.xlane.f32.xlu0 %v2827_v4 }
0x1cef   :  { %v2823_v40 = vpop.xlane.xlu0 %2822 }
0x1cf0   :  { %v2830_v60 = vmul.f32 0.03125, %v2823_v40 }
0x1cf2   :  { %v2833_v54 = vadd.f32 1e-05, %v2830_v60 }
0x1cf3   :  { %v2826_v57 = vpop.xlane.xlu1 %2825 }
0x1cf4   :  { %5684 = vrsqrt.f32 %v2833_v54  ;;  %v2831_v6 = vmul.f32 0.03125, %v2826_v57  ;;  %v3364_v54 = vld [vmem:[%s7012_s19] sm:$0xff]  ;;  %v3365_v57 = vld [vmem:[%s7012_s19 + $0x8] sm:$0xff] }
0x1cf6   :  { %v2834_v27 = vadd.f32 1e-05, %v2831_v6  ;;  %v5461_v6 = vpack.c.bf16 %v3365_v57, %v3364_v54  ;;  %v3795_v54 = vld [vmem:[%s7016_s21] sm:$0xff]  ;;  %v3796_v57 = vld [vmem:[%s7016_s21 + $0x8] sm:$0xff] }
0x1cf7   :  { %v2829_v49 = vpop.xlane.xlu0 %2828 }
0x1cf8   :  { %5686 = vrsqrt.f32 %v2834_v27  ;;  %v2832_v42 = vmul.f32 0.03125, %v2829_v49  ;;  %v3366_v27 = vld [vmem:[%s7012_s19 + $0x10] sm:$0xff]  ;;  %v3367_v49 = vld [vmem:[%s7012_s19 + $0x18] sm:$0xff] }
0x1cfa   :  { %v2835_v43 = vadd.f32 1e-05, %v2832_v42 }
0x1cfc   :  { %5688 = vrsqrt.f32 %v2835_v43  ;;  %v5464_v43 = vpack.c.bf16 %v3367_v49, %v3366_v27 }
0x1cfe   :  { %v5685_v44 = vpop.eup %5684 }
0x1cff   :  { %v2839_v45 = vmul.f32 %v5685_v44, %v2815_v22 }
0x1d01   :  { %v2846_v7 = vmul.f32 %v2845_v47, %v2839_v45 }
0x1d02   :  { %v5687_v13 = vpop.eup %5686 }
0x1d03   :  { %v2840_v59 = vmul.f32 %v5687_v13, %v2816_v25  ;;  %v2853_v9 = vadd.f32 %v2852_v50, %v2846_v7  ;;  %v3369_v13 = vld [vmem:[%s7012_s19 + $0x28] sm:$0xff] }
0x1d05   :  { %v2847_v15 = vmul.f32 %v2845_v47, %v2840_v59  ;;  %v3372_v59 = vld [vmem:[%s7012_s19 + $0x40] sm:$0xff] }
0x1d06   :  { %v5689_v53 = vpop.eup %5688 }
0x1d07   :  { %v2841_v58 = vmul.f32 %v5689_v53, %v2817_v32  ;;  %v2854_v63 = vadd.f32 %v2852_v50, %v2847_v15  ;;  %v3370_v53 = vld [vmem:[%s7012_s19 + $0x30] sm:$0xff] }
0x1d09   :  { %v5446_v55 = vpack.c.bf16 %v2854_v63, %v2853_v9  ;;  %v2848_v61 = vmul.f32 %v2845_v47, %v2841_v58  ;;  %v3368_v47 = vld [vmem:[%s7012_s19 + $0x20] sm:$0xff]  ;;  %v3371_v58 = vld [vmem:[%s7012_s19 + $0x38] sm:$0xff]  ;;  %v3374_v9 = vld [vmem:[%s7012_s19 + $0x50] sm:$0xff] }
0x1d0a   :  { %v5467_v7 = vpack.c.bf16 %v3369_v13, %v3368_v47  ;;  %v5470_v63 = vpack.c.bf16 %v3371_v58, %v3370_v53  ;;  %v3799_v58 = vld [vmem:[%s7016_s21 + $0x20] sm:$0xff] }
0x1d0b   :  { %5447 = vmatpush3.bf16.msra.mxu0 %v5446_v55  ;;  %v2855_v48 = vadd.f32 %v2852_v50, %v2848_v61  ;;  %v3373_v50 = vld [vmem:[%s7012_s19 + $0x48] sm:$0xff]  ;;  %v3375_v55 = vld [vmem:[%s7012_s19 + $0x58] sm:$0xff] }
0x1d0c   :  { %5102 = vmatprep.subr.mxu0 %v5737_v3  ;;  %v5473_v15 = vpack.c.bf16 %v3373_v50, %v3372_v59  ;;  %v5476_v61 = vpack.c.bf16 %v3375_v55, %v3374_v9 }
0x1d0f   :  { %5103 = vmatpush3.msk.msra.mxu0 %vm964_vm7, %v2855_v48 }
0x1d10   :  { %5105 = vmatmul.mubr.msk.f32.vlgmr.msra.gmra.mrb[60].mxu0 %vm912_vm5, %v2856_v36  ;;  %5107 = vmatprep.subr.mxu0 %v5737_v3  ;;  %vm3269_vm5 = vcmask 57344  }
0x1d11   :  { %5109 = vmatprep.mubr.msk.f32.mxu0 %vm5740_vm1, %v5737_v3 }
0x1de3   :  { %v2930_v39 = vpop.f32.mrb[60].mxu0 }
0x1de4   :  { %v2931_v1 = vadd.f32 %v2930_v39, %v2857_v51  ;;  %v5106_v20 = vpop.f32.mrb[61].mxu0 }
0x1de5   :  { %v3615_v20 = vld [vmem:[%s7013_s20] sm:$0xff] }
0x1de6   :  { %5108 = vmatpush3.xpose.msk.msra.mxu0 %vm714_vm2, %v2931_v1  ;;  %5113 = vmatpush3.msk.msra.mxu1 %vm3026_vm9, %v2931_v1 }
0x1de7   :  { %5117 = vmatprep.subr.mxu0 %v5737_v3  ;;  %5122 = vmatprep.subr.mxu1 %v5737_v3 }
0x1de9   :  { %5110 = vmatmul.mubr.msk.f32.vlgmr.msra.gmra.mrb[62].mxu0 %vm714_vm2, %v2934_v2 }
0x1dea   :  { %5119 = vmatprep.mubr.msk.f32.mxu0 %vm5740_vm1, %v5737_v3 }
0x1ebc   :  { %v3007_v8 = vpop.f32.mrb[62].mxu0 }
0x1ebd   :  { %v3012_v10 = vsel %vm3011_vm10, %v3007_v8, -inf  ;;  %v5111_v11 = vpop.f32.mrb[63].mxu0 }
0x1ebe   :  { %3013 = vmax.xlane.f32.xlu1 %v3012_v10  ;;  %v3618_v11 = vld [vmem:[%s7013_s20 + $0x18] sm:$0xff] }
0x1f4b   :  { %v3014_v12 = vpop.xlane.xlu1 %3013 }
0x1f4c   :  { %v3015_v14 = vsub.f32 %v3007_v8, %v3014_v12  ;;  %v3617_v8 = vld [vmem:[%s7013_s20 + $0x10] sm:$0xff] }
0x1f4d   :  { %v5482_v12 = vpack.c.bf16 %v3618_v11, %v3617_v8  ;;  %v3806_v8 = vld [vmem:[%s7016_s21 + $0x58] sm:$0xff]  ;;  %v3631_v11 = vld [vmem:[%s7013_s20 + $0x80] sm:$0x1] }
0x1f4e   :  { %v3016_v0 = vmul.f32 1.442695, %v3015_v14  ;;  %v3619_v14 = vld [vmem:[%s7013_s20 + $0x20] sm:$0xff] }
0x1f50   :  { %5690 = vpow2.f32 %v3016_v0  ;;  %v3620_v0 = vld [vmem:[%s7013_s20 + $0x28] sm:$0xff] }
0x1f5a   :  { %v5691_v28 = vpop.eup %5690 }
0x1f5b   :  { %v3018_v56 = vsel %vm3011_vm10, %v5691_v28, 0.0 }
0x1f5c   :  { %3019 = vadd.xlane.f32.xlu0 %v3018_v56  ;;  %v3621_v56 = vld [vmem:[%s7013_s20 + $0x30] sm:$0xff] }
0x1f72   :  { %3289 = vrot.lane.b32.xlu0 %v3288_v33, %s5738_s30  ;;  %v5488_v33 = vpack.c.bf16 %v3622_v5, %v3621_v56 }
0x1fe9   :  { %v3020_v17 = vpop.xlane.xlu0 %3019 }
0x1fea   :  { %5692 = vrcp.f32 %v3020_v17  ;;  %v3623_v17 = vld [vmem:[%s7013_s20 + $0x40] sm:$0xff] }
0x1fed   :  { %v3290_v46 = vpop.permute.xlu0 %3289 }
0x1ff4   :  { %v5693_v19 = vpop.eup %5692 }
0x1ff5   :  { %v3022_v22 = vmul.f32 %v5693_v19, %v5691_v28  ;;  %v5485_v28 = vpack.c.bf16 %v3620_v0, %v3619_v14  ;;  %v3624_v19 = vld [vmem:[%s7013_s20 + $0x48] sm:$0xff] }
0x1ff7   :  { %5115 = vmatmul.mubr.msk.f32.vlgmr.msra.gmra.mrb[64].mxu1 %vm3011_vm10, %v3022_v22  ;;  %v5491_v22 = vpack.c.bf16 %v3624_v19, %v3623_v17  ;;  %v5746_v19 = vmov 0  }
0x1ff8   :  { %5124 = vmatprep.mubr.msk.f32.mxu1 %vm5740_vm1, %v5737_v3  ;;  %5595 = vset.pattern.permute.xlu1 %v5746_v19 }
0x1ff9   :  { %5594 = vset.pattern.permute.xlu0 %v5746_v19 }
0x20ca   :  { %v3095_v31 = vpop.f32.mrb[64].mxu1 }
0x20cb   :  { %v3099_v23 = vmul.f32 %v3095_v31, %v3095_v31  ;;  %v5116_v62 = vpop.f32.mrb[65].mxu1 }
0x20cd   :  { %v3100_v25 = vsel %vm714_vm2, %v3099_v23, 0.0 }
0x20ce   :  { %3101 = vadd.xlane.f32.xlu1 %v3100_v25 }
0x215b   :  { %v3102_v26 = vpop.xlane.xlu1 %3101 }
0x215c   :  { %v3103_v38 = vmax.f32 %v3102_v26, 1e-24 }
0x215e   :  { %5694 = vrsqrt.f32 %v3103_v38  ;;  %v3627_v38 = vld [vmem:[%s7013_s20 + $0x60] sm:$0xff] }
0x2168   :  { %v5695_v35 = vpop.eup %5694 }
0x2169   :  { %v3105_v29 = vmul.f32 %v5695_v35, %v3095_v31  ;;  %v3628_v35 = vld [vmem:[%s7013_s20 + $0x68] sm:$0xff] }
0x216b   :  { %v3106_v32 = vadd.f32 %v3105_v29, %v2934_v2  ;;  %v3616_v2 = vld [vmem:[%s7013_s20 + $0x8] sm:$0xff]  ;;  %v5496_v29 = vpack.c.bf16 %v3628_v35, %v3627_v38 }
0x216c   :  { %v5479_v10 = vpack.c.bf16 %v3616_v2, %v3615_v20  ;;  %v3805_v20 = vld [vmem:[%s7016_s21 + $0x50] sm:$0xff] }
0x216d   :  { %5118 = vmatpush3.xpose.msk.msra.mxu0 %vm714_vm2, %v3106_v32  ;;  %v3626_v32 = vld [vmem:[%s7013_s20 + $0x58] sm:$0xff] }
0x216e   :  { %5448 = vmatprep.subr.bf16.mxu0 %v5739_v41 }
0x2170   :  { %5120 = vmatmul.mubr.msk.f32.vlgmr.msra.gmra.mrb[64].mxu0 %vm714_vm2, %v587_v34 }
0x2171   :  { %5450 = vmatpush3.bf16.msra.mxu0 %v6083_v16  ;;  %5143 = vmatprep.mubr.msk.f32.mxu0 %vm5740_vm1, %v5737_v3  ;;  %v3189_v16 = vld [vmem:[%s7011_s12] sm:$0xff] }
0x2172   :  { %5451 = vmatprep.subr.bf16.mxu0 %v5739_v41  ;;  %5123 = vmatpush3.msra.mxu1 %v3189_v16  ;;  %v3630_v16 = vld [vmem:[%s7013_s20 + $0x78] sm:$0xff] }
0x2173   :  { %5460 = vmatprep.subr.bf16.mxu1 %v5739_v41 }
0x2175   :  { %5453 = vmatpush3.bf16.msra.mxu0 %v6089_v18 }
0x2176   :  { %5454 = vmatprep.subr.bf16.mxu0 %v5739_v41 }
0x2179   :  { %5456 = vmatpush3.bf16.msra.mxu0 %v6100_v21 }
0x217a   :  { %5457 = vmatprep.subr.bf16.mxu0 %v5739_v41 }
0x217d   :  { %5459 = vmatpush3.bf16.msra.mxu0 %v6110_v24 }
0x217e   :  { %5472 = vmatprep.subr.bf16.mxu0 %v5739_v41 }
0x2180   :  { %5144 = vmatmul.mubr.msk.f32.vlgmr.msra.gmra.mrb[66].mxu0 %vm121_vm0, %v3290_v46  ;;  %v3629_v46 = vld [vmem:[%s7013_s20 + $0x70] sm:$0xff] }
0x2181   :  { %5176 = vmatprep.mubr.msk.f32.mxu0 %vm5740_vm1, %v5737_v3  ;;  %5474 = vmatpush3.bf16.msra.mxu0 %v5473_v15 }
0x2182   :  { %5475 = vmatprep.subr.bf16.mxu0 %v5739_v41 }
0x2185   :  { %5477 = vmatpush3.bf16.msra.mxu0 %v5476_v61  ;;  %v3801_v61 = vld [vmem:[%s7016_s21 + $0x30] sm:$0xff] }
0x2186   :  { %5497 = vmatprep.subr.bf16.mxu0 %v5496_v29 }
0x2243   :  { %v3179_v18 = vpop.f32.mrb[64].mxu0 }
0x2244   :  { %v4544_v21 = vmul.f32 -1.442695, %v3179_v18  ;;  %v5121_v37 = vpop.f32.mrb[65].mxu0  ;;  %v5500_v18 = vpack.c.bf16 %v3630_v16, %v3629_v46 }
0x2246   :  { %5696 = vpow2.f32 %v4544_v21  ;;  %v3595_v21 = vld [vmem:[%s7014_s18] sm:$0x3] }
0x2250   :  { %v5697_v24 = vpop.eup %5696 }
0x2251   :  { %v3186_v4 = vadd.f32 1.0, %v5697_v24 }
0x2253   :  { %5698 = vrcp.f32 %v3186_v4  ;;  %v3359_v40 = vpop.f32.mrb[66].mxu0 }
0x2254   :  { %v5145_v60 = vpop.f32.mrb[67].mxu0  ;;  %v3360_v44 = vadd.f32 %v3359_v40, %v512_v30  ;;  %v3625_v30 = vld [vmem:[%s7013_s20 + $0x50] sm:$0xff]  ;;  %v6834_v40 = vld [vmem:[%s7015_s14] sm:$0xff] }
0x2255   :  { %v6839_v60 = vld [vmem:[%s7015_s14 + $0x8] sm:$0xf] }
0x2256   :  { %v6734_v45 = vsub.f32 %v587_v34, %v3360_v44  ;;  %v5494_v34 = vpack.c.bf16 %v3626_v32, %v3625_v30  ;;  %v3798_v44 = vld [vmem:[%s7016_s21 + $0x18] sm:$0xff] }
0x225d   :  { %v6727_v42 = vpop.eup %5698 }
0x225e   :  { %5125 = vmatmul.mubr.msk.f32.vlgmr.msra.gmra.mrb[66].mxu1 %vm3193_vm11, %v6727_v42 }
0x225f   :  { %5462 = vmatpush3.bf16.msra.mxu1 %v5461_v6  ;;  %5154 = vmatprep.mubr.msk.f32.mxu1 %vm5740_vm1, %v5737_v3  ;;  %v3797_v6 = vld [vmem:[%s7016_s21 + $0x10] sm:$0xff] }
0x2260   :  { %5463 = vmatprep.subr.bf16.mxu1 %v5739_v41  ;;  %v5508_v47 = vpack.c.bf16 %v3798_v44, %v3797_v6 }
0x2263   :  { %5465 = vmatpush3.bf16.msra.mxu1 %v5464_v43  ;;  %v5504_v43 = vpack.c.bf16 %v3796_v57, %v3795_v54 }
0x2264   :  { %5466 = vmatprep.subr.bf16.mxu1 %v5739_v41 }
0x2266   :  { %5155 = vmatmul.mubr.msk.f32.vlgmr.msra.gmra.mrb[68].mxu1 %vm714_vm2, %v6734_v45 }
0x2267   :  { %5165 = vmatprep.mubr.msk.f32.mxu1 %vm5740_vm1, %v5737_v3  ;;  %5468 = vmatpush3.bf16.msra.mxu1 %v5467_v7 }
0x2268   :  { %5469 = vmatprep.subr.bf16.mxu1 %v5739_v41 }
0x226b   :  { %5471 = vmatpush3.bf16.msra.mxu1 %v5470_v63 }
0x226c   :  { %5478 = vmatprep.subr.bf16.mxu1 %v5739_v41 }
0x2331   :  { %v6768_v48 = vpop.f32.mrb[66].mxu1 }
0x2332   :  { %v5126_v36 = vpop.f32.mrb[67].mxu1 }
0x2333   :  { %v3802_v36 = vld [vmem:[%s7016_s21 + $0x38] sm:$0xff] }
0x2339   :  { %v3445_v51 = vpop.f32.mrb[68].mxu1 }
0x233a   :  { %v3449_v39 = vmax.f32 %v3445_v51, 0.0  ;;  %v5156_v1 = vpop.f32.mrb[69].mxu1  ;;  %v5516_v51 = vpack.c.bf16 %v3802_v36, %v3801_v61  ;;  %v3917_v61 = vld [vmem:[%s7019_s15] sm:$0xff] }
0x233b   :  { %v3804_v1 = vld [vmem:[%s7016_s21 + $0x48] sm:$0xff] }
0x233c   :  { %5166 = vmatmul.mubr.msk.f32.vlgmr.msra.gmra.mrb[70].mxu1 %vm714_vm2, %v3449_v39  ;;  %5177 = vmatmul.mubr.msk.f32.vlgmr.msra.gmra.mrb[68].mxu0 %vm714_vm2, %v3449_v39  ;;  %v3803_v39 = vld [vmem:[%s7016_s21 + $0x40] sm:$0xff] }
0x233d   :  { %5203 = vmatprep.mubr.msk.f32.mxu1 %vm5740_vm1, %v5737_v3  ;;  %5480 = vmatpush3.bf16.msra.mxu1 %v5479_v10  ;;  %v5520_v2 = vpack.c.bf16 %v3804_v1, %v3803_v39  ;;  %v5524_v10 = vpack.c.bf16 %v3806_v8, %v3805_v20 }
0x233e   :  { %5481 = vmatprep.subr.bf16.mxu1 %v5739_v41  ;;  %5499 = vmatpush3.bf16.msra.mxu0 %v5496_v29 }
0x233f   :  { %5501 = vmatprep.subr.bf16.mxu0 %v5500_v18  ;;  %5214 = vmatprep.mubr.msk.f32.mxu0 %vm714_vm2, %v6834_v40 }
0x2341   :  { %5483 = vmatpush3.bf16.msra.mxu1 %v5482_v12 }
0x2342   :  { %5484 = vmatprep.subr.bf16.mxu1 %v5739_v41  ;;  %5503 = vmatpush3.bf16.msra.mxu0 %v5500_v18 }
0x2343   :  { %5505 = vmatprep.subr.bf16.mxu0 %v5504_v43 }
0x2345   :  { %5486 = vmatpush3.bf16.msra.mxu1 %v5485_v28  ;;  %5215 = vmatmul.mubr.msk.f32.vlgmr.msra.gmra.mrb[70].mxu0 %vm714_vm2, %v6839_v60 }
0x2346   :  { %5487 = vmatprep.subr.bf16.mxu1 %v5739_v41  ;;  %5507 = vmatpush3.bf16.msra.mxu0 %v5504_v43 }
0x2347   :  { %5509 = vmatprep.subr.bf16.mxu0 %v5508_v47 }
0x2349   :  { %5489 = vmatpush3.bf16.msra.mxu1 %v5488_v33 }
0x234a   :  { %5490 = vmatprep.subr.bf16.mxu1 %v5739_v41  ;;  %5511 = vmatpush3.bf16.msra.mxu0 %v5508_v47 }
0x234d   :  { %5492 = vmatpush3.bf16.msra.mxu1 %v5491_v22 }
0x234e   :  { %5493 = vmatprep.subr.bf16.mxu1 %v5739_v41 }
0x2351   :  { %5495 = vmatpush3.bf16.msra.mxu1 %v5494_v34 }
0x2352   :  { %5244 = vmatprep.subr.mxu1 %v5737_v3 }
0x240f   :  { %v3519_v31 = vpop.f32.mrb[70].mxu1  ;;  %v3589_v23 = vpop.f32.mrb[68].mxu0 }
0x2410   :  { %v3593_v62 = vmul.f32 1.442695, %v3589_v23  ;;  %v5167_v25 = vpop.f32.mrb[71].mxu1  ;;  %v5178_v26 = vpop.f32.mrb[69].mxu0 }
0x2412   :  { %5700 = vpow2.f32 %v3593_v62 }
0x2418   :  { %v5216_v63 = vpop.f32.mrb[70].mxu0 }
0x2419   :  { %v3784_v55 = vpop.f32.mrb[71].mxu0 }
0x241c   :  { %v5701_v37 = vpop.eup %5700 }
0x241d   :  { %v3599_v24 = vrot.slane %v5701_v37, 7  ;;  %v3596_v4 = vmul.f32 %v5701_v37, %v3595_v21 }
0x241f   :  { %v3601_v27 = vmul.f32 %v3599_v24, %v3595_v21  ;;  %v3597_v49 = vadd.f32 %v3596_v4, %v3519_v31 }
0x2421   :  { %v3603_v13 = vrot.slane %v3601_v27, 1 }
0x2423   :  { %v3605_v59 = vadd.f32 %v3603_v13, %v3519_v31 }
0x2425   :  { %3607 = vrot.lane.b32.xlu1 %v3605_v59, %s5745_s27  ;;  %v5747_v59 = vmov 1  }
0x2429   :  { %3610 = vrot.lane.b32.xlu1 %v6734_v45, %s5738_s30  ;;  %v3800_v45 = vld [vmem:[%s7016_s21 + $0x28] sm:$0xff] }
0x242a   :  { %v5512_v9 = vpack.c.bf16 %v3800_v45, %v3799_v58  ;;  %v4236_v45 = vld [vmem:[%s7018_s22 + $0x10] sm:$0xff] }
0x242c   :  { %5513 = vmatprep.subr.bf16.mxu0 %v5512_v9 }
0x242d   :  { %5515 = vmatpush3.bf16.msra.mxu0 %v5512_v9  ;;  %v4237_v9 = vld [vmem:[%s7018_s22 + $0x18] sm:$0xff] }
0x242e   :  { %5517 = vmatprep.subr.bf16.mxu0 %v5516_v51 }
0x2431   :  { %5519 = vmatpush3.bf16.msra.mxu0 %v5516_v51 }
0x2432   :  { %5521 = vmatprep.subr.bf16.mxu0 %v5520_v2 }
0x2435   :  { %5523 = vmatpush3.bf16.msra.mxu0 %v5520_v2 }
0x2436   :  { %5525 = vmatprep.subr.bf16.mxu0 %v5524_v10 }
0x2439   :  { %5527 = vmatpush3.bf16.msra.mxu0 %v5524_v10 }
0x243a   :  { %5534 = vmatprep.subr.bf16.mxu0 %v5739_v41 }
0x2497   :  { %v3608_v7 = vpop.permute.xlu1 %3607 }
0x2498   :  { %v3613_v50 = vsel %vm714_vm2, %v3597_v49, %v3608_v7  ;;  %v5748_v7 = vmov 2  }
0x249b   :  { %v3611_v15 = vpop.permute.xlu1 %3610 }
0x249c   :  { %v3614_v53 = vsel %vm121_vm0, %v3613_v50, %v3611_v15  ;;  %v6904_v50 = vld [vmem:[%s7017_s16] sm:$0xff]  ;;  %vm3952_vm0 = vcmask 257024  }
0x249d   :  { %5204 = vmatmul.mubr.msk.f32.vlgmr.msra.gmra.mrb[72].mxu1 %vm3634_vm12, %v3614_v53  ;;  %v4234_v15 = vld [vmem:[%s7018_s22] sm:$0xff]  ;;  %v4235_v53 = vld [vmem:[%s7018_s22 + $0x8] sm:$0xff] }
0x249e   :  { %5246 = vmatprep.mubr.msk.f32.mxu1 %vm5740_vm1, %v5737_v3  ;;  %5245 = vmatpush3.xpose.msk.msra.mxu1 %vm816_vm3, %v6904_v50  ;;  %v5535_v58 = vpack.c.bf16 %v4235_v53, %v4234_v15  ;;  %v3267_v53 = vadd.f32 %v6727_v42, %v6768_v48 }
0x249f   :  { %5528 = vmatprep.subr.bf16.mxu1 %v5739_v41 }
0x2570   :  { %v3704_v12 = vpop.f32.mrb[72].mxu1 }
0x2571   :  { %v3705_v14 = vadd.f32 %v3704_v12, %v3631_v11  ;;  %v5205_v0 = vpop.f32.mrb[73].mxu1 }
0x2573   :  { %v3711_v28 = vrot.slane %v3705_v14, %v5977_v52 }
0x2575   :  { %v3790_v56 = vadd.f32 %v5216_v63, %v3711_v28  ;;  %v3785_v5 = vadd.f32 %v3784_v55, %v3711_v28  ;;  %v5538_v63 = vpack.c.bf16 %v4237_v9, %v4236_v45  ;;  %v3918_v55 = vld [vmem:[%s7019_s15 + $0x8] sm:$0xf] }
0x2576   :  { %v3190_v9 = vld [vmem:[%s7011_s12 + $0x8] sm:$0x1] }
0x2577   :  { %5702 = vtanh.f32 %v3790_v56 }
0x2578   :  { %5704 = vtanh.f32 %v3785_v5 }
0x2581   :  { %v5703_v33 = vpop.eup %5702 }
0x2582   :  { %v5705_v17 = vpop.eup %5704 }
0x2583   :  { %5241 = vmatprep.mubr.msk.f32.mxu0 %vm3634_vm12, %v5705_v17 }
0x2584   :  { %5242 = vmatmul.mubr.msk.f32.vlgmr.msra.gmra.mrb[72].mxu0 %vm3634_vm12, %v5703_v33 }
0x2585   :  { %5273 = vmatprep.mubr.msk.f32.mxu0 %vm5740_vm1, %v5737_v3  ;;  %5536 = vmatpush3.bf16.msra.mxu0 %v5535_v58 }
0x2586   :  { %5537 = vmatprep.subr.bf16.mxu0 %v5739_v41 }
0x2589   :  { %5539 = vmatpush3.bf16.msra.mxu0 %v5538_v63 }
0x2657   :  { %v5243_v22 = vpop.f32.mrb[72].mxu0 }
0x2658   :  { %v3891_v52 = vsel %vm3890_vm13, %v5243_v22, -inf  ;;  %v3879_v31 = vpop.f32.mrb[73].mxu0 }
0x2659   :  { %v3889_v23 = vsel %vm3888_vm14, %v3879_v31, -inf }
0x265a   :  { %v3892_v62 = vmax.f32 %v3889_v23, %v3891_v52  ;;  %v4064_v23 = vld [vmem:[%s7020_s17 + $0x8] sm:$0xff] }
0x265c   :  { %v3893_v25 = vrot.slane %v3892_v62, 4 }
0x265e   :  { %v3894_v26 = vmax.f32 %v3892_v62, %v3893_v25 }
0x2660   :  { %v3895_v38 = vrot.slane %v3894_v26, 2 }
0x2662   :  { %v3896_v35 = vmax.f32 %v3894_v26, %v3895_v38 }
0x2664   :  { %v3897_v29 = vrot.slane %v3896_v35, 1 }
0x2666   :  { %v3898_v30 = vmax.f32 %v3896_v35, %v3897_v29 }
0x2668   :  { %v3899_v32 = vsub.f32 %v3879_v31, %v3898_v30  ;;  %v3900_v34 = vsub.f32 %v5243_v22, %v3898_v30  ;;  %v4063_v31 = vld [vmem:[%s7020_s17] sm:$0xff] }
0x2669   :  { %v5529_v30 = vpack.c.bf16 %v4064_v23, %v4063_v31  ;;  %v4343_v23 = vld [vmem:[%s7021_s13] sm:$0xff] }
0x266a   :  { %v3901_v46 = vmul.f32 1.442695, %v3899_v32  ;;  %v3903_v16 = vmul.f32 1.442695, %v3900_v34  ;;  %v4065_v34 = vld [vmem:[%s7020_s17 + $0x10] sm:$0xff] }
0x266c   :  { %5706 = vpow2.f32 %v3901_v46  ;;  %v4066_v46 = vld [vmem:[%s7020_s17 + $0x18] sm:$0xff] }
0x266d   :  { %5708 = vpow2.f32 %v3903_v16 }
0x2676   :  { %v5707_v18 = vpop.eup %5706 }
0x2677   :  { %v5709_v21 = vpop.eup %5708  ;;  %v3905_v37 = vsel %vm3888_vm14, %v5707_v18, 0.0 }
0x2678   :  { %v3906_v24 = vsel %vm3890_vm13, %v5709_v21, 0.0 }
0x2679   :  { %v3907_v4 = vadd.f32 %v3906_v24, %v3905_v37 }
0x267b   :  { %v3908_v54 = vrot.slane %v3907_v4, 4 }
0x267d   :  { %v3909_v57 = vadd.f32 %v3908_v54, %v3907_v4 }
0x267f   :  { %v3910_v6 = vrot.slane %v3909_v57, 2 }
0x2681   :  { %v3911_v27 = vadd.f32 %v3910_v6, %v3909_v57 }
0x2683   :  { %v3912_v49 = vrot.slane %v3911_v27, 1 }
0x2685   :  { %v3913_v43 = vadd.f32 %v3912_v49, %v3911_v27 }
0x2687   :  { %5710 = vrcp.f32 %v3913_v43 }
0x2691   :  { %v5711_v44 = vpop.eup %5710 }
0x2692   :  { %v3916_v47 = vmul.f32 %v5711_v44, %v5709_v21  ;;  %v3915_v13 = vmul.f32 %v5711_v44, %v5707_v18  ;;  %v4067_v44 = vld [vmem:[%s7020_s17 + $0x20] sm:$0x1] }
0x2694   :  { %3926 = vperm.xlu1 %5595, %v3916_v47   ;;  %3921 = vperm.xlu0 %5594, %v3915_v13  }
0x2698   :  { %5596 = vset.pattern.permute.xlu1 %v5747_v59  ;;  %5597 = vset.pattern.permute.xlu0 %v5747_v59 }
0x2699   :  { %3942 = vperm.xlu1 %5596, %v3915_v13   ;;  %3946 = vperm.xlu0 %5597, %v3916_v47  }
0x269d   :  { %5598 = vset.pattern.permute.xlu1 %v5748_v7 }
0x269e   :  { %3962 = vperm.xlu1 %5598, %v3915_v13   ;;  %v4068_v13 = vld [vmem:[%s7020_s17 + $0x21] sm:$0x1] }
0x26a2   :  { %3966 = vperm.xlu1 %5598, %v3916_v47  }
0x26a6   :  { %5599 = vset.pattern.permute.xlu1 %v5746_v19 }
0x2713   :  { %v3927_v36 = vpop.permute.xlu1 %3926  ;;  %v3922_v51 = vpop.permute.xlu0 %3921 }
0x2714   :  { %v3930_v39 = vmul.f32 %v3927_v36, %v3918_v55  ;;  %v3929_v1 = vmul.f32 %v3922_v51, %v3917_v61  ;;  %v3268_v36 = vadd.f32 %v3267_v53, %v3190_v9 }
0x2716   :  { %v3933_v20 = vsel %vm3932_vm15, %v3930_v39, 0.0  ;;  %v3931_v2 = vsel %vm816_vm3, %v3929_v1, 0.0  ;;  %v3270_v51 = vsel %vm3269_vm5, %v3268_v36, 0.0 }
0x2717   :  { %v3934_v8 = vadd.f32 %v3933_v20, %v3931_v2 }
0x2718   :  { %v3943_v10 = vpop.permute.xlu1 %3942  ;;  %v3947_v11 = vpop.permute.xlu0 %3946 }
0x2719   :  { %v3935_v12 = vrot.slane %v3934_v8, 4  ;;  %v3949_v14 = vmul.f32 %v3943_v10, %v6834_v40  ;;  %v3950_v0 = vmul.f32 %v3947_v11, %v6839_v60 }
0x271b   :  { %v3936_v28 = vadd.f32 %v3935_v12, %v3934_v8  ;;  %v3951_v56 = vsel %vm714_vm2, %v3949_v14, 0.0  ;;  %v3953_v5 = vsel %vm3952_vm0, %v3950_v0, 0.0 }
0x271c   :  { %v3954_v33 = vadd.f32 %v3953_v5, %v3951_v56 }
0x271d   :  { %v3937_v17 = vrot.slane %v3936_v28, 2  ;;  %v3963_v19 = vpop.permute.xlu1 %3962 }
0x271e   :  { %v3955_v22 = vrot.slane %v3954_v33, 4  ;;  %v3969_v25 = vmul.f32 %v3963_v19, %v6834_v40 }
0x271f   :  { %v3938_v52 = vadd.f32 %v3937_v17, %v3936_v28 }
0x2720   :  { %v3956_v62 = vadd.f32 %v3955_v22, %v3954_v33  ;;  %v3971_v18 = vsel %vm714_vm2, %v3969_v25, 0.0 }
0x2721   :  { %v3939_v26 = vrot.slane %v3938_v52, 1  ;;  %v3967_v38 = vpop.permute.xlu1 %3966 }
0x2722   :  { %v3957_v35 = vrot.slane %v3956_v62, 2  ;;  %v3970_v29 = vmul.f32 %v3967_v38, %v6839_v60  ;;  %v5532_v60 = vpack.c.bf16 %v4066_v46, %v4065_v34 }
0x2723   :  { %v3940_v32 = vadd.f32 %v3939_v26, %v3938_v52 }
0x2724   :  { %v3958_v16 = vadd.f32 %v3957_v35, %v3956_v62  ;;  %v3972_v40 = vsel %vm3952_vm0, %v3970_v29, 0.0 }
0x2725   :  { %v3973_v21 = vadd.f32 %v3972_v40, %v3971_v18  ;;  %5247 = vmatmul.mubr.msk.f32.vlgmr.msra.gmra.mrb[74].mxu1 %vm816_vm3, %v3940_v32  ;;  %v3191_v40 = vld [vmem:[%s7011_s12 + $0x9] sm:$0x1] }
0x2726   :  { %5530 = vmatpush3.bf16.msra.mxu1 %v5529_v30  ;;  %5257 = vmatprep.mubr.msk.f32.mxu1 %vm5740_vm1, %v5737_v3  ;;  %v3959_v37 = vrot.slane %v3958_v16, 1 }
0x2727   :  { %v3974_v24 = vrot.slane %v3973_v21, 4  ;;  %5531 = vmatprep.subr.bf16.mxu1 %v5739_v41 }
0x2728   :  { %v3960_v54 = vadd.f32 %v3959_v37, %v3958_v16 }
0x2729   :  { %v3975_v4 = vadd.f32 %v3974_v24, %v3973_v21 }
0x272a   :  { %5533 = vmatpush3.bf16.msra.mxu1 %v5532_v60 }
0x272b   :  { %v3976_v57 = vrot.slane %v3975_v4, 2  ;;  %5260 = vmatprep.subr.mxu1 %v5737_v3 }
0x272d   :  { %v3977_v6 = vadd.f32 %v3976_v57, %v3975_v4  ;;  %5258 = vmatmul.mubr.msk.f32.vlgmr.msra.gmra.mrb[76].mxu1 %vm714_vm2, %v3960_v54  ;;  %v3192_v4 = vld [vmem:[%s7011_s12 + $0xa] sm:$0x1] }
0x272e   :  { %5262 = vmatprep.mubr.msk.f32.mxu1 %vm5740_vm1, %v5737_v3 }
0x272f   :  { %v3978_v27 = vrot.slane %v3977_v6, 1 }
0x2731   :  { %v3979_v49 = vadd.f32 %v3978_v27, %v3977_v6 }
0x2733   :  { %5274 = vmatmul.mubr.msk.f32.vlgmr.msra.gmra.mrb[74].mxu0 %vm714_vm2, %v3979_v49  ;;  %5261 = vmatpush3.xpose.msk.msra.mxu1 %vm816_vm3, %v6904_v50  ;;  %v4238_v50 = vld [vmem:[%s7018_s22 + $0x20] sm:$0x1]  ;;  %vm4312_vm2 = vcmask 8192  }
0x2734   :  { %5276 = vmatprep.subr.mxu1 %v5737_v3 }
0x27f8   :  { %v4053_v41 = vpop.f32.mrb[74].mxu1 }
0x27f9   :  { %v5248_v43 = vpop.f32.mrb[75].mxu1  ;;  %v4557_v62 = vmul.f32 -1.442695, %v4053_v41 }
0x2800   :  { %v4138_v47 = vpop.f32.mrb[76].mxu1 }
0x2801   :  { %v4139_v59 = vadd.f32 %v4138_v47, %v4067_v44  ;;  %v5259_v7 = vpop.f32.mrb[77].mxu1 }
0x2803   :  { %v4142_v15 = vadd.f32 %v4139_v59, %v4068_v13 }
0x2805   :  { %v4144_v58 = vsel %vm4143_vm4, %v4142_v15, -inf }
0x2806   :  { %4145 = vmax.xlane.f32.xlu0 %v4144_v58  ;;  %v4308_v45 = vpop.f32.mrb[74].mxu0 }
0x2807   :  { %v4309_v63 = vadd.f32 %v4308_v45, %v4238_v50  ;;  %v5275_v55 = vpop.f32.mrb[75].mxu0 }
0x2809   :  { %v4313_v61 = vsel %vm4312_vm2, %v4309_v63, -inf }
0x280a   :  { %4314 = vmax.xlane.f32.xlu0 %v4313_v61 }
0x280e   :  { %3271 = vadd.xlane.f32.xlu0 %v3270_v51 }
0x2893   :  { %v4146_v42 = vpop.xlane.xlu0 %4145 }
0x2894   :  { %v4147_v48 = vsub.f32 %v4142_v15, %v4146_v42 }
0x2896   :  { %v4148_v39 = vmul.f32 1.442695, %v4147_v48 }
0x2897   :  { %v4315_v1 = vpop.xlane.xlu0 %4314 }
0x2898   :  { %5712 = vpow2.f32 %v4148_v39  ;;  %v4316_v20 = vsub.f32 %v4309_v63, %v4315_v1 }
0x289a   :  { %v4317_v2 = vmul.f32 1.442695, %v4316_v20 }
0x289b   :  { %v3272_v8 = vpop.xlane.xlu0 %3271 }
0x289c   :  { %5714 = vpow2.f32 %v4317_v2  ;;  %v3274_v10 = vmul.f32 0.125, %v3272_v8 }
0x289e   :  { %v3275_v11 = vsub.f32 %v3268_v36, %v3274_v10 }
0x28a0   :  { %v3276_v12 = vmul.f32 %v3275_v11, %v3275_v11 }
0x28a2   :  { %v5713_v14 = vpop.eup %5712  ;;  %v3277_v0 = vsel %vm3269_vm5, %v3276_v12, 0.0 }
0x28a3   :  { %v4150_v28 = vsel %vm4143_vm4, %v5713_v14, 0.0  ;;  %3278 = vadd.xlane.f32.xlu0 %v3277_v0 }
0x28a4   :  { %4151 = vadd.xlane.f32.xlu1 %v4150_v28 }
0x28a6   :  { %v5715_v56 = vpop.eup %5714 }
0x28a7   :  { %v4319_v5 = vsel %vm4312_vm2, %v5715_v56, 0.0 }
0x28a8   :  { %4320 = vadd.xlane.f32.xlu1 %v4319_v5 }
0x2930   :  { %v3279_v25 = vpop.xlane.xlu0 %3278 }
0x2931   :  { %v4152_v33 = vpop.xlane.xlu1 %4151  ;;  %v3280_v26 = vmul.f32 0.125, %v3279_v25 }
0x2932   :  { %5716 = vrcp.f32 %v4152_v33 }
0x2933   :  { %v3281_v30 = vadd.f32 1e-05, %v3280_v26 }
0x2935   :  { %v4321_v17 = vpop.xlane.xlu1 %4320 }
0x2936   :  { %5718 = vrcp.f32 %v4321_v17 }
0x2937   :  { %5720 = vpow2.f32 %v4557_v62 }
0x293c   :  { %v5717_v19 = vpop.eup %5716 }
0x293d   :  { %v4154_v22 = vmul.f32 %v5717_v19, %v5713_v14 }
0x293f   :  { %5263 = vmatmul.mubr.msk.f32.vlgmr.msra.gmra.mrb[78].mxu1 %vm816_vm3, %v4154_v22 }
0x2940   :  { %v5719_v52 = vpop.eup %5718  ;;  %5278 = vmatprep.mubr.msk.f32.mxu1 %vm5740_vm1, %v5737_v3  ;;  %5277 = vmatpush3.msra.mxu1 %v4343_v23  ;;  %vm4431_vm1 = vcmask 72704  }
0x2941   :  { %v4323_v31 = vmul.f32 %v5719_v52, %v5715_v56  ;;  %v5721_v32 = vpop.eup %5720 }
0x2942   :  { %v4060_v3 = vadd.f32 1.0, %v5721_v32 }
0x2943   :  { %4326 = vperm.xlu1 %5599, %v4323_v31   ;;  %4331 = vperm.xlu0 %5597, %v4323_v31  }
0x29c2   :  { %v4327_v21 = vpop.permute.xlu1 %4326  ;;  %v4332_v54 = vpop.permute.xlu0 %4331 }
0x2a12   :  { %v4224_v38 = vpop.f32.mrb[78].mxu1 }
0x2a13   :  { %v4561_v35 = vmul.f32 -1.442695, %v4224_v38  ;;  %v5264_v29 = vpop.f32.mrb[79].mxu1 }
0x2a15   :  { %5722 = vpow2.f32 %v4561_v35 }
0x2a16   :  { %5724 = vrsqrt.f32 %v3281_v30 }
0x2a17   :  { %5726 = vrcp.f32 %v4060_v3 }
0x2a1f   :  { %v5723_v34 = vpop.eup %5722 }
0x2a20   :  { %v4231_v46 = vadd.f32 1.0, %v5723_v34  ;;  %v5725_v16 = vpop.eup %5724 }
0x2a21   :  { %v3283_v18 = vmul.f32 %v5725_v16, %v3275_v11  ;;  %v5727_v60 = vpop.eup %5726 }
0x2a22   :  { %5728 = vrcp.f32 %v4231_v46  ;;  %v4329_v57 = vmul.f32 %v5727_v60, %v4327_v21 }
0x2a23   :  { %v3284_v37 = vmul.f32 %v3283_v18, %v3191_v40 }
0x2a25   :  { %v3285_v27 = vadd.f32 %v3284_v37, %v3192_v4 }
0x2a2c   :  { %v5729_v24 = vpop.eup %5728 }
0x2a2d   :  { %v4334_v6 = vmul.f32 %v5729_v24, %v4332_v54 }
0x2a2f   :  { %v4335_v49 = vadd.f32 %v4334_v6, %v4329_v57 }
0x2a31   :  { %v4336_v41 = vmul.f32 %v4335_v49, %v3285_v27 }
0x2a33   :  { %v4563_v43 = vmul.f32 -1.442695, %v4336_v41 }
0x2a35   :  { %5730 = vpow2.f32 %v4563_v43 }
0x2a3f   :  { %v5731_v44 = vpop.eup %5730 }
0x2a40   :  { %v4340_v47 = vadd.f32 1.0, %v5731_v44 }
0x2a42   :  { %5732 = vrcp.f32 %v4340_v47 }
0x2a4c   :  { %v5733_v13 = vpop.eup %5732 }
0x2a4d   :  { %5279 = vmatmul.mubr.msk.f32.vlgmr.msra.gmra.mrb[80].mxu1 %vm3193_vm11, %v5733_v13 }
0x2b20   :  { %v4413_v59 = vpop.f32.mrb[80].mxu1 }
0x2b21   :  { %v4417_v7 = vmul.f32 %v5733_v13, %v4413_v59  ;;  %v5280_v15 = vpop.f32.mrb[81].mxu1 }
0x2b23   :  { %v4418_v50 = vsel %vm3269_vm5, %v4417_v7, 0.0 }
0x2b24   :  { %4419 = vadd.xlane.f32.xlu1 %v4418_v50 }
0x2bb1   :  { %v4420_v53 = vpop.xlane.xlu1 %4419 }
0x2bb2   :  { %v4421_v58 = vrot.slane %v4420_v53, 4 }
0x2bb4   :  { %v4422_v45 = vadd.f32 %v4421_v58, %v4420_v53 }
0x2bb6   :  { %v4423_v9 = vrot.slane %v4422_v45, 2 }
0x2bb8   :  { %v4424_v63 = vadd.f32 %v4423_v9, %v4422_v45 }
0x2bba   :  { %v4425_v55 = vrot.slane %v4424_v63, 1 }
0x2bbc   :  { %v4426_v61 = vadd.f32 %v4425_v55, %v4424_v63 }
0x2bbe   :  { %5540 = vpush %v4426_v61 }
0x2bef   :  { %s5541_s12 = spop %5540 }
0x2bf0   :  { %v4428_v36 = vstv %s5541_s12 }
0x2bf1   :  { %v4429_v51 = vmul.f32 0.0005, %v4428_v36 }
0x2bf3   :  { %v4430_v42 = vsel %vm3193_vm11, %v4336_v41, %v4429_v51 }
0x2bf4   :  { %v4432_v48 = vsel %vm4431_vm1, %v4430_v42, 0.0 }
0x2bf5   :  { %4433 = vst [vmem:[%s7022_s23] sm:$0x1] %v4432_v48 }

</bundles_post_ra>
